<compile_context>
chip_gen: v6e
topology: v6e:2x2x1
jax: 0.10.0
libtpu: 0.0.40
codegen_flags: <defaults>
</compile_context>

<pallas_src>
import jax
import jax.numpy as jnp
from jax import lax
from jax.experimental import pallas as pl
from jax.experimental.pallas import tpu as pltpu


# ----------------------------- Pallas kernel -------------------------------


def generator_kernel(x_ref,
                     wih0, whh0, b0,
                     wih1, whh1, b1,
                     wih2, whh2, b2,
                     w1f, b1f, w2f, b2f, w3p, b3p,
                     out_ref):
    """Fused 3-layer LSTM (wavefront-scheduled) + (BN-folded) MLP head.

    x_ref:   (T, Bb, Dp)   time-major, padded input
    out_ref: (T, Bb, Op)   padded output
    LSTM weights use the packed gate layout (in, 4*H) with PyTorch gate order
    (i, f, g, o); hidden state stays at its true width H.
    """
    T, Bb, Dp = x_ref.shape
    H = whh0.shape[0]          # true hidden size
    G = whh0.shape[1]          # gate width = 4*H (lane-dense when H % 32 == 0)
    f32 = jnp.float32
    num_layers = 3

    # ---- layer-0 input projection hoisted: one MXU matmul for all timesteps
    x_flat = x_ref[...].reshape(T * Bb, Dp)
    gin0 = (jnp.dot(x_flat, wih0[...], preferred_element_type=f32)
            + b0[...]).reshape(T, Bb, G)

    wih = (None, wih1[...], wih2[...])
    whh = (whh0[...], whh1[...], whh2[...])
    bias = (None, b1[...], b2[...])

    def cell(l, gin, h_prev, c_prev):
        gates = gin + jnp.dot(h_prev, whh[l], preferred_element_type=f32)
        s = jax.nn.sigmoid(gates)      # valid for i, f, o lanes
        tg = jnp.tanh(gates)           # valid for g lanes
        i = s[:, 0 * H:1 * H]
        f = s[:, 1 * H:2 * H]
        g = tg[:, 2 * H:3 * H]
        o = s[:, 3 * H:4 * H]
        c_new = f * c_prev + i * g
        h_new = o * jnp.tanh(c_new)
        return h_new, c_new

    zero_state = jnp.zeros((Bb, H), f32)
    h = [zero_state] * num_layers
    c = [zero_state] * num_layers
    outs = [[None] * T for _ in range(num_layers)]

    # Wavefront: cell (l, t) runs at step t + l.  Cells within one step are
    # mutually independent, so the (fully unrolled) scheduler can overlap the
    # MXU / EUP / VPU work of different layers.
    for step in range(T + num_layers - 1):
        for l in range(num_layers):
            t = step - l
            if 0 <= t < T:
                if l == 0:
                    gin = gin0[t]
                else:
                    gin = (jnp.dot(outs[l - 1][t], wih[l],
                                   preferred_element_type=f32) + bias[l])
                h[l], c[l] = cell(l, gin, h[l], c[l])
                outs[l][t] = h[l]

    # ---- fused FC head: Linear->(BN folded)->ReLU->Linear->(BN folded)->ReLU
    #      ->Linear->Tanh.  Dropout(0.3) = identity in eval mode.
    xf = jnp.concatenate(outs[num_layers - 1], axis=0)          # (T*Bb, H)
    h1 = jnp.maximum(
        jnp.dot(xf, w1f[...], preferred_element_type=f32) + b1f[...], 0.0)
    h2 = jnp.maximum(
        jnp.dot(h1, w2f[...], preferred_element_type=f32) + b2f[...], 0.0)
    y = jnp.tanh(
        jnp.dot(h2, w3p[...], preferred_element_type=f32) + b3p[...])
    out_ref[...] = y.reshape(T, Bb, out_ref.shape[-1])


# ------------------------------ padding utils ------------------------------


def _rup(n, m):
    return ((n + m - 1) // m) * m


def _pad_rows(w, rows):
    return jnp.pad(w, ((0, rows - w.shape[0]), (0, 0)))


def _pad2(a, rows, cols):
    return jnp.pad(a, ((0, rows - a.shape[0]), (0, cols - a.shape[1])))


# ------------------------------ wrapper glue -------------------------------


def init_params(key, music_dim, condition_dim, hidden_dim, output_dim,
                num_layers=3):
    """Deterministic synthetic init (uniform, PyTorch-like scale)."""
    din = music_dim + condition_dim
    params = {"hidden": hidden_dim, "output": output_dim}
    k = 1.0 / jnp.sqrt(hidden_dim)
    keys = iter(list(jax.random.split(key, 4 * num_layers + 6)))

    lstm = []
    in_dim = din
    for _ in range(num_layers):
        wih = jax.random.uniform(next(keys), (in_dim, 4 * hidden_dim),
                                 jnp.float32, -k, k)
        whh = jax.random.uniform(next(keys), (hidden_dim, 4 * hidden_dim),
                                 jnp.float32, -k, k)
        b_ih = jax.random.uniform(next(keys), (4 * hidden_dim,),
                                  jnp.float32, -k, k)
        b_hh = jax.random.uniform(next(keys), (4 * hidden_dim,),
                                  jnp.float32, -k, k)
        lstm.append((wih, whh, (b_ih + b_hh).reshape(1, 4 * hidden_dim)))
        in_dim = hidden_dim
    params["lstm"] = lstm

    def linear(kw, kb, fan_in, fan_out):
        s = 1.0 / jnp.sqrt(fan_in)
        w = jax.random.uniform(kw, (fan_in, fan_out), jnp.float32, -s, s)
        b = jax.random.uniform(kb, (fan_out,), jnp.float32, -s, s)
        return w, b.reshape(1, fan_out)

    params["fc1"] = linear(next(keys), next(keys), hidden_dim, hidden_dim)
    params["fc2"] = linear(next(keys), next(keys), hidden_dim, hidden_dim)
    params["fc3"] = linear(next(keys), next(keys), hidden_dim, output_dim)

    def bn(dim):
        return (jnp.ones((1, dim), jnp.float32),    # gamma
                jnp.zeros((1, dim), jnp.float32),   # beta
                jnp.zeros((1, dim), jnp.float32),   # running mean
                jnp.ones((1, dim), jnp.float32))    # running var
    params["bn1"] = bn(hidden_dim)
    params["bn2"] = bn(hidden_dim)
    return params


def generator_forward(x, condition, params):
    B, T, fm = x.shape
    H = params["hidden"]
    O = params["output"]
    Cd = condition.shape[1]
    Din = fm + Cd
    G = 4 * H                      # packed gate width (128 for H=32)

    Dp = _rup(Din, 128)            # lane-dense input feature dim
    Hp = _rup(H, 128)              # lane-dense FC-head width
    Op = _rup(O, 128)              # lane-dense output dim

    # Batch blocking: fill MXU rows for real batches; keep >= 2 grid blocks
    # when the batch allows it so both v7x TensorCores get a block.
    Bpad = _rup(max(B, 8), 8)
    if Bpad >= 16:
        Bblk = min(128, max(8, ((Bpad // 2) // 8) * 8))
        Bpad = _rup(Bpad, Bblk)
    else:
        Bblk = Bpad
    n_blocks = Bpad // Bblk

    # concat condition (matches torch.cat((x, cond_exp), 2)), time-major, pad.
    cond = jnp.broadcast_to(condition[:, None, :], (B, T, Cd))
    xc = jnp.concatenate([x, cond], axis=2).astype(jnp.float32)   # (B, T, Din)
    xt = jnp.transpose(xc, (1, 0, 2))                             # (T, B, Din)
    xt = jnp.pad(xt, ((0, 0), (0, Bpad - B), (0, Dp - Din)))      # (T, Bpad, Dp)

    # ---- LSTM weights: packed gate layout (in, 4*H), PyTorch (i,f,g,o) order.
    #      Only layer 0 needs zero row-padding (Din -> Dp); padded input
    #      columns are zero so the math on real rows/cols is exact.
    (wih0, whh0, bl0), (wih1, whh1, bl1), (wih2, whh2, bl2) = params["lstm"]
    wih0p = _pad_rows(wih0, Dp)

    # ---- fold eval-mode BatchNorm into the Linear weights, then pad the
    #      FC head to lane-dense width (padded cols get 0 bias -> ReLU keeps 0).
    eps = 1e-5
    w1, b1 = params["fc1"]
    w2, b2 = params["fc2"]
    w3, b3 = params["fc3"]
    g1, be1, m1, v1 = params["bn1"]
    g2, be2, m2, v2 = params["bn2"]
    s1 = g1 * lax.rsqrt(v1 + eps)
    s2 = g2 * lax.rsqrt(v2 + eps)
    w1f = _pad2(w1 * s1, H, Hp)
    b1f = _pad2((b1 - m1) * s1 + be1, 1, Hp)
    w2f = _pad2(w2 * s2, Hp, Hp)
    b2f = _pad2((b2 - m2) * s2 + be2, 1, Hp)
    w3p = _pad2(w3, Hp, Op)
    b3p = _pad2(b3, 1, Op)

    def _full(shape):
        zeros = (0,) * len(shape)
        return pl.BlockSpec(shape, lambda bb: zeros)

    out = pl.pallas_call(
        generator_kernel,
        out_shape=jax.ShapeDtypeStruct((T, Bpad, Op), jnp.float32),
        grid_spec=pltpu.PrefetchScalarGridSpec(
            num_scalar_prefetch=0,
            grid=(n_blocks,),
            in_specs=[
                pl.BlockSpec((T, Bblk, Dp), lambda bb: (0, bb, 0)),
                _full((Dp, G)), _full((H, G)), _full((1, G)),
                _full((H, G)), _full((H, G)), _full((1, G)),
                _full((H, G)), _full((H, G)), _full((1, G)),
                _full((H, Hp)), _full((1, Hp)),
                _full((Hp, Hp)), _full((1, Hp)),
                _full((Hp, Op)), _full((1, Op)),
            ],
            out_specs=pl.BlockSpec((T, Bblk, Op), lambda bb: (0, bb, 0)),
        ),
        compiler_params=pltpu.CompilerParams(
            dimension_semantics=("parallel",)),
    )(xt, wih0p, whh0, bl0, wih1, whh1, bl1, wih2, whh2, bl2,
      w1f, b1f, w2f, b2f, w3p, b3p)

    # back to batch_first, strip batch / output padding
    return jnp.transpose(out, (1, 0, 2))[:B, :, :O]


# --------------------------------- driver ----------------------------------

if __name__ == "__main__":
    # small, module-consistent shapes
    B, T = 2, 8
    MUSIC_DIM, COND_DIM = 12, 4
    HIDDEN, OUTPUT = 32, 48

    key = jax.random.PRNGKey(0)
    k_x, k_c, k_p = jax.random.split(key, 3)

    x = jax.random.normal(k_x, (B, T, MUSIC_DIM), jnp.float32)
    condition = jax.random.normal(k_c, (B, COND_DIM), jnp.float32)
    params = init_params(k_p, MUSIC_DIM, COND_DIM, HIDDEN, OUTPUT)

    out = generator_forward(x, condition, params)
    out = jax.block_until_ready(out)

    assert out.shape == (B, T, OUTPUT)
    assert bool(jnp.all(jnp.isfinite(out)))
    assert bool(jnp.all(jnp.abs(out) <= 1.0))  # Tanh output range
    print("KERNEL_OK")
</pallas_src>

<mosaic_0001>
module attributes {stable_mosaic.version = 11 : i64} {
  func.func @generator_kernel(%arg0: i32, %arg1: memref<8x8x128xf32, #tpu.memory_space<vmem>>, %arg2: memref<128x128xf32, #tpu.memory_space<vmem>>, %arg3: memref<32x128xf32, #tpu.memory_space<vmem>>, %arg4: memref<1x128xf32, #tpu.memory_space<vmem>>, %arg5: memref<32x128xf32, #tpu.memory_space<vmem>>, %arg6: memref<32x128xf32, #tpu.memory_space<vmem>>, %arg7: memref<1x128xf32, #tpu.memory_space<vmem>>, %arg8: memref<32x128xf32, #tpu.memory_space<vmem>>, %arg9: memref<32x128xf32, #tpu.memory_space<vmem>>, %arg10: memref<1x128xf32, #tpu.memory_space<vmem>>, %arg11: memref<32x128xf32, #tpu.memory_space<vmem>>, %arg12: memref<1x128xf32, #tpu.memory_space<vmem>>, %arg13: memref<128x128xf32, #tpu.memory_space<vmem>>, %arg14: memref<1x128xf32, #tpu.memory_space<vmem>>, %arg15: memref<128x128xf32, #tpu.memory_space<vmem>>, %arg16: memref<1x128xf32, #tpu.memory_space<vmem>>, %arg17: memref<8x8x128xf32, #tpu.memory_space<vmem>>) attributes {dimension_semantics = [#tpu.dimension_semantics<parallel>], iteration_bounds = array<i64: 1>, scalar_prefetch = 0 : i64, scratch_operands = 0 : i64, tpu.core_type = #tpu.core_type<tc>, window_params = [{transform_indices = @transform_0, window_bounds = array<i64: 8, 8, 128>}, {pipeline_mode = #tpu.pipeline_mode<synchronous>, transform_indices = @transform_1, window_bounds = array<i64: 128, 128>}, {pipeline_mode = #tpu.pipeline_mode<synchronous>, transform_indices = @transform_2, window_bounds = array<i64: 32, 128>}, {pipeline_mode = #tpu.pipeline_mode<synchronous>, transform_indices = @transform_3, window_bounds = array<i64: 1, 128>}, {pipeline_mode = #tpu.pipeline_mode<synchronous>, transform_indices = @transform_4, window_bounds = array<i64: 32, 128>}, {pipeline_mode = #tpu.pipeline_mode<synchronous>, transform_indices = @transform_5, window_bounds = array<i64: 32, 128>}, {pipeline_mode = #tpu.pipeline_mode<synchronous>, transform_indices = @transform_6, window_bounds = array<i64: 1, 128>}, {pipeline_mode = #tpu.pipeline_mode<synchronous>, transform_indices = @transform_7, window_bounds = array<i64: 32, 128>}, {pipeline_mode = #tpu.pipeline_mode<synchronous>, transform_indices = @transform_8, window_bounds = array<i64: 32, 128>}, {pipeline_mode = #tpu.pipeline_mode<synchronous>, transform_indices = @transform_9, window_bounds = array<i64: 1, 128>}, {pipeline_mode = #tpu.pipeline_mode<synchronous>, transform_indices = @transform_10, window_bounds = array<i64: 32, 128>}, {pipeline_mode = #tpu.pipeline_mode<synchronous>, transform_indices = @transform_11, window_bounds = array<i64: 1, 128>}, {pipeline_mode = #tpu.pipeline_mode<synchronous>, transform_indices = @transform_12, window_bounds = array<i64: 128, 128>}, {pipeline_mode = #tpu.pipeline_mode<synchronous>, transform_indices = @transform_13, window_bounds = array<i64: 1, 128>}, {pipeline_mode = #tpu.pipeline_mode<synchronous>, transform_indices = @transform_14, window_bounds = array<i64: 128, 128>}, {pipeline_mode = #tpu.pipeline_mode<synchronous>, transform_indices = @transform_15, window_bounds = array<i64: 1, 128>}, {transform_indices = @transform_16, window_bounds = array<i64: 8, 8, 128>}]} {
    %c0 = arith.constant 0 : index
    %c0_0 = arith.constant 0 : index
    %c0_1 = arith.constant 0 : index
    %0 = vector.load %arg1[%c0, %c0_0, %c0_1] : memref<8x8x128xf32, #tpu.memory_space<vmem>>, vector<8x8x128xf32>
    %1 = vector.shape_cast %0 : vector<8x8x128xf32> to vector<64x128xf32>
    %c0_2 = arith.constant 0 : index
    %c0_3 = arith.constant 0 : index
    %2 = vector.load %arg2[%c0_2, %c0_3] : memref<128x128xf32, #tpu.memory_space<vmem>>, vector<128x128xf32>
    %cst = arith.constant dense<0.000000e+00> : vector<64x128xf32>
    %3 = tpu.matmul %1, %2, %cst {dimension_numbers = #tpu.dot_dimension_numbers<[1], [0], [0], [1], [0, 0, 1, 1], [], []>} : vector<64x128xf32>, vector<128x128xf32>, vector<64x128xf32> -> vector<64x128xf32>
    %c0_4 = arith.constant 0 : index
    %c0_5 = arith.constant 0 : index
    %4 = vector.load %arg4[%c0_4, %c0_5] : memref<1x128xf32, #tpu.memory_space<vmem>>, vector<1x128xf32>
    %5 = vector.broadcast %4 : vector<1x128xf32> to vector<64x128xf32>
    %6 = arith.addf %3, %5 : vector<64x128xf32>
    %7 = vector.shape_cast %6 : vector<64x128xf32> to vector<8x8x128xf32>
    %c0_6 = arith.constant 0 : index
    %c0_7 = arith.constant 0 : index
    %8 = vector.load %arg5[%c0_6, %c0_7] : memref<32x128xf32, #tpu.memory_space<vmem>>, vector<32x128xf32>
    %c0_8 = arith.constant 0 : index
    %c0_9 = arith.constant 0 : index
    %9 = vector.load %arg8[%c0_8, %c0_9] : memref<32x128xf32, #tpu.memory_space<vmem>>, vector<32x128xf32>
    %c0_10 = arith.constant 0 : index
    %c0_11 = arith.constant 0 : index
    %10 = vector.load %arg3[%c0_10, %c0_11] : memref<32x128xf32, #tpu.memory_space<vmem>>, vector<32x128xf32>
    %c0_12 = arith.constant 0 : index
    %c0_13 = arith.constant 0 : index
    %11 = vector.load %arg6[%c0_12, %c0_13] : memref<32x128xf32, #tpu.memory_space<vmem>>, vector<32x128xf32>
    %c0_14 = arith.constant 0 : index
    %c0_15 = arith.constant 0 : index
    %12 = vector.load %arg9[%c0_14, %c0_15] : memref<32x128xf32, #tpu.memory_space<vmem>>, vector<32x128xf32>
    %c0_16 = arith.constant 0 : index
    %c0_17 = arith.constant 0 : index
    %13 = vector.load %arg7[%c0_16, %c0_17] : memref<1x128xf32, #tpu.memory_space<vmem>>, vector<1x128xf32>
    %c0_18 = arith.constant 0 : index
    %c0_19 = arith.constant 0 : index
    %14 = vector.load %arg10[%c0_18, %c0_19] : memref<1x128xf32, #tpu.memory_space<vmem>>, vector<1x128xf32>
    %cst_20 = arith.constant 0.000000e+00 : f32
    %15 = vector.broadcast %cst_20 : f32 to vector<8x32xf32>
    %16 = vector.extract_strided_slice %7 {offsets = [0, 0, 0], sizes = [1, 8, 128], strides = [1, 1, 1]} : vector<8x8x128xf32> to vector<1x8x128xf32>
    %17 = vector.shape_cast %16 : vector<1x8x128xf32> to vector<8x128xf32>
    %cst_21 = arith.constant dense<0.000000e+00> : vector<8x128xf32>
    %18 = tpu.matmul %15, %10, %cst_21 {dimension_numbers = #tpu.dot_dimension_numbers<[1], [0], [0], [1], [0, 0, 1, 1], [], []>} : vector<8x32xf32>, vector<32x128xf32>, vector<8x128xf32> -> vector<8x128xf32>
    %19 = arith.addf %17, %18 : vector<8x128xf32>
    %20 = arith.negf %19 : vector<8x128xf32>
    %21 = math.exp %20 : vector<8x128xf32>
    %cst_22 = arith.constant 1.000000e+00 : f32
    %22 = vector.broadcast %cst_22 : f32 to vector<8x128xf32>
    %23 = arith.addf %22, %21 : vector<8x128xf32>
    %24 = arith.divf %22, %23 : vector<8x128xf32>
    %25 = math.tanh %19 : vector<8x128xf32>
    %26 = vector.extract_strided_slice %24 {offsets = [0, 0], sizes = [8, 32], strides = [1, 1]} : vector<8x128xf32> to vector<8x32xf32>
    %27 = vector.extract_strided_slice %24 {offsets = [0, 32], sizes = [8, 32], strides = [1, 1]} : vector<8x128xf32> to vector<8x32xf32>
    %28 = vector.extract_strided_slice %25 {offsets = [0, 64], sizes = [8, 32], strides = [1, 1]} : vector<8x128xf32> to vector<8x32xf32>
    %29 = vector.extract_strided_slice %24 {offsets = [0, 96], sizes = [8, 32], strides = [1, 1]} : vector<8x128xf32> to vector<8x32xf32>
    %30 = arith.mulf %27, %15 : vector<8x32xf32>
    %31 = arith.mulf %26, %28 : vector<8x32xf32>
    %32 = arith.addf %30, %31 : vector<8x32xf32>
    %33 = math.tanh %32 : vector<8x32xf32>
    %34 = arith.mulf %29, %33 : vector<8x32xf32>
    %35 = vector.extract_strided_slice %7 {offsets = [1, 0, 0], sizes = [1, 8, 128], strides = [1, 1, 1]} : vector<8x8x128xf32> to vector<1x8x128xf32>
    %36 = vector.shape_cast %35 : vector<1x8x128xf32> to vector<8x128xf32>
    %cst_23 = arith.constant dense<0.000000e+00> : vector<8x128xf32>
    %37 = tpu.matmul %34, %10, %cst_23 {dimension_numbers = #tpu.dot_dimension_numbers<[1], [0], [0], [1], [0, 0, 1, 1], [], []>} : vector<8x32xf32>, vector<32x128xf32>, vector<8x128xf32> -> vector<8x128xf32>
    %38 = arith.addf %36, %37 : vector<8x128xf32>
    %39 = arith.negf %38 : vector<8x128xf32>
    %40 = math.exp %39 : vector<8x128xf32>
    %cst_24 = arith.constant 1.000000e+00 : f32
    %41 = vector.broadcast %cst_24 : f32 to vector<8x128xf32>
    %42 = arith.addf %41, %40 : vector<8x128xf32>
    %43 = arith.divf %41, %42 : vector<8x128xf32>
    %44 = math.tanh %38 : vector<8x128xf32>
    %45 = vector.extract_strided_slice %43 {offsets = [0, 0], sizes = [8, 32], strides = [1, 1]} : vector<8x128xf32> to vector<8x32xf32>
    %46 = vector.extract_strided_slice %43 {offsets = [0, 32], sizes = [8, 32], strides = [1, 1]} : vector<8x128xf32> to vector<8x32xf32>
    %47 = vector.extract_strided_slice %44 {offsets = [0, 64], sizes = [8, 32], strides = [1, 1]} : vector<8x128xf32> to vector<8x32xf32>
    %48 = vector.extract_strided_slice %43 {offsets = [0, 96], sizes = [8, 32], strides = [1, 1]} : vector<8x128xf32> to vector<8x32xf32>
    %49 = arith.mulf %46, %32 : vector<8x32xf32>
    %50 = arith.mulf %45, %47 : vector<8x32xf32>
    %51 = arith.addf %49, %50 : vector<8x32xf32>
    %52 = math.tanh %51 : vector<8x32xf32>
    %53 = arith.mulf %48, %52 : vector<8x32xf32>
    %cst_25 = arith.constant dense<0.000000e+00> : vector<8x128xf32>
    %54 = tpu.matmul %34, %8, %cst_25 {dimension_numbers = #tpu.dot_dimension_numbers<[1], [0], [0], [1], [0, 0, 1, 1], [], []>} : vector<8x32xf32>, vector<32x128xf32>, vector<8x128xf32> -> vector<8x128xf32>
    %55 = vector.broadcast %13 : vector<1x128xf32> to vector<8x128xf32>
    %56 = arith.addf %54, %55 : vector<8x128xf32>
    %cst_26 = arith.constant dense<0.000000e+00> : vector<8x128xf32>
    %57 = tpu.matmul %15, %11, %cst_26 {dimension_numbers = #tpu.dot_dimension_numbers<[1], [0], [0], [1], [0, 0, 1, 1], [], []>} : vector<8x32xf32>, vector<32x128xf32>, vector<8x128xf32> -> vector<8x128xf32>
    %58 = arith.addf %56, %57 : vector<8x128xf32>
    %59 = arith.negf %58 : vector<8x128xf32>
    %60 = math.exp %59 : vector<8x128xf32>
    %cst_27 = arith.constant 1.000000e+00 : f32
    %61 = vector.broadcast %cst_27 : f32 to vector<8x128xf32>
    %62 = arith.addf %61, %60 : vector<8x128xf32>
    %63 = arith.divf %61, %62 : vector<8x128xf32>
    %64 = math.tanh %58 : vector<8x128xf32>
    %65 = vector.extract_strided_slice %63 {offsets = [0, 0], sizes = [8, 32], strides = [1, 1]} : vector<8x128xf32> to vector<8x32xf32>
    %66 = vector.extract_strided_slice %63 {offsets = [0, 32], sizes = [8, 32], strides = [1, 1]} : vector<8x128xf32> to vector<8x32xf32>
    %67 = vector.extract_strided_slice %64 {offsets = [0, 64], sizes = [8, 32], strides = [1, 1]} : vector<8x128xf32> to vector<8x32xf32>
    %68 = vector.extract_strided_slice %63 {offsets = [0, 96], sizes = [8, 32], strides = [1, 1]} : vector<8x128xf32> to vector<8x32xf32>
    %69 = arith.mulf %66, %15 : vector<8x32xf32>
    %70 = arith.mulf %65, %67 : vector<8x32xf32>
    %71 = arith.addf %69, %70 : vector<8x32xf32>
    %72 = math.tanh %71 : vector<8x32xf32>
    %73 = arith.mulf %68, %72 : vector<8x32xf32>
    %74 = vector.extract_strided_slice %7 {offsets = [2, 0, 0], sizes = [1, 8, 128], strides = [1, 1, 1]} : vector<8x8x128xf32> to vector<1x8x128xf32>
    %75 = vector.shape_cast %74 : vector<1x8x128xf32> to vector<8x128xf32>
    %cst_28 = arith.constant dense<0.000000e+00> : vector<8x128xf32>
    %76 = tpu.matmul %53, %10, %cst_28 {dimension_numbers = #tpu.dot_dimension_numbers<[1], [0], [0], [1], [0, 0, 1, 1], [], []>} : vector<8x32xf32>, vector<32x128xf32>, vector<8x128xf32> -> vector<8x128xf32>
    %77 = arith.addf %75, %76 : vector<8x128xf32>
    %78 = arith.negf %77 : vector<8x128xf32>
    %79 = math.exp %78 : vector<8x128xf32>
    %cst_29 = arith.constant 1.000000e+00 : f32
    %80 = vector.broadcast %cst_29 : f32 to vector<8x128xf32>
    %81 = arith.addf %80, %79 : vector<8x128xf32>
    %82 = arith.divf %80, %81 : vector<8x128xf32>
    %83 = math.tanh %77 : vector<8x128xf32>
    %84 = vector.extract_strided_slice %82 {offsets = [0, 0], sizes = [8, 32], strides = [1, 1]} : vector<8x128xf32> to vector<8x32xf32>
    %85 = vector.extract_strided_slice %82 {offsets = [0, 32], sizes = [8, 32], strides = [1, 1]} : vector<8x128xf32> to vector<8x32xf32>
    %86 = vector.extract_strided_slice %83 {offsets = [0, 64], sizes = [8, 32], strides = [1, 1]} : vector<8x128xf32> to vector<8x32xf32>
    %87 = vector.extract_strided_slice %82 {offsets = [0, 96], sizes = [8, 32], strides = [1, 1]} : vector<8x128xf32> to vector<8x32xf32>
    %88 = arith.mulf %85, %51 : vector<8x32xf32>
    %89 = arith.mulf %84, %86 : vector<8x32xf32>
    %90 = arith.addf %88, %89 : vector<8x32xf32>
    %91 = math.tanh %90 : vector<8x32xf32>
    %92 = arith.mulf %87, %91 : vector<8x32xf32>
    %cst_30 = arith.constant dense<0.000000e+00> : vector<8x128xf32>
    %93 = tpu.matmul %53, %8, %cst_30 {dimension_numbers = #tpu.dot_dimension_numbers<[1], [0], [0], [1], [0, 0, 1, 1], [], []>} : vector<8x32xf32>, vector<32x128xf32>, vector<8x128xf32> -> vector<8x128xf32>
    %94 = vector.broadcast %13 : vector<1x128xf32> to vector<8x128xf32>
    %95 = arith.addf %93, %94 : vector<8x128xf32>
    %cst_31 = arith.constant dense<0.000000e+00> : vector<8x128xf32>
    %96 = tpu.matmul %73, %11, %cst_31 {dimension_numbers = #tpu.dot_dimension_numbers<[1], [0], [0], [1], [0, 0, 1, 1], [], []>} : vector<8x32xf32>, vector<32x128xf32>, vector<8x128xf32> -> vector<8x128xf32>
    %97 = arith.addf %95, %96 : vector<8x128xf32>
    %98 = arith.negf %97 : vector<8x128xf32>
    %99 = math.exp %98 : vector<8x128xf32>
    %cst_32 = arith.constant 1.000000e+00 : f32
    %100 = vector.broadcast %cst_32 : f32 to vector<8x128xf32>
    %101 = arith.addf %100, %99 : vector<8x128xf32>
    %102 = arith.divf %100, %101 : vector<8x128xf32>
    %103 = math.tanh %97 : vector<8x128xf32>
    %104 = vector.extract_strided_slice %102 {offsets = [0, 0], sizes = [8, 32], strides = [1, 1]} : vector<8x128xf32> to vector<8x32xf32>
    %105 = vector.extract_strided_slice %102 {offsets = [0, 32], sizes = [8, 32], strides = [1, 1]} : vector<8x128xf32> to vector<8x32xf32>
    %106 = vector.extract_strided_slice %103 {offsets = [0, 64], sizes = [8, 32], strides = [1, 1]} : vector<8x128xf32> to vector<8x32xf32>
    %107 = vector.extract_strided_slice %102 {offsets = [0, 96], sizes = [8, 32], strides = [1, 1]} : vector<8x128xf32> to vector<8x32xf32>
    %108 = arith.mulf %105, %71 : vector<8x32xf32>
    %109 = arith.mulf %104, %106 : vector<8x32xf32>
    %110 = arith.addf %108, %109 : vector<8x32xf32>
    %111 = math.tanh %110 : vector<8x32xf32>
    %112 = arith.mulf %107, %111 : vector<8x32xf32>
    %cst_33 = arith.constant dense<0.000000e+00> : vector<8x128xf32>
    %113 = tpu.matmul %73, %9, %cst_33 {dimension_numbers = #tpu.dot_dimension_numbers<[1], [0], [0], [1], [0, 0, 1, 1], [], []>} : vector<8x32xf32>, vector<32x128xf32>, vector<8x128xf32> -> vector<8x128xf32>
    %114 = vector.broadcast %14 : vector<1x128xf32> to vector<8x128xf32>
    %115 = arith.addf %113, %114 : vector<8x128xf32>
    %cst_34 = arith.constant dense<0.000000e+00> : vector<8x128xf32>
    %116 = tpu.matmul %15, %12, %cst_34 {dimension_numbers = #tpu.dot_dimension_numbers<[1], [0], [0], [1], [0, 0, 1, 1], [], []>} : vector<8x32xf32>, vector<32x128xf32>, vector<8x128xf32> -> vector<8x128xf32>
    %117 = arith.addf %115, %116 : vector<8x128xf32>
    %118 = arith.negf %117 : vector<8x128xf32>
    %119 = math.exp %118 : vector<8x128xf32>
    %cst_35 = arith.constant 1.000000e+00 : f32
    %120 = vector.broadcast %cst_35 : f32 to vector<8x128xf32>
    %121 = arith.addf %120, %119 : vector<8x128xf32>
    %122 = arith.divf %120, %121 : vector<8x128xf32>
    %123 = math.tanh %117 : vector<8x128xf32>
    %124 = vector.extract_strided_slice %122 {offsets = [0, 0], sizes = [8, 32], strides = [1, 1]} : vector<8x128xf32> to vector<8x32xf32>
    %125 = vector.extract_strided_slice %122 {offsets = [0, 32], sizes = [8, 32], strides = [1, 1]} : vector<8x128xf32> to vector<8x32xf32>
    %126 = vector.extract_strided_slice %123 {offsets = [0, 64], sizes = [8, 32], strides = [1, 1]} : vector<8x128xf32> to vector<8x32xf32>
    %127 = vector.extract_strided_slice %122 {offsets = [0, 96], sizes = [8, 32], strides = [1, 1]} : vector<8x128xf32> to vector<8x32xf32>
    %128 = arith.mulf %125, %15 : vector<8x32xf32>
    %129 = arith.mulf %124, %126 : vector<8x32xf32>
    %130 = arith.addf %128, %129 : vector<8x32xf32>
    %131 = math.tanh %130 : vector<8x32xf32>
    %132 = arith.mulf %127, %131 : vector<8x32xf32>
    %133 = vector.extract_strided_slice %7 {offsets = [3, 0, 0], sizes = [1, 8, 128], strides = [1, 1, 1]} : vector<8x8x128xf32> to vector<1x8x128xf32>
    %134 = vector.shape_cast %133 : vector<1x8x128xf32> to vector<8x128xf32>
    %cst_36 = arith.constant dense<0.000000e+00> : vector<8x128xf32>
    %135 = tpu.matmul %92, %10, %cst_36 {dimension_numbers = #tpu.dot_dimension_numbers<[1], [0], [0], [1], [0, 0, 1, 1], [], []>} : vector<8x32xf32>, vector<32x128xf32>, vector<8x128xf32> -> vector<8x128xf32>
    %136 = arith.addf %134, %135 : vector<8x128xf32>
    %137 = arith.negf %136 : vector<8x128xf32>
    %138 = math.exp %137 : vector<8x128xf32>
    %cst_37 = arith.constant 1.000000e+00 : f32
    %139 = vector.broadcast %cst_37 : f32 to vector<8x128xf32>
    %140 = arith.addf %139, %138 : vector<8x128xf32>
    %141 = arith.divf %139, %140 : vector<8x128xf32>
    %142 = math.tanh %136 : vector<8x128xf32>
    %143 = vector.extract_strided_slice %141 {offsets = [0, 0], sizes = [8, 32], strides = [1, 1]} : vector<8x128xf32> to vector<8x32xf32>
    %144 = vector.extract_strided_slice %141 {offsets = [0, 32], sizes = [8, 32], strides = [1, 1]} : vector<8x128xf32> to vector<8x32xf32>
    %145 = vector.extract_strided_slice %142 {offsets = [0, 64], sizes = [8, 32], strides = [1, 1]} : vector<8x128xf32> to vector<8x32xf32>
    %146 = vector.extract_strided_slice %141 {offsets = [0, 96], sizes = [8, 32], strides = [1, 1]} : vector<8x128xf32> to vector<8x32xf32>
    %147 = arith.mulf %144, %90 : vector<8x32xf32>
    %148 = arith.mulf %143, %145 : vector<8x32xf32>
    %149 = arith.addf %147, %148 : vector<8x32xf32>
    %150 = math.tanh %149 : vector<8x32xf32>
    %151 = arith.mulf %146, %150 : vector<8x32xf32>
    %cst_38 = arith.constant dense<0.000000e+00> : vector<8x128xf32>
    %152 = tpu.matmul %92, %8, %cst_38 {dimension_numbers = #tpu.dot_dimension_numbers<[1], [0], [0], [1], [0, 0, 1, 1], [], []>} : vector<8x32xf32>, vector<32x128xf32>, vector<8x128xf32> -> vector<8x128xf32>
    %153 = vector.broadcast %13 : vector<1x128xf32> to vector<8x128xf32>
    %154 = arith.addf %152, %153 : vector<8x128xf32>
    %cst_39 = arith.constant dense<0.000000e+00> : vector<8x128xf32>
    %155 = tpu.matmul %112, %11, %cst_39 {dimension_numbers = #tpu.dot_dimension_numbers<[1], [0], [0], [1], [0, 0, 1, 1], [], []>} : vector<8x32xf32>, vector<32x128xf32>, vector<8x128xf32> -> vector<8x128xf32>
    %156 = arith.addf %154, %155 : vector<8x128xf32>
    %157 = arith.negf %156 : vector<8x128xf32>
    %158 = math.exp %157 : vector<8x128xf32>
    %cst_40 = arith.constant 1.000000e+00 : f32
    %159 = vector.broadcast %cst_40 : f32 to vector<8x128xf32>
    %160 = arith.addf %159, %158 : vector<8x128xf32>
    %161 = arith.divf %159, %160 : vector<8x128xf32>
    %162 = math.tanh %156 : vector<8x128xf32>
    %163 = vector.extract_strided_slice %161 {offsets = [0, 0], sizes = [8, 32], strides = [1, 1]} : vector<8x128xf32> to vector<8x32xf32>
    %164 = vector.extract_strided_slice %161 {offsets = [0, 32], sizes = [8, 32], strides = [1, 1]} : vector<8x128xf32> to vector<8x32xf32>
    %165 = vector.extract_strided_slice %162 {offsets = [0, 64], sizes = [8, 32], strides = [1, 1]} : vector<8x128xf32> to vector<8x32xf32>
    %166 = vector.extract_strided_slice %161 {offsets = [0, 96], sizes = [8, 32], strides = [1, 1]} : vector<8x128xf32> to vector<8x32xf32>
    %167 = arith.mulf %164, %110 : vector<8x32xf32>
    %168 = arith.mulf %163, %165 : vector<8x32xf32>
    %169 = arith.addf %167, %168 : vector<8x32xf32>
    %170 = math.tanh %169 : vector<8x32xf32>
    %171 = arith.mulf %166, %170 : vector<8x32xf32>
    %cst_41 = arith.constant dense<0.000000e+00> : vector<8x128xf32>
    %172 = tpu.matmul %112, %9, %cst_41 {dimension_numbers = #tpu.dot_dimension_numbers<[1], [0], [0], [1], [0, 0, 1, 1], [], []>} : vector<8x32xf32>, vector<32x128xf32>, vector<8x128xf32> -> vector<8x128xf32>
    %173 = vector.broadcast %14 : vector<1x128xf32> to vector<8x128xf32>
    %174 = arith.addf %172, %173 : vector<8x128xf32>
    %cst_42 = arith.constant dense<0.000000e+00> : vector<8x128xf32>
    %175 = tpu.matmul %132, %12, %cst_42 {dimension_numbers = #tpu.dot_dimension_numbers<[1], [0], [0], [1], [0, 0, 1, 1], [], []>} : vector<8x32xf32>, vector<32x128xf32>, vector<8x128xf32> -> vector<8x128xf32>
    %176 = arith.addf %174, %175 : vector<8x128xf32>
    %177 = arith.negf %176 : vector<8x128xf32>
    %178 = math.exp %177 : vector<8x128xf32>
    %cst_43 = arith.constant 1.000000e+00 : f32
    %179 = vector.broadcast %cst_43 : f32 to vector<8x128xf32>
    %180 = arith.addf %179, %178 : vector<8x128xf32>
    %181 = arith.divf %179, %180 : vector<8x128xf32>
    %182 = math.tanh %176 : vector<8x128xf32>
    %183 = vector.extract_strided_slice %181 {offsets = [0, 0], sizes = [8, 32], strides = [1, 1]} : vector<8x128xf32> to vector<8x32xf32>
    %184 = vector.extract_strided_slice %181 {offsets = [0, 32], sizes = [8, 32], strides = [1, 1]} : vector<8x128xf32> to vector<8x32xf32>
    %185 = vector.extract_strided_slice %182 {offsets = [0, 64], sizes = [8, 32], strides = [1, 1]} : vector<8x128xf32> to vector<8x32xf32>
    %186 = vector.extract_strided_slice %181 {offsets = [0, 96], sizes = [8, 32], strides = [1, 1]} : vector<8x128xf32> to vector<8x32xf32>
    %187 = arith.mulf %184, %130 : vector<8x32xf32>
    %188 = arith.mulf %183, %185 : vector<8x32xf32>
    %189 = arith.addf %187, %188 : vector<8x32xf32>
    %190 = math.tanh %189 : vector<8x32xf32>
    %191 = arith.mulf %186, %190 : vector<8x32xf32>
    %192 = vector.extract_strided_slice %7 {offsets = [4, 0, 0], sizes = [1, 8, 128], strides = [1, 1, 1]} : vector<8x8x128xf32> to vector<1x8x128xf32>
    %193 = vector.shape_cast %192 : vector<1x8x128xf32> to vector<8x128xf32>
    %cst_44 = arith.constant dense<0.000000e+00> : vector<8x128xf32>
    %194 = tpu.matmul %151, %10, %cst_44 {dimension_numbers = #tpu.dot_dimension_numbers<[1], [0], [0], [1], [0, 0, 1, 1], [], []>} : vector<8x32xf32>, vector<32x128xf32>, vector<8x128xf32> -> vector<8x128xf32>
    %195 = arith.addf %193, %194 : vector<8x128xf32>
    %196 = arith.negf %195 : vector<8x128xf32>
    %197 = math.exp %196 : vector<8x128xf32>
    %cst_45 = arith.constant 1.000000e+00 : f32
    %198 = vector.broadcast %cst_45 : f32 to vector<8x128xf32>
    %199 = arith.addf %198, %197 : vector<8x128xf32>
    %200 = arith.divf %198, %199 : vector<8x128xf32>
    %201 = math.tanh %195 : vector<8x128xf32>
    %202 = vector.extract_strided_slice %200 {offsets = [0, 0], sizes = [8, 32], strides = [1, 1]} : vector<8x128xf32> to vector<8x32xf32>
    %203 = vector.extract_strided_slice %200 {offsets = [0, 32], sizes = [8, 32], strides = [1, 1]} : vector<8x128xf32> to vector<8x32xf32>
    %204 = vector.extract_strided_slice %201 {offsets = [0, 64], sizes = [8, 32], strides = [1, 1]} : vector<8x128xf32> to vector<8x32xf32>
    %205 = vector.extract_strided_slice %200 {offsets = [0, 96], sizes = [8, 32], strides = [1, 1]} : vector<8x128xf32> to vector<8x32xf32>
    %206 = arith.mulf %203, %149 : vector<8x32xf32>
    %207 = arith.mulf %202, %204 : vector<8x32xf32>
    %208 = arith.addf %206, %207 : vector<8x32xf32>
    %209 = math.tanh %208 : vector<8x32xf32>
    %210 = arith.mulf %205, %209 : vector<8x32xf32>
    %cst_46 = arith.constant dense<0.000000e+00> : vector<8x128xf32>
    %211 = tpu.matmul %151, %8, %cst_46 {dimension_numbers = #tpu.dot_dimension_numbers<[1], [0], [0], [1], [0, 0, 1, 1], [], []>} : vector<8x32xf32>, vector<32x128xf32>, vector<8x128xf32> -> vector<8x128xf32>
    %212 = vector.broadcast %13 : vector<1x128xf32> to vector<8x128xf32>
    %213 = arith.addf %211, %212 : vector<8x128xf32>
    %cst_47 = arith.constant dense<0.000000e+00> : vector<8x128xf32>
    %214 = tpu.matmul %171, %11, %cst_47 {dimension_numbers = #tpu.dot_dimension_numbers<[1], [0], [0], [1], [0, 0, 1, 1], [], []>} : vector<8x32xf32>, vector<32x128xf32>, vector<8x128xf32> -> vector<8x128xf32>
    %215 = arith.addf %213, %214 : vector<8x128xf32>
    %216 = arith.negf %215 : vector<8x128xf32>
    %217 = math.exp %216 : vector<8x128xf32>
    %cst_48 = arith.constant 1.000000e+00 : f32
    %218 = vector.broadcast %cst_48 : f32 to vector<8x128xf32>
    %219 = arith.addf %218, %217 : vector<8x128xf32>
    %220 = arith.divf %218, %219 : vector<8x128xf32>
    %221 = math.tanh %215 : vector<8x128xf32>
    %222 = vector.extract_strided_slice %220 {offsets = [0, 0], sizes = [8, 32], strides = [1, 1]} : vector<8x128xf32> to vector<8x32xf32>
    %223 = vector.extract_strided_slice %220 {offsets = [0, 32], sizes = [8, 32], strides = [1, 1]} : vector<8x128xf32> to vector<8x32xf32>
    %224 = vector.extract_strided_slice %221 {offsets = [0, 64], sizes = [8, 32], strides = [1, 1]} : vector<8x128xf32> to vector<8x32xf32>
    %225 = vector.extract_strided_slice %220 {offsets = [0, 96], sizes = [8, 32], strides = [1, 1]} : vector<8x128xf32> to vector<8x32xf32>
    %226 = arith.mulf %223, %169 : vector<8x32xf32>
    %227 = arith.mulf %222, %224 : vector<8x32xf32>
    %228 = arith.addf %226, %227 : vector<8x32xf32>
    %229 = math.tanh %228 : vector<8x32xf32>
    %230 = arith.mulf %225, %229 : vector<8x32xf32>
    %cst_49 = arith.constant dense<0.000000e+00> : vector<8x128xf32>
    %231 = tpu.matmul %171, %9, %cst_49 {dimension_numbers = #tpu.dot_dimension_numbers<[1], [0], [0], [1], [0, 0, 1, 1], [], []>} : vector<8x32xf32>, vector<32x128xf32>, vector<8x128xf32> -> vector<8x128xf32>
    %232 = vector.broadcast %14 : vector<1x128xf32> to vector<8x128xf32>
    %233 = arith.addf %231, %232 : vector<8x128xf32>
    %cst_50 = arith.constant dense<0.000000e+00> : vector<8x128xf32>
    %234 = tpu.matmul %191, %12, %cst_50 {dimension_numbers = #tpu.dot_dimension_numbers<[1], [0], [0], [1], [0, 0, 1, 1], [], []>} : vector<8x32xf32>, vector<32x128xf32>, vector<8x128xf32> -> vector<8x128xf32>
    %235 = arith.addf %233, %234 : vector<8x128xf32>
    %236 = arith.negf %235 : vector<8x128xf32>
    %237 = math.exp %236 : vector<8x128xf32>
    %cst_51 = arith.constant 1.000000e+00 : f32
    %238 = vector.broadcast %cst_51 : f32 to vector<8x128xf32>
    %239 = arith.addf %238, %237 : vector<8x128xf32>
    %240 = arith.divf %238, %239 : vector<8x128xf32>
    %241 = math.tanh %235 : vector<8x128xf32>
    %242 = vector.extract_strided_slice %240 {offsets = [0, 0], sizes = [8, 32], strides = [1, 1]} : vector<8x128xf32> to vector<8x32xf32>
    %243 = vector.extract_strided_slice %240 {offsets = [0, 32], sizes = [8, 32], strides = [1, 1]} : vector<8x128xf32> to vector<8x32xf32>
    %244 = vector.extract_strided_slice %241 {offsets = [0, 64], sizes = [8, 32], strides = [1, 1]} : vector<8x128xf32> to vector<8x32xf32>
    %245 = vector.extract_strided_slice %240 {offsets = [0, 96], sizes = [8, 32], strides = [1, 1]} : vector<8x128xf32> to vector<8x32xf32>
    %246 = arith.mulf %243, %189 : vector<8x32xf32>
    %247 = arith.mulf %242, %244 : vector<8x32xf32>
    %248 = arith.addf %246, %247 : vector<8x32xf32>
    %249 = math.tanh %248 : vector<8x32xf32>
    %250 = arith.mulf %245, %249 : vector<8x32xf32>
    %251 = vector.extract_strided_slice %7 {offsets = [5, 0, 0], sizes = [1, 8, 128], strides = [1, 1, 1]} : vector<8x8x128xf32> to vector<1x8x128xf32>
    %252 = vector.shape_cast %251 : vector<1x8x128xf32> to vector<8x128xf32>
    %cst_52 = arith.constant dense<0.000000e+00> : vector<8x128xf32>
    %253 = tpu.matmul %210, %10, %cst_52 {dimension_numbers = #tpu.dot_dimension_numbers<[1], [0], [0], [1], [0, 0, 1, 1], [], []>} : vector<8x32xf32>, vector<32x128xf32>, vector<8x128xf32> -> vector<8x128xf32>
    %254 = arith.addf %252, %253 : vector<8x128xf32>
    %255 = arith.negf %254 : vector<8x128xf32>
    %256 = math.exp %255 : vector<8x128xf32>
    %cst_53 = arith.constant 1.000000e+00 : f32
    %257 = vector.broadcast %cst_53 : f32 to vector<8x128xf32>
    %258 = arith.addf %257, %256 : vector<8x128xf32>
    %259 = arith.divf %257, %258 : vector<8x128xf32>
    %260 = math.tanh %254 : vector<8x128xf32>
    %261 = vector.extract_strided_slice %259 {offsets = [0, 0], sizes = [8, 32], strides = [1, 1]} : vector<8x128xf32> to vector<8x32xf32>
    %262 = vector.extract_strided_slice %259 {offsets = [0, 32], sizes = [8, 32], strides = [1, 1]} : vector<8x128xf32> to vector<8x32xf32>
    %263 = vector.extract_strided_slice %260 {offsets = [0, 64], sizes = [8, 32], strides = [1, 1]} : vector<8x128xf32> to vector<8x32xf32>
    %264 = vector.extract_strided_slice %259 {offsets = [0, 96], sizes = [8, 32], strides = [1, 1]} : vector<8x128xf32> to vector<8x32xf32>
    %265 = arith.mulf %262, %208 : vector<8x32xf32>
    %266 = arith.mulf %261, %263 : vector<8x32xf32>
    %267 = arith.addf %265, %266 : vector<8x32xf32>
    %268 = math.tanh %267 : vector<8x32xf32>
    %269 = arith.mulf %264, %268 : vector<8x32xf32>
    %cst_54 = arith.constant dense<0.000000e+00> : vector<8x128xf32>
    %270 = tpu.matmul %210, %8, %cst_54 {dimension_numbers = #tpu.dot_dimension_numbers<[1], [0], [0], [1], [0, 0, 1, 1], [], []>} : vector<8x32xf32>, vector<32x128xf32>, vector<8x128xf32> -> vector<8x128xf32>
    %271 = vector.broadcast %13 : vector<1x128xf32> to vector<8x128xf32>
    %272 = arith.addf %270, %271 : vector<8x128xf32>
    %cst_55 = arith.constant dense<0.000000e+00> : vector<8x128xf32>
    %273 = tpu.matmul %230, %11, %cst_55 {dimension_numbers = #tpu.dot_dimension_numbers<[1], [0], [0], [1], [0, 0, 1, 1], [], []>} : vector<8x32xf32>, vector<32x128xf32>, vector<8x128xf32> -> vector<8x128xf32>
    %274 = arith.addf %272, %273 : vector<8x128xf32>
    %275 = arith.negf %274 : vector<8x128xf32>
    %276 = math.exp %275 : vector<8x128xf32>
    %cst_56 = arith.constant 1.000000e+00 : f32
    %277 = vector.broadcast %cst_56 : f32 to vector<8x128xf32>
    %278 = arith.addf %277, %276 : vector<8x128xf32>
    %279 = arith.divf %277, %278 : vector<8x128xf32>
    %280 = math.tanh %274 : vector<8x128xf32>
    %281 = vector.extract_strided_slice %279 {offsets = [0, 0], sizes = [8, 32], strides = [1, 1]} : vector<8x128xf32> to vector<8x32xf32>
    %282 = vector.extract_strided_slice %279 {offsets = [0, 32], sizes = [8, 32], strides = [1, 1]} : vector<8x128xf32> to vector<8x32xf32>
    %283 = vector.extract_strided_slice %280 {offsets = [0, 64], sizes = [8, 32], strides = [1, 1]} : vector<8x128xf32> to vector<8x32xf32>
    %284 = vector.extract_strided_slice %279 {offsets = [0, 96], sizes = [8, 32], strides = [1, 1]} : vector<8x128xf32> to vector<8x32xf32>
    %285 = arith.mulf %282, %228 : vector<8x32xf32>
    %286 = arith.mulf %281, %283 : vector<8x32xf32>
    %287 = arith.addf %285, %286 : vector<8x32xf32>
    %288 = math.tanh %287 : vector<8x32xf32>
    %289 = arith.mulf %284, %288 : vector<8x32xf32>
    %cst_57 = arith.constant dense<0.000000e+00> : vector<8x128xf32>
    %290 = tpu.matmul %230, %9, %cst_57 {dimension_numbers = #tpu.dot_dimension_numbers<[1], [0], [0], [1], [0, 0, 1, 1], [], []>} : vector<8x32xf32>, vector<32x128xf32>, vector<8x128xf32> -> vector<8x128xf32>
    %291 = vector.broadcast %14 : vector<1x128xf32> to vector<8x128xf32>
    %292 = arith.addf %290, %291 : vector<8x128xf32>
    %cst_58 = arith.constant dense<0.000000e+00> : vector<8x128xf32>
    %293 = tpu.matmul %250, %12, %cst_58 {dimension_numbers = #tpu.dot_dimension_numbers<[1], [0], [0], [1], [0, 0, 1, 1], [], []>} : vector<8x32xf32>, vector<32x128xf32>, vector<8x128xf32> -> vector<8x128xf32>
    %294 = arith.addf %292, %293 : vector<8x128xf32>
    %295 = arith.negf %294 : vector<8x128xf32>
    %296 = math.exp %295 : vector<8x128xf32>
    %cst_59 = arith.constant 1.000000e+00 : f32
    %297 = vector.broadcast %cst_59 : f32 to vector<8x128xf32>
    %298 = arith.addf %297, %296 : vector<8x128xf32>
    %299 = arith.divf %297, %298 : vector<8x128xf32>
    %300 = math.tanh %294 : vector<8x128xf32>
    %301 = vector.extract_strided_slice %299 {offsets = [0, 0], sizes = [8, 32], strides = [1, 1]} : vector<8x128xf32> to vector<8x32xf32>
    %302 = vector.extract_strided_slice %299 {offsets = [0, 32], sizes = [8, 32], strides = [1, 1]} : vector<8x128xf32> to vector<8x32xf32>
    %303 = vector.extract_strided_slice %300 {offsets = [0, 64], sizes = [8, 32], strides = [1, 1]} : vector<8x128xf32> to vector<8x32xf32>
    %304 = vector.extract_strided_slice %299 {offsets = [0, 96], sizes = [8, 32], strides = [1, 1]} : vector<8x128xf32> to vector<8x32xf32>
    %305 = arith.mulf %302, %248 : vector<8x32xf32>
    %306 = arith.mulf %301, %303 : vector<8x32xf32>
    %307 = arith.addf %305, %306 : vector<8x32xf32>
    %308 = math.tanh %307 : vector<8x32xf32>
    %309 = arith.mulf %304, %308 : vector<8x32xf32>
    %310 = vector.extract_strided_slice %7 {offsets = [6, 0, 0], sizes = [1, 8, 128], strides = [1, 1, 1]} : vector<8x8x128xf32> to vector<1x8x128xf32>
    %311 = vector.shape_cast %310 : vector<1x8x128xf32> to vector<8x128xf32>
    %cst_60 = arith.constant dense<0.000000e+00> : vector<8x128xf32>
    %312 = tpu.matmul %269, %10, %cst_60 {dimension_numbers = #tpu.dot_dimension_numbers<[1], [0], [0], [1], [0, 0, 1, 1], [], []>} : vector<8x32xf32>, vector<32x128xf32>, vector<8x128xf32> -> vector<8x128xf32>
    %313 = arith.addf %311, %312 : vector<8x128xf32>
    %314 = arith.negf %313 : vector<8x128xf32>
    %315 = math.exp %314 : vector<8x128xf32>
    %cst_61 = arith.constant 1.000000e+00 : f32
    %316 = vector.broadcast %cst_61 : f32 to vector<8x128xf32>
    %317 = arith.addf %316, %315 : vector<8x128xf32>
    %318 = arith.divf %316, %317 : vector<8x128xf32>
    %319 = math.tanh %313 : vector<8x128xf32>
    %320 = vector.extract_strided_slice %318 {offsets = [0, 0], sizes = [8, 32], strides = [1, 1]} : vector<8x128xf32> to vector<8x32xf32>
    %321 = vector.extract_strided_slice %318 {offsets = [0, 32], sizes = [8, 32], strides = [1, 1]} : vector<8x128xf32> to vector<8x32xf32>
    %322 = vector.extract_strided_slice %319 {offsets = [0, 64], sizes = [8, 32], strides = [1, 1]} : vector<8x128xf32> to vector<8x32xf32>
    %323 = vector.extract_strided_slice %318 {offsets = [0, 96], sizes = [8, 32], strides = [1, 1]} : vector<8x128xf32> to vector<8x32xf32>
    %324 = arith.mulf %321, %267 : vector<8x32xf32>
    %325 = arith.mulf %320, %322 : vector<8x32xf32>
    %326 = arith.addf %324, %325 : vector<8x32xf32>
    %327 = math.tanh %326 : vector<8x32xf32>
    %328 = arith.mulf %323, %327 : vector<8x32xf32>
    %cst_62 = arith.constant dense<0.000000e+00> : vector<8x128xf32>
    %329 = tpu.matmul %269, %8, %cst_62 {dimension_numbers = #tpu.dot_dimension_numbers<[1], [0], [0], [1], [0, 0, 1, 1], [], []>} : vector<8x32xf32>, vector<32x128xf32>, vector<8x128xf32> -> vector<8x128xf32>
    %330 = vector.broadcast %13 : vector<1x128xf32> to vector<8x128xf32>
    %331 = arith.addf %329, %330 : vector<8x128xf32>
    %cst_63 = arith.constant dense<0.000000e+00> : vector<8x128xf32>
    %332 = tpu.matmul %289, %11, %cst_63 {dimension_numbers = #tpu.dot_dimension_numbers<[1], [0], [0], [1], [0, 0, 1, 1], [], []>} : vector<8x32xf32>, vector<32x128xf32>, vector<8x128xf32> -> vector<8x128xf32>
    %333 = arith.addf %331, %332 : vector<8x128xf32>
    %334 = arith.negf %333 : vector<8x128xf32>
    %335 = math.exp %334 : vector<8x128xf32>
    %cst_64 = arith.constant 1.000000e+00 : f32
    %336 = vector.broadcast %cst_64 : f32 to vector<8x128xf32>
    %337 = arith.addf %336, %335 : vector<8x128xf32>
    %338 = arith.divf %336, %337 : vector<8x128xf32>
    %339 = math.tanh %333 : vector<8x128xf32>
    %340 = vector.extract_strided_slice %338 {offsets = [0, 0], sizes = [8, 32], strides = [1, 1]} : vector<8x128xf32> to vector<8x32xf32>
    %341 = vector.extract_strided_slice %338 {offsets = [0, 32], sizes = [8, 32], strides = [1, 1]} : vector<8x128xf32> to vector<8x32xf32>
    %342 = vector.extract_strided_slice %339 {offsets = [0, 64], sizes = [8, 32], strides = [1, 1]} : vector<8x128xf32> to vector<8x32xf32>
    %343 = vector.extract_strided_slice %338 {offsets = [0, 96], sizes = [8, 32], strides = [1, 1]} : vector<8x128xf32> to vector<8x32xf32>
    %344 = arith.mulf %341, %287 : vector<8x32xf32>
    %345 = arith.mulf %340, %342 : vector<8x32xf32>
    %346 = arith.addf %344, %345 : vector<8x32xf32>
    %347 = math.tanh %346 : vector<8x32xf32>
    %348 = arith.mulf %343, %347 : vector<8x32xf32>
    %cst_65 = arith.constant dense<0.000000e+00> : vector<8x128xf32>
    %349 = tpu.matmul %289, %9, %cst_65 {dimension_numbers = #tpu.dot_dimension_numbers<[1], [0], [0], [1], [0, 0, 1, 1], [], []>} : vector<8x32xf32>, vector<32x128xf32>, vector<8x128xf32> -> vector<8x128xf32>
    %350 = vector.broadcast %14 : vector<1x128xf32> to vector<8x128xf32>
    %351 = arith.addf %349, %350 : vector<8x128xf32>
    %cst_66 = arith.constant dense<0.000000e+00> : vector<8x128xf32>
    %352 = tpu.matmul %309, %12, %cst_66 {dimension_numbers = #tpu.dot_dimension_numbers<[1], [0], [0], [1], [0, 0, 1, 1], [], []>} : vector<8x32xf32>, vector<32x128xf32>, vector<8x128xf32> -> vector<8x128xf32>
    %353 = arith.addf %351, %352 : vector<8x128xf32>
    %354 = arith.negf %353 : vector<8x128xf32>
    %355 = math.exp %354 : vector<8x128xf32>
    %cst_67 = arith.constant 1.000000e+00 : f32
    %356 = vector.broadcast %cst_67 : f32 to vector<8x128xf32>
    %357 = arith.addf %356, %355 : vector<8x128xf32>
    %358 = arith.divf %356, %357 : vector<8x128xf32>
    %359 = math.tanh %353 : vector<8x128xf32>
    %360 = vector.extract_strided_slice %358 {offsets = [0, 0], sizes = [8, 32], strides = [1, 1]} : vector<8x128xf32> to vector<8x32xf32>
    %361 = vector.extract_strided_slice %358 {offsets = [0, 32], sizes = [8, 32], strides = [1, 1]} : vector<8x128xf32> to vector<8x32xf32>
    %362 = vector.extract_strided_slice %359 {offsets = [0, 64], sizes = [8, 32], strides = [1, 1]} : vector<8x128xf32> to vector<8x32xf32>
    %363 = vector.extract_strided_slice %358 {offsets = [0, 96], sizes = [8, 32], strides = [1, 1]} : vector<8x128xf32> to vector<8x32xf32>
    %364 = arith.mulf %361, %307 : vector<8x32xf32>
    %365 = arith.mulf %360, %362 : vector<8x32xf32>
    %366 = arith.addf %364, %365 : vector<8x32xf32>
    %367 = math.tanh %366 : vector<8x32xf32>
    %368 = arith.mulf %363, %367 : vector<8x32xf32>
    %369 = vector.extract_strided_slice %7 {offsets = [7, 0, 0], sizes = [1, 8, 128], strides = [1, 1, 1]} : vector<8x8x128xf32> to vector<1x8x128xf32>
    %370 = vector.shape_cast %369 : vector<1x8x128xf32> to vector<8x128xf32>
    %cst_68 = arith.constant dense<0.000000e+00> : vector<8x128xf32>
    %371 = tpu.matmul %328, %10, %cst_68 {dimension_numbers = #tpu.dot_dimension_numbers<[1], [0], [0], [1], [0, 0, 1, 1], [], []>} : vector<8x32xf32>, vector<32x128xf32>, vector<8x128xf32> -> vector<8x128xf32>
    %372 = arith.addf %370, %371 : vector<8x128xf32>
    %373 = arith.negf %372 : vector<8x128xf32>
    %374 = math.exp %373 : vector<8x128xf32>
    %cst_69 = arith.constant 1.000000e+00 : f32
    %375 = vector.broadcast %cst_69 : f32 to vector<8x128xf32>
    %376 = arith.addf %375, %374 : vector<8x128xf32>
    %377 = arith.divf %375, %376 : vector<8x128xf32>
    %378 = math.tanh %372 : vector<8x128xf32>
    %379 = vector.extract_strided_slice %377 {offsets = [0, 0], sizes = [8, 32], strides = [1, 1]} : vector<8x128xf32> to vector<8x32xf32>
    %380 = vector.extract_strided_slice %377 {offsets = [0, 32], sizes = [8, 32], strides = [1, 1]} : vector<8x128xf32> to vector<8x32xf32>
    %381 = vector.extract_strided_slice %378 {offsets = [0, 64], sizes = [8, 32], strides = [1, 1]} : vector<8x128xf32> to vector<8x32xf32>
    %382 = vector.extract_strided_slice %377 {offsets = [0, 96], sizes = [8, 32], strides = [1, 1]} : vector<8x128xf32> to vector<8x32xf32>
    %383 = arith.mulf %380, %326 : vector<8x32xf32>
    %384 = arith.mulf %379, %381 : vector<8x32xf32>
    %385 = arith.addf %383, %384 : vector<8x32xf32>
    %386 = math.tanh %385 : vector<8x32xf32>
    %387 = arith.mulf %382, %386 : vector<8x32xf32>
    %cst_70 = arith.constant dense<0.000000e+00> : vector<8x128xf32>
    %388 = tpu.matmul %328, %8, %cst_70 {dimension_numbers = #tpu.dot_dimension_numbers<[1], [0], [0], [1], [0, 0, 1, 1], [], []>} : vector<8x32xf32>, vector<32x128xf32>, vector<8x128xf32> -> vector<8x128xf32>
    %389 = vector.broadcast %13 : vector<1x128xf32> to vector<8x128xf32>
    %390 = arith.addf %388, %389 : vector<8x128xf32>
    %cst_71 = arith.constant dense<0.000000e+00> : vector<8x128xf32>
    %391 = tpu.matmul %348, %11, %cst_71 {dimension_numbers = #tpu.dot_dimension_numbers<[1], [0], [0], [1], [0, 0, 1, 1], [], []>} : vector<8x32xf32>, vector<32x128xf32>, vector<8x128xf32> -> vector<8x128xf32>
    %392 = arith.addf %390, %391 : vector<8x128xf32>
    %393 = arith.negf %392 : vector<8x128xf32>
    %394 = math.exp %393 : vector<8x128xf32>
    %cst_72 = arith.constant 1.000000e+00 : f32
    %395 = vector.broadcast %cst_72 : f32 to vector<8x128xf32>
    %396 = arith.addf %395, %394 : vector<8x128xf32>
    %397 = arith.divf %395, %396 : vector<8x128xf32>
    %398 = math.tanh %392 : vector<8x128xf32>
    %399 = vector.extract_strided_slice %397 {offsets = [0, 0], sizes = [8, 32], strides = [1, 1]} : vector<8x128xf32> to vector<8x32xf32>
    %400 = vector.extract_strided_slice %397 {offsets = [0, 32], sizes = [8, 32], strides = [1, 1]} : vector<8x128xf32> to vector<8x32xf32>
    %401 = vector.extract_strided_slice %398 {offsets = [0, 64], sizes = [8, 32], strides = [1, 1]} : vector<8x128xf32> to vector<8x32xf32>
    %402 = vector.extract_strided_slice %397 {offsets = [0, 96], sizes = [8, 32], strides = [1, 1]} : vector<8x128xf32> to vector<8x32xf32>
    %403 = arith.mulf %400, %346 : vector<8x32xf32>
    %404 = arith.mulf %399, %401 : vector<8x32xf32>
    %405 = arith.addf %403, %404 : vector<8x32xf32>
    %406 = math.tanh %405 : vector<8x32xf32>
    %407 = arith.mulf %402, %406 : vector<8x32xf32>
    %cst_73 = arith.constant dense<0.000000e+00> : vector<8x128xf32>
    %408 = tpu.matmul %348, %9, %cst_73 {dimension_numbers = #tpu.dot_dimension_numbers<[1], [0], [0], [1], [0, 0, 1, 1], [], []>} : vector<8x32xf32>, vector<32x128xf32>, vector<8x128xf32> -> vector<8x128xf32>
    %409 = vector.broadcast %14 : vector<1x128xf32> to vector<8x128xf32>
    %410 = arith.addf %408, %409 : vector<8x128xf32>
    %cst_74 = arith.constant dense<0.000000e+00> : vector<8x128xf32>
    %411 = tpu.matmul %368, %12, %cst_74 {dimension_numbers = #tpu.dot_dimension_numbers<[1], [0], [0], [1], [0, 0, 1, 1], [], []>} : vector<8x32xf32>, vector<32x128xf32>, vector<8x128xf32> -> vector<8x128xf32>
    %412 = arith.addf %410, %411 : vector<8x128xf32>
    %413 = arith.negf %412 : vector<8x128xf32>
    %414 = math.exp %413 : vector<8x128xf32>
    %cst_75 = arith.constant 1.000000e+00 : f32
    %415 = vector.broadcast %cst_75 : f32 to vector<8x128xf32>
    %416 = arith.addf %415, %414 : vector<8x128xf32>
    %417 = arith.divf %415, %416 : vector<8x128xf32>
    %418 = math.tanh %412 : vector<8x128xf32>
    %419 = vector.extract_strided_slice %417 {offsets = [0, 0], sizes = [8, 32], strides = [1, 1]} : vector<8x128xf32> to vector<8x32xf32>
    %420 = vector.extract_strided_slice %417 {offsets = [0, 32], sizes = [8, 32], strides = [1, 1]} : vector<8x128xf32> to vector<8x32xf32>
    %421 = vector.extract_strided_slice %418 {offsets = [0, 64], sizes = [8, 32], strides = [1, 1]} : vector<8x128xf32> to vector<8x32xf32>
    %422 = vector.extract_strided_slice %417 {offsets = [0, 96], sizes = [8, 32], strides = [1, 1]} : vector<8x128xf32> to vector<8x32xf32>
    %423 = arith.mulf %420, %366 : vector<8x32xf32>
    %424 = arith.mulf %419, %421 : vector<8x32xf32>
    %425 = arith.addf %423, %424 : vector<8x32xf32>
    %426 = math.tanh %425 : vector<8x32xf32>
    %427 = arith.mulf %422, %426 : vector<8x32xf32>
    %cst_76 = arith.constant dense<0.000000e+00> : vector<8x128xf32>
    %428 = tpu.matmul %387, %8, %cst_76 {dimension_numbers = #tpu.dot_dimension_numbers<[1], [0], [0], [1], [0, 0, 1, 1], [], []>} : vector<8x32xf32>, vector<32x128xf32>, vector<8x128xf32> -> vector<8x128xf32>
    %429 = vector.broadcast %13 : vector<1x128xf32> to vector<8x128xf32>
    %430 = arith.addf %428, %429 : vector<8x128xf32>
    %cst_77 = arith.constant dense<0.000000e+00> : vector<8x128xf32>
    %431 = tpu.matmul %407, %11, %cst_77 {dimension_numbers = #tpu.dot_dimension_numbers<[1], [0], [0], [1], [0, 0, 1, 1], [], []>} : vector<8x32xf32>, vector<32x128xf32>, vector<8x128xf32> -> vector<8x128xf32>
    %432 = arith.addf %430, %431 : vector<8x128xf32>
    %433 = arith.negf %432 : vector<8x128xf32>
    %434 = math.exp %433 : vector<8x128xf32>
    %cst_78 = arith.constant 1.000000e+00 : f32
    %435 = vector.broadcast %cst_78 : f32 to vector<8x128xf32>
    %436 = arith.addf %435, %434 : vector<8x128xf32>
    %437 = arith.divf %435, %436 : vector<8x128xf32>
    %438 = math.tanh %432 : vector<8x128xf32>
    %439 = vector.extract_strided_slice %437 {offsets = [0, 0], sizes = [8, 32], strides = [1, 1]} : vector<8x128xf32> to vector<8x32xf32>
    %440 = vector.extract_strided_slice %437 {offsets = [0, 32], sizes = [8, 32], strides = [1, 1]} : vector<8x128xf32> to vector<8x32xf32>
    %441 = vector.extract_strided_slice %438 {offsets = [0, 64], sizes = [8, 32], strides = [1, 1]} : vector<8x128xf32> to vector<8x32xf32>
    %442 = vector.extract_strided_slice %437 {offsets = [0, 96], sizes = [8, 32], strides = [1, 1]} : vector<8x128xf32> to vector<8x32xf32>
    %443 = arith.mulf %440, %405 : vector<8x32xf32>
    %444 = arith.mulf %439, %441 : vector<8x32xf32>
    %445 = arith.addf %443, %444 : vector<8x32xf32>
    %446 = math.tanh %445 : vector<8x32xf32>
    %447 = arith.mulf %442, %446 : vector<8x32xf32>
    %cst_79 = arith.constant dense<0.000000e+00> : vector<8x128xf32>
    %448 = tpu.matmul %407, %9, %cst_79 {dimension_numbers = #tpu.dot_dimension_numbers<[1], [0], [0], [1], [0, 0, 1, 1], [], []>} : vector<8x32xf32>, vector<32x128xf32>, vector<8x128xf32> -> vector<8x128xf32>
    %449 = vector.broadcast %14 : vector<1x128xf32> to vector<8x128xf32>
    %450 = arith.addf %448, %449 : vector<8x128xf32>
    %cst_80 = arith.constant dense<0.000000e+00> : vector<8x128xf32>
    %451 = tpu.matmul %427, %12, %cst_80 {dimension_numbers = #tpu.dot_dimension_numbers<[1], [0], [0], [1], [0, 0, 1, 1], [], []>} : vector<8x32xf32>, vector<32x128xf32>, vector<8x128xf32> -> vector<8x128xf32>
    %452 = arith.addf %450, %451 : vector<8x128xf32>
    %453 = arith.negf %452 : vector<8x128xf32>
    %454 = math.exp %453 : vector<8x128xf32>
    %cst_81 = arith.constant 1.000000e+00 : f32
    %455 = vector.broadcast %cst_81 : f32 to vector<8x128xf32>
    %456 = arith.addf %455, %454 : vector<8x128xf32>
    %457 = arith.divf %455, %456 : vector<8x128xf32>
    %458 = math.tanh %452 : vector<8x128xf32>
    %459 = vector.extract_strided_slice %457 {offsets = [0, 0], sizes = [8, 32], strides = [1, 1]} : vector<8x128xf32> to vector<8x32xf32>
    %460 = vector.extract_strided_slice %457 {offsets = [0, 32], sizes = [8, 32], strides = [1, 1]} : vector<8x128xf32> to vector<8x32xf32>
    %461 = vector.extract_strided_slice %458 {offsets = [0, 64], sizes = [8, 32], strides = [1, 1]} : vector<8x128xf32> to vector<8x32xf32>
    %462 = vector.extract_strided_slice %457 {offsets = [0, 96], sizes = [8, 32], strides = [1, 1]} : vector<8x128xf32> to vector<8x32xf32>
    %463 = arith.mulf %460, %425 : vector<8x32xf32>
    %464 = arith.mulf %459, %461 : vector<8x32xf32>
    %465 = arith.addf %463, %464 : vector<8x32xf32>
    %466 = math.tanh %465 : vector<8x32xf32>
    %467 = arith.mulf %462, %466 : vector<8x32xf32>
    %cst_82 = arith.constant dense<0.000000e+00> : vector<8x128xf32>
    %468 = tpu.matmul %447, %9, %cst_82 {dimension_numbers = #tpu.dot_dimension_numbers<[1], [0], [0], [1], [0, 0, 1, 1], [], []>} : vector<8x32xf32>, vector<32x128xf32>, vector<8x128xf32> -> vector<8x128xf32>
    %469 = vector.broadcast %14 : vector<1x128xf32> to vector<8x128xf32>
    %470 = arith.addf %468, %469 : vector<8x128xf32>
    %cst_83 = arith.constant dense<0.000000e+00> : vector<8x128xf32>
    %471 = tpu.matmul %467, %12, %cst_83 {dimension_numbers = #tpu.dot_dimension_numbers<[1], [0], [0], [1], [0, 0, 1, 1], [], []>} : vector<8x32xf32>, vector<32x128xf32>, vector<8x128xf32> -> vector<8x128xf32>
    %472 = arith.addf %470, %471 : vector<8x128xf32>
    %473 = arith.negf %472 : vector<8x128xf32>
    %474 = math.exp %473 : vector<8x128xf32>
    %cst_84 = arith.constant 1.000000e+00 : f32
    %475 = vector.broadcast %cst_84 : f32 to vector<8x128xf32>
    %476 = arith.addf %475, %474 : vector<8x128xf32>
    %477 = arith.divf %475, %476 : vector<8x128xf32>
    %478 = math.tanh %472 : vector<8x128xf32>
    %479 = vector.extract_strided_slice %477 {offsets = [0, 0], sizes = [8, 32], strides = [1, 1]} : vector<8x128xf32> to vector<8x32xf32>
    %480 = vector.extract_strided_slice %477 {offsets = [0, 32], sizes = [8, 32], strides = [1, 1]} : vector<8x128xf32> to vector<8x32xf32>
    %481 = vector.extract_strided_slice %478 {offsets = [0, 64], sizes = [8, 32], strides = [1, 1]} : vector<8x128xf32> to vector<8x32xf32>
    %482 = vector.extract_strided_slice %477 {offsets = [0, 96], sizes = [8, 32], strides = [1, 1]} : vector<8x128xf32> to vector<8x32xf32>
    %483 = arith.mulf %480, %465 : vector<8x32xf32>
    %484 = arith.mulf %479, %481 : vector<8x32xf32>
    %485 = arith.addf %483, %484 : vector<8x32xf32>
    %486 = math.tanh %485 : vector<8x32xf32>
    %487 = arith.mulf %482, %486 : vector<8x32xf32>
    %488 = tpu.concatenate %132, %191, %250, %309, %368, %427, %467, %487 in 0 : vector<8x32xf32>, vector<8x32xf32>, vector<8x32xf32>, vector<8x32xf32>, vector<8x32xf32>, vector<8x32xf32>, vector<8x32xf32>, vector<8x32xf32> -> vector<64x32xf32>
    %c0_85 = arith.constant 0 : index
    %c0_86 = arith.constant 0 : index
    %489 = vector.load %arg11[%c0_85, %c0_86] : memref<32x128xf32, #tpu.memory_space<vmem>>, vector<32x128xf32>
    %cst_87 = arith.constant dense<0.000000e+00> : vector<64x128xf32>
    %490 = tpu.matmul %488, %489, %cst_87 {dimension_numbers = #tpu.dot_dimension_numbers<[1], [0], [0], [1], [0, 0, 1, 1], [], []>} : vector<64x32xf32>, vector<32x128xf32>, vector<64x128xf32> -> vector<64x128xf32>
    %c0_88 = arith.constant 0 : index
    %c0_89 = arith.constant 0 : index
    %491 = vector.load %arg12[%c0_88, %c0_89] : memref<1x128xf32, #tpu.memory_space<vmem>>, vector<1x128xf32>
    %492 = vector.broadcast %491 : vector<1x128xf32> to vector<64x128xf32>
    %493 = arith.addf %490, %492 : vector<64x128xf32>
    %cst_90 = arith.constant 0.000000e+00 : f32
    %494 = vector.broadcast %cst_90 : f32 to vector<64x128xf32>
    %495 = arith.maximumf %493, %494 : vector<64x128xf32>
    %c0_91 = arith.constant 0 : index
    %c0_92 = arith.constant 0 : index
    %496 = vector.load %arg13[%c0_91, %c0_92] : memref<128x128xf32, #tpu.memory_space<vmem>>, vector<128x128xf32>
    %cst_93 = arith.constant dense<0.000000e+00> : vector<64x128xf32>
    %497 = tpu.matmul %495, %496, %cst_93 {dimension_numbers = #tpu.dot_dimension_numbers<[1], [0], [0], [1], [0, 0, 1, 1], [], []>} : vector<64x128xf32>, vector<128x128xf32>, vector<64x128xf32> -> vector<64x128xf32>
    %c0_94 = arith.constant 0 : index
    %c0_95 = arith.constant 0 : index
    %498 = vector.load %arg14[%c0_94, %c0_95] : memref<1x128xf32, #tpu.memory_space<vmem>>, vector<1x128xf32>
    %499 = vector.broadcast %498 : vector<1x128xf32> to vector<64x128xf32>
    %500 = arith.addf %497, %499 : vector<64x128xf32>
    %cst_96 = arith.constant 0.000000e+00 : f32
    %501 = vector.broadcast %cst_96 : f32 to vector<64x128xf32>
    %502 = arith.maximumf %500, %501 : vector<64x128xf32>
    %c0_97 = arith.constant 0 : index
    %c0_98 = arith.constant 0 : index
    %503 = vector.load %arg15[%c0_97, %c0_98] : memref<128x128xf32, #tpu.memory_space<vmem>>, vector<128x128xf32>
    %cst_99 = arith.constant dense<0.000000e+00> : vector<64x128xf32>
    %504 = tpu.matmul %502, %503, %cst_99 {dimension_numbers = #tpu.dot_dimension_numbers<[1], [0], [0], [1], [0, 0, 1, 1], [], []>} : vector<64x128xf32>, vector<128x128xf32>, vector<64x128xf32> -> vector<64x128xf32>
    %c0_100 = arith.constant 0 : index
    %c0_101 = arith.constant 0 : index
    %505 = vector.load %arg16[%c0_100, %c0_101] : memref<1x128xf32, #tpu.memory_space<vmem>>, vector<1x128xf32>
    %506 = vector.broadcast %505 : vector<1x128xf32> to vector<64x128xf32>
    %507 = arith.addf %504, %506 : vector<64x128xf32>
    %508 = math.tanh %507 : vector<64x128xf32>
    %509 = vector.shape_cast %508 : vector<64x128xf32> to vector<8x8x128xf32>
    %c0_102 = arith.constant 0 : index
    %c0_103 = arith.constant 0 : index
    %c0_104 = arith.constant 0 : index
    %510 = vector.load %arg17[%c0_102, %c0_103, %c0_104] : memref<8x8x128xf32, #tpu.memory_space<vmem>>, vector<8x8x128xf32>
    tpu.vector_store %arg17[%c0_102, %c0_103, %c0_104], %509 {strides = array<i32>} : memref<8x8x128xf32, #tpu.memory_space<vmem>>, vector<8x8x128xf32>,
    return
  }
  func.func @transform_0(%arg0: i32) -> (i32, i32, i32) {
    %c0_i32 = arith.constant 0 : i32
    %c0_i32_0 = arith.constant 0 : i32
    %c0_i32_1 = arith.constant 0 : i32
    return %c0_i32, %arg0, %c0_i32_0 : i32, i32, i32
  }
  func.func @transform_1(%arg0: i32) -> (i32, i32) {
    %c0_i32 = arith.constant 0 : i32
    %c0_i32_0 = arith.constant 0 : i32
    %c0_i32_1 = arith.constant 0 : i32
    return %c0_i32, %c0_i32_0 : i32, i32
  }
  func.func @transform_2(%arg0: i32) -> (i32, i32) {
    %c0_i32 = arith.constant 0 : i32
    %c0_i32_0 = arith.constant 0 : i32
    %c0_i32_1 = arith.constant 0 : i32
    return %c0_i32, %c0_i32_0 : i32, i32
  }
  func.func @transform_3(%arg0: i32) -> (i32, i32) {
    %c0_i32 = arith.constant 0 : i32
    %c0_i32_0 = arith.constant 0 : i32
    %c0_i32_1 = arith.constant 0 : i32
    return %c0_i32, %c0_i32_0 : i32, i32
  }
  func.func @transform_4(%arg0: i32) -> (i32, i32) {
    %c0_i32 = arith.constant 0 : i32
    %c0_i32_0 = arith.constant 0 : i32
    %c0_i32_1 = arith.constant 0 : i32
    return %c0_i32, %c0_i32_0 : i32, i32
  }
  func.func @transform_5(%arg0: i32) -> (i32, i32) {
    %c0_i32 = arith.constant 0 : i32
    %c0_i32_0 = arith.constant 0 : i32
    %c0_i32_1 = arith.constant 0 : i32
    return %c0_i32, %c0_i32_0 : i32, i32
  }
  func.func @transform_6(%arg0: i32) -> (i32, i32) {
    %c0_i32 = arith.constant 0 : i32
    %c0_i32_0 = arith.constant 0 : i32
    %c0_i32_1 = arith.constant 0 : i32
    return %c0_i32, %c0_i32_0 : i32, i32
  }
  func.func @transform_7(%arg0: i32) -> (i32, i32) {
    %c0_i32 = arith.constant 0 : i32
    %c0_i32_0 = arith.constant 0 : i32
    %c0_i32_1 = arith.constant 0 : i32
    return %c0_i32, %c0_i32_0 : i32, i32
  }
  func.func @transform_8(%arg0: i32) -> (i32, i32) {
    %c0_i32 = arith.constant 0 : i32
    %c0_i32_0 = arith.constant 0 : i32
    %c0_i32_1 = arith.constant 0 : i32
    return %c0_i32, %c0_i32_0 : i32, i32
  }
  func.func @transform_9(%arg0: i32) -> (i32, i32) {
    %c0_i32 = arith.constant 0 : i32
    %c0_i32_0 = arith.constant 0 : i32
    %c0_i32_1 = arith.constant 0 : i32
    return %c0_i32, %c0_i32_0 : i32, i32
  }
  func.func @transform_10(%arg0: i32) -> (i32, i32) {
    %c0_i32 = arith.constant 0 : i32
    %c0_i32_0 = arith.constant 0 : i32
    %c0_i32_1 = arith.constant 0 : i32
    return %c0_i32, %c0_i32_0 : i32, i32
  }
  func.func @transform_11(%arg0: i32) -> (i32, i32) {
    %c0_i32 = arith.constant 0 : i32
    %c0_i32_0 = arith.constant 0 : i32
    %c0_i32_1 = arith.constant 0 : i32
    return %c0_i32, %c0_i32_0 : i32, i32
  }
  func.func @transform_12(%arg0: i32) -> (i32, i32) {
    %c0_i32 = arith.constant 0 : i32
    %c0_i32_0 = arith.constant 0 : i32
    %c0_i32_1 = arith.constant 0 : i32
    return %c0_i32, %c0_i32_0 : i32, i32
  }
  func.func @transform_13(%arg0: i32) -> (i32, i32) {
    %c0_i32 = arith.constant 0 : i32
    %c0_i32_0 = arith.constant 0 : i32
    %c0_i32_1 = arith.constant 0 : i32
    return %c0_i32, %c0_i32_0 : i32, i32
  }
  func.func @transform_14(%arg0: i32) -> (i32, i32) {
    %c0_i32 = arith.constant 0 : i32
    %c0_i32_0 = arith.constant 0 : i32
    %c0_i32_1 = arith.constant 0 : i32
    return %c0_i32, %c0_i32_0 : i32, i32
  }
  func.func @transform_15(%arg0: i32) -> (i32, i32) {
    %c0_i32 = arith.constant 0 : i32
    %c0_i32_0 = arith.constant 0 : i32
    %c0_i32_1 = arith.constant 0 : i32
    return %c0_i32, %c0_i32_0 : i32, i32
  }
  func.func @transform_16(%arg0: i32) -> (i32, i32, i32) {
    %c0_i32 = arith.constant 0 : i32
    %c0_i32_0 = arith.constant 0 : i32
    %c0_i32_1 = arith.constant 0 : i32
    return %c0_i32, %arg0, %c0_i32_0 : i32, i32, i32
  }
}

</mosaic_0001>

<bundles_post_ra>
// kernel: tpu_custom_call.1
= control target key start
LH: loop header
LB: loop body
LE: loop exit
PB: predicated region body
PF: predicated region fallthrough
CT: control target
= control target key end

     0   :  { %s6744_s0 = inlined_call_operand.hbm [shape: f32[8,8,128], index: 0, kind: input, shape index: {}]   ;;  %s6745_s1 = inlined_call_operand.hbm [shape: f32[128,128], index: 1, kind: input, shape index: {}]   ;;  %s6746_s2 = inlined_call_operand.hbm [shape: f32[32,128], index: 2, kind: input, shape index: {}]   ;;  %s6747_s3 = inlined_call_operand.vmem [shape: f32[1,128], index: 3, kind: input, shape index: {}]   ;;  %s6748_s4 = inlined_call_operand.hbm [shape: f32[32,128], index: 4, kind: input, shape index: {}]   ;;  %s6749_s5 = inlined_call_operand.hbm [shape: f32[32,128], index: 5, kind: input, shape index: {}]   ;;  %s6750_s6 = inlined_call_operand.vmem [shape: f32[1,128], index: 6, kind: input, shape index: {}]   ;;  %s6751_s7 = inlined_call_operand.hbm [shape: f32[32,128], index: 7, kind: input, shape index: {}]   ;;  %s6752_s8 = inlined_call_operand.hbm [shape: f32[32,128], index: 8, kind: input, shape index: {}]   ;;  %s6753_s9 = inlined_call_operand.vmem [shape: f32[1,128], index: 9, kind: input, shape index: {}]   ;;  %s6754_s10 = inlined_call_operand.hbm [shape: f32[32,128], index: 10, kind: input, shape index: {}]   ;;  %s6755_s11 = inlined_call_operand.vmem [shape: f32[1,128], index: 11, kind: input, shape index: {}]   ;;  %s6756_s12 = inlined_call_operand.hbm [shape: f32[128,128], index: 12, kind: input, shape index: {}]   ;;  %s6757_s13 = inlined_call_operand.vmem [shape: f32[1,128], index: 13, kind: input, shape index: {}]   ;;  %s6758_s14 = inlined_call_operand.hbm [shape: f32[128,128], index: 14, kind: input, shape index: {}]   ;;  %s6759_s15 = inlined_call_operand.vmem [shape: f32[1,128], index: 15, kind: input, shape index: {}]   ;;  %s6760_s16 = inlined_call_operand.hbm [shape: f32[8,8,128], index: 16, kind: output, shape index: {}]  }
   0x1   :  { %6761 = sst [smem:[#allocation27_spill]] %s6744_s0 }
   0x2   :  { %21 = vsyncpa [#allocation3], 0 }
   0x3   :  { %22 = vsyncpa [#allocation6], 0 }
   0x4   :  { %23 = vsyncpa [#allocation9], 0 }
   0x5   :  { %24 = vsyncpa [#allocation12], 0 }
   0x6   :  { %25 = vsyncpa [#allocation15], 0 }
   0x7   :  { %26 = vsyncpa [#allocation18], 0 }
   0x8   :  { %27 = vsyncpa [#allocation4], 0  ;;  %s5743_s21 = smov [#allocation5]   ;;  %s5744_s23 = smov [#allocation8]  }
   0x9   :  { %s45_s22 = sshll.u32 %s5743_s21, 4  ;;  %s71_s24 = sshll.u32 %s5744_s23, 4  ;;  %s46_s22 = int_to_ptr.vmem [resolvable:$true] %s45_s22  ;;  %s72_s24 = int_to_ptr.vmem [resolvable:$true] %s71_s24 }
   0xa   :  { %s5517_s25 = scalar_lea.vmem %s46_s22, 2048  ;;  %p5522_p1 = scmp.lt.s32.totalorder %s46_s22, %s46_s22 }
   0xb   :  { %p5518_p0 = scmp.ne.s32.totalorder %s46_s22, %s5517_s25  ;;  %p5523_p2 = scmp.lt.s32.totalorder %s5517_s25, %s5517_s25 }
   0xd   :  { %p5524_p3 = por %p5523_p2, %p5522_p1 }
   0xf   :  { %p5525_p4 = pnand %p5524_p3, %p5518_p0 }
  0x11   :  { %5528 = shalt.err (!%p5525_p4)
}
  0x12   :  { %s5745_s26 = smov 128   ;;  %s5746_s27 = smov 8  }
  0x13   :  { %51 = dma.hbm_to_vmem [thread:$0]  %s6745_s1, 2048, %s46_s22, [#allocation6], %s5745_s26, %s5745_s26, %s5746_s27  }
  0x14   :  { %s5537_s30 = scalar_lea.vmem %s72_s24, 512  ;;  %p5542_p6 = scmp.lt.s32.totalorder %s72_s24, %s72_s24 }
  0x15   :  { %p5538_p5 = scmp.ne.s32.totalorder %s72_s24, %s5537_s30  ;;  %p5543_p7 = scmp.lt.s32.totalorder %s5537_s30, %s5537_s30 }
  0x17   :  { %p5544_p8 = por %p5543_p7, %p5542_p6 }
  0x19   :  { %p5545_p9 = pnand %p5544_p8, %p5538_p5 }
  0x1b   :  { %5548 = shalt.err (!%p5545_p9)
}
  0x1c   :  { %77 = dma.hbm_to_vmem [thread:$0]  %s6748_s4, 512, %s72_s24, [#allocation9], %s5745_s26, %s5745_s26, %s5746_s27  }
  0x1d   :  { %s5747_s18 = smov [#allocation11]   ;;  %s5748_s20 = smov [#allocation14]  }
  0x1e   :  { %s97_s19 = sshll.u32 %s5747_s18, 4  ;;  %s123_s21 = sshll.u32 %s5748_s20, 4  ;;  %s98_s19 = int_to_ptr.vmem [resolvable:$true] %s97_s19  ;;  %s124_s21 = int_to_ptr.vmem [resolvable:$true] %s123_s21 }
  0x1f   :  { %s5557_s1 = scalar_lea.vmem %s98_s19, 512  ;;  %p5562_p11 = scmp.lt.s32.totalorder %s98_s19, %s98_s19 }
  0x20   :  { %p5558_p10 = scmp.ne.s32.totalorder %s98_s19, %s5557_s1  ;;  %p5563_p12 = scmp.lt.s32.totalorder %s5557_s1, %s5557_s1 }
  0x22   :  { %p5564_p13 = por %p5563_p12, %p5562_p11 }
  0x24   :  { %p5565_p0 = pnand %p5564_p13, %p5558_p10 }
  0x26   :  { %5568 = shalt.err (!%p5565_p0)
}
  0x27   :  { %103 = dma.hbm_to_vmem [thread:$0]  %s6751_s7, 512, %s98_s19, [#allocation12], %s5745_s26, %s5745_s26, %s5746_s27  }
  0x28   :  { %s5577_s4 = scalar_lea.vmem %s124_s21, 512  ;;  %p5582_p2 = scmp.lt.s32.totalorder %s124_s21, %s124_s21 }
  0x29   :  { %p5578_p1 = scmp.ne.s32.totalorder %s124_s21, %s5577_s4  ;;  %p5583_p3 = scmp.lt.s32.totalorder %s5577_s4, %s5577_s4 }
  0x2b   :  { %p5584_p4 = por %p5583_p3, %p5582_p2 }
  0x2d   :  { %p5585_p5 = pnand %p5584_p4, %p5578_p1 }
  0x2f   :  { %5588 = shalt.err (!%p5585_p5)
}
  0x30   :  { %129 = dma.hbm_to_vmem [thread:$0]  %s6754_s10, 512, %s124_s21, [#allocation15], %s5745_s26, %s5745_s26, %s5746_s27  }
  0x31   :  { %s5749_s28 = smov [#allocation2]   ;;  %s5750_s30 = smov [#allocation7]  }
  0x32   :  { %s33_s29 = sshll.u32 %s5749_s28, 4  ;;  %s57_s0 = sshll.u32 %s5750_s30, 4  ;;  %s34_s29 = int_to_ptr.vmem [resolvable:$true] %s33_s29  ;;  %s58_s0 = int_to_ptr.vmem [resolvable:$true] %s57_s0 }
  0x33   :  { %s5597_s7 = scalar_lea.vmem %s34_s29, 1024  ;;  %p5602_p7 = scmp.lt.s32.totalorder %s34_s29, %s34_s29 }
  0x34   :  { %p5598_p6 = scmp.ne.s32.totalorder %s34_s29, %s5597_s7  ;;  %p5603_p8 = scmp.lt.s32.totalorder %s5597_s7, %s5597_s7 }
  0x36   :  { %p5604_p9 = por %p5603_p8, %p5602_p7 }
  0x38   :  { %p5605_p10 = pnand %p5604_p9, %p5598_p6 }
  0x3a   :  { %5608 = shalt.err (!%p5605_p10)
}
  0x3b   :  { %s6762_s19 = sld [smem:[#allocation27_spill]]  ;;  %s5617_s10 = scalar_lea.vmem %s58_s0, 512 }
  0x3c   :  { %p5618_p11 = scmp.ne.s32.totalorder %s58_s0, %s5617_s10  ;;  %p5622_p12 = scmp.lt.s32.totalorder %s58_s0, %s58_s0 }
  0x3d   :  { %p5623_p13 = scmp.lt.s32.totalorder %s5617_s10, %s5617_s10 }
  0x3f   :  { %p5624_p0 = por %p5623_p13, %p5622_p12 }
  0x41   :  { %39 = dma.hbm_to_vmem [thread:$0]  %s6762_s19, 1024, %s34_s29, [#allocation3], %s5745_s26, %s5745_s26, %s5746_s27  }
  0x42   :  { %p5625_p1 = pnand %p5624_p0, %p5618_p11 }
  0x44   :  { %5628 = shalt.err (!%p5625_p1)
}
  0x45   :  { %63 = dma.hbm_to_vmem [thread:$0]  %s6746_s2, 512, %s58_s0, [#allocation6], %s5745_s26, %s5745_s26, %s5746_s27  }
  0x46   :  { %s5751_s1 = smov [#allocation10]   ;;  %s5752_s23 = smov [#allocation13]  }
  0x47   :  { %s83_s22 = sshll.u32 %s5751_s1, 4  ;;  %s109_s4 = sshll.u32 %s5752_s23, 4  ;;  %s84_s22 = int_to_ptr.vmem [resolvable:$true] %s83_s22  ;;  %s110_s4 = int_to_ptr.vmem [resolvable:$true] %s109_s4 }
  0x48   :  { %s5637_s24 = scalar_lea.vmem %s84_s22, 512  ;;  %p5642_p3 = scmp.lt.s32.totalorder %s84_s22, %s84_s22 }
  0x49   :  { %p5638_p2 = scmp.ne.s32.totalorder %s84_s22, %s5637_s24  ;;  %p5643_p4 = scmp.lt.s32.totalorder %s5637_s24, %s5637_s24 }
  0x4b   :  { %p5644_p5 = por %p5643_p4, %p5642_p3 }
  0x4d   :  { %p5645_p6 = pnand %p5644_p5, %p5638_p2 }
  0x4f   :  { %5648 = shalt.err (!%p5645_p6)
}
  0x50   :  { %89 = dma.hbm_to_vmem [thread:$0]  %s6749_s5, 512, %s84_s22, [#allocation9], %s5745_s26, %s5745_s26, %s5746_s27  }
  0x51   :  { %s5657_s2 = scalar_lea.vmem %s110_s4, 512  ;;  %p5662_p8 = scmp.lt.s32.totalorder %s110_s4, %s110_s4 }
  0x52   :  { %p5658_p7 = scmp.ne.s32.totalorder %s110_s4, %s5657_s2  ;;  %p5663_p9 = scmp.lt.s32.totalorder %s5657_s2, %s5657_s2 }
  0x54   :  { %p5664_p10 = por %p5663_p9, %p5662_p8 }
  0x56   :  { %p5665_p11 = pnand %p5664_p10, %p5658_p7 }
  0x58   :  { %5668 = shalt.err (!%p5665_p11)
}
  0x59   :  { %115 = dma.hbm_to_vmem [thread:$0]  %s6752_s8, 512, %s110_s4, [#allocation12], %s5745_s26, %s5745_s26, %s5746_s27  }
  0x5a   :  { %s5753_s0 = smov [#allocation16]   ;;  %s5754_s17 = smov [#allocation17]  }
  0x5b   :  { %s137_s7 = sshll.u32 %s5753_s0, 4  ;;  %s151_s18 = sshll.u32 %s5754_s17, 4  ;;  %s138_s7 = int_to_ptr.vmem [resolvable:$true] %s137_s7  ;;  %s152_s18 = int_to_ptr.vmem [resolvable:$true] %s151_s18 }
  0x5c   :  { %s5677_s5 = scalar_lea.vmem %s138_s7, 2048  ;;  %p5682_p13 = scmp.lt.s32.totalorder %s138_s7, %s138_s7 }
  0x5d   :  { %p5678_p12 = scmp.ne.s32.totalorder %s138_s7, %s5677_s5  ;;  %p5683_p0 = scmp.lt.s32.totalorder %s5677_s5, %s5677_s5 }
  0x5f   :  { %p5684_p1 = por %p5683_p0, %p5682_p13 }
  0x61   :  { %p5685_p2 = pnand %p5684_p1, %p5678_p12 }
  0x63   :  { %5688 = shalt.err (!%p5685_p2)
}
  0x64   :  { %143 = dma.hbm_to_vmem [thread:$0]  %s6756_s12, 2048, %s138_s7, [#allocation15], %s5745_s26, %s5745_s26, %s5746_s27  }
  0x65   :  { %s5697_s8 = scalar_lea.vmem %s152_s18, 2048  ;;  %p5702_p4 = scmp.lt.s32.totalorder %s152_s18, %s152_s18 }
  0x66   :  { %p5698_p3 = scmp.ne.s32.totalorder %s152_s18, %s5697_s8  ;;  %p5703_p5 = scmp.lt.s32.totalorder %s5697_s8, %s5697_s8 }
  0x68   :  { %p5704_p6 = por %p5703_p5, %p5702_p4 }
  0x6a   :  { %p5705_p7 = pnand %p5704_p6, %p5698_p3 }
  0x6c   :  { %5708 = shalt.err (!%p5705_p7)
}
  0x6d   :  { %157 = dma.hbm_to_vmem [thread:$0]  %s6758_s14, 2048, %s152_s18, [#allocation18], %s5745_s26, %s5745_s26, %s5746_s27  }
  0x6e   :  { %5729 = dma.done.wait [#allocation3], 1024  }
  0x6f   :  { %5730 = vsyncadd [#allocation3], 4294966272 }
  0x70   :  { %5731 = dma.done.wait [#allocation6], 2560  }
  0x71   :  { %5732 = vsyncadd [#allocation6], 4294964736 }
  0x72   :  { %5733 = dma.done.wait [#allocation9], 1024  }
  0x73   :  { %5734 = vsyncadd [#allocation9], 4294966272 }
  0x74   :  { %5735 = dma.done.wait [#allocation12], 1024  }
  0x75   :  { %5736 = vsyncadd [#allocation12], 4294966272 }
  0x76   :  { %5737 = dma.done.wait [#allocation15], 2560  }
  0x77   :  { %5738 = vsyncadd [#allocation15], 4294964736 }
  0x78   :  { %5739 = dma.done.wait [#allocation18], 2048  }
  0x79   :  { %5740 = vsyncadd [#allocation18], 4294965248  ;;  %v5755_v0 = vmov 0.0   ;;  %vm5756_vm0 = vmmov 0   ;;  %v213_v1 = vld [vmem:[#allocation5 + $0x78] sm:$0xff]  ;;  %v212_v2 = vld [vmem:[#allocation5 + $0x70] sm:$0xff] }
  0x7a   :  { %4713 = vmatprep.subr.mxu1 %v5755_v0  ;;  %4721 = vmatprep.mubr.msk.f32.mxu1 %vm5756_vm0, %v5755_v0  ;;  %v211_v3 = vld [vmem:[#allocation5 + $0x68] sm:$0xff]  ;;  %v210_v4 = vld [vmem:[#allocation5 + $0x60] sm:$0xff]  ;;  %v5908_v5 = vld [vmem:[#allocation7 + $0x18] sm:$0xff]  ;;  %s5757_s1 = smov 64   ;;  %s5758_s22 = smov 32   ;;  %vm348_vm1 = vcmask 261120  }
  0x7b   :  { %4669 = vmatprep.subr.mxu0 %v213_v1  ;;  %4714 = vmatpush3.msra.mxu1 %v5908_v5  ;;  %v5911_v6 = vld [vmem:[#allocation7 + $0x10] sm:$0xff]  ;;  %v209_v7 = vld [vmem:[#allocation5 + $0x58] sm:$0xff]  ;;  %v190_v8 = vld [vmem:[#allocation2] sm:$0xff] }
  0x7c   :  { %4670 = vmatpush3.msra.mxu0 %v213_v1  ;;  %4715 = vmatprep.subr.mxu1 %v5755_v0  ;;  %v5915_v9 = vld [vmem:[#allocation7 + $0x8] sm:$0xff]  ;;  %v208_v10 = vld [vmem:[#allocation5 + $0x50] sm:$0xff]  ;;  %v5918_v11 = vld [vmem:[#allocation7] sm:$0xff] }
  0x7d   :  { %4671 = vmatprep.subr.mxu0 %v212_v2  ;;  %4716 = vmatpush3.msra.mxu1 %v5911_v6  ;;  %v207_v12 = vld [vmem:[#allocation5 + $0x48] sm:$0xff]  ;;  %v206_v13 = vld [vmem:[#allocation5 + $0x40] sm:$0xff]  ;;  %v205_v14 = vld [vmem:[#allocation5 + $0x38] sm:$0xff] }
  0x7e   :  { %4672 = vmatpush3.msra.mxu0 %v212_v2  ;;  %4717 = vmatprep.subr.mxu1 %v5755_v0  ;;  %v204_v15 = vld [vmem:[#allocation5 + $0x30] sm:$0xff]  ;;  %v203_v16 = vld [vmem:[#allocation5 + $0x28] sm:$0xff]  ;;  %v202_v17 = vld [vmem:[#allocation5 + $0x20] sm:$0xff] }
  0x7f   :  { %4673 = vmatprep.subr.mxu0 %v211_v3  ;;  %4701 = vmatprep.mubr.f32.mxu0 %v190_v8  ;;  %v201_v18 = vld [vmem:[#allocation5 + $0x18] sm:$0xff]  ;;  %v200_v19 = vld [vmem:[#allocation5 + $0x10] sm:$0xff]  ;;  %v199_v20 = vld [vmem:[#allocation5 + $0x8] sm:$0xff] }
  0x80   :  { %4674 = vmatpush3.msra.mxu0 %v211_v3  ;;  %4718 = vmatpush3.msra.mxu1 %v5915_v9  ;;  %v198_v21 = vld [vmem:[#allocation5] sm:$0xff]  ;;  %v191_v22 = vld [vmem:[#allocation2 + $0x8] sm:$0xff]  ;;  %v5950_v41 = vld [vmem:[#allocation8 + $0x18] sm:$0xff] }
  0x81   :  { %4675 = vmatprep.subr.mxu0 %v210_v4  ;;  %4719 = vmatprep.subr.mxu1 %v5755_v0  ;;  %v5941_v26 = vld [vmem:[%s6747_s3] ss:$0 sm:$0xff]  ;;  %v5954_v42 = vld [vmem:[#allocation8 + $0x10] sm:$0xff]  ;;  %v5957_v43 = vld [vmem:[#allocation8 + $0x8] sm:$0xff] }
  0x82   :  { %4676 = vmatpush3.msra.mxu0 %v210_v4  ;;  %4720 = vmatpush3.msra.mxu1 %v5918_v11  ;;  %v5961_v44 = vld [vmem:[#allocation8] sm:$0xff]  ;;  %v5976_v48 = vld [vmem:[#allocation10 + $0x18] sm:$0xff]  ;;  %v5981_v49 = vld [vmem:[#allocation10 + $0x10] sm:$0xff] }
  0x83   :  { %4677 = vmatprep.subr.mxu0 %v209_v7  ;;  %4722 = vmatmul.mubr.f32.vlgmr.msra.gmra.mxu1 %v5755_v0  ;;  %v5987_v50 = vld [vmem:[#allocation10 + $0x8] sm:$0xff]  ;;  %v5991_v51 = vld [vmem:[#allocation10] sm:$0xff] }
  0x84   :  { %4678 = vmatpush3.msra.mxu0 %v209_v7  ;;  %4724 = vmatprep.subr.mxu1 %v5755_v0  ;;  %v6013_v58 = vld [vmem:[%s6750_s6] ss:$0 sm:$0xff] }
  0x85   :  { %4679 = vmatprep.subr.mxu0 %v208_v10  ;;  %4725 = vmatpush3.msra.mxu1 %v5908_v5 }
  0x86   :  { %4680 = vmatpush3.msra.mxu0 %v208_v10  ;;  %4726 = vmatprep.subr.mxu1 %v5755_v0 }
  0x87   :  { %4681 = vmatprep.subr.mxu0 %v207_v12  ;;  %4727 = vmatpush3.msra.mxu1 %v5911_v6 }
  0x88   :  { %4682 = vmatpush3.msra.mxu0 %v207_v12  ;;  %4728 = vmatprep.subr.mxu1 %v5755_v0 }
  0x89   :  { %4683 = vmatprep.subr.mxu0 %v206_v13  ;;  %4729 = vmatpush3.msra.mxu1 %v5915_v9 }
  0x8a   :  { %4684 = vmatpush3.msra.mxu0 %v206_v13  ;;  %4730 = vmatprep.subr.mxu1 %v5755_v0 }
  0x8b   :  { %4685 = vmatprep.subr.mxu0 %v205_v14  ;;  %4731 = vmatpush3.msra.mxu1 %v5918_v11 }
  0x8c   :  { %4686 = vmatpush3.msra.mxu0 %v205_v14  ;;  %4732 = vmatprep.mubr.msk.f32.mxu1 %vm5756_vm0, %v5755_v0 }
  0x8d   :  { %4687 = vmatprep.subr.mxu0 %v204_v15  ;;  %4735 = vmatprep.subr.mxu1 %v5755_v0 }
  0x8e   :  { %4688 = vmatpush3.msra.mxu0 %v204_v15 }
  0x8f   :  { %4689 = vmatprep.subr.mxu0 %v203_v16 }
  0x90   :  { %4690 = vmatpush3.msra.mxu0 %v203_v16 }
  0x91   :  { %4691 = vmatprep.subr.mxu0 %v202_v17 }
  0x92   :  { %4692 = vmatpush3.msra.mxu0 %v202_v17 }
  0x93   :  { %4693 = vmatprep.subr.mxu0 %v201_v18 }
  0x94   :  { %4694 = vmatpush3.msra.mxu0 %v201_v18 }
  0x95   :  { %4695 = vmatprep.subr.mxu0 %v200_v19 }
  0x96   :  { %4696 = vmatpush3.msra.mxu0 %v200_v19 }
  0x97   :  { %4697 = vmatprep.subr.mxu0 %v199_v20 }
  0x98   :  { %4698 = vmatpush3.msra.mxu0 %v199_v20 }
  0x99   :  { %4699 = vmatprep.subr.mxu0 %v198_v21 }
  0x9a   :  { %4700 = vmatpush3.msra.mxu0 %v198_v21 }
  0x9b   :  { %4702 = vmatmul.mubr.f32.vlgmr.msra.gmra.mxu0 %v191_v22  ;;  %4768 = vmatprep.subr.mxu0 %v5755_v0 }
  0x9c   :  { %4769 = vmatpush3.msra.mxu0 %v5950_v41 }
  0x9d   :  { %4770 = vmatprep.subr.mxu0 %v5755_v0 }
  0x9e   :  { %4771 = vmatpush3.msra.mxu0 %v5954_v42 }
  0x9f   :  { %4772 = vmatprep.subr.mxu0 %v5755_v0 }
  0xa0   :  { %4773 = vmatpush3.msra.mxu0 %v5957_v43 }
  0xa1   :  { %4774 = vmatprep.subr.mxu0 %v5755_v0 }
  0xa2   :  { %4775 = vmatpush3.msra.mxu0 %v5961_v44 }
  0xa3   :  { %4790 = vmatprep.subr.mxu0 %v5755_v0 }
 0x143   :  { %v418_v23 = vpop.f32.mrf.mxu1 }
 0x145   :  { %v4723_v24 = vpop.f32.mrf.mxu1 }
 0x15b   :  { %v5936_v25 = vpop.f32.mrf.mxu0 }
 0x15c   :  { %v293_v52 = vadd.f32 %v5936_v25, %v5941_v26  ;;  %v192_v25 = vld [vmem:[#allocation2 + $0x10] sm:$0xff] }
 0x15d   :  { %v287_v27 = vpop.f32.mrf.mxu0  ;;  %4704 = vmatprep.mubr.f32.mxu0 %v192_v25 }
 0x15e   :  { %v288_v28 = vadd.f32 %v5941_v26, %v287_v27  ;;  %v193_v27 = vld [vmem:[#allocation2 + $0x18] sm:$0xff] }
 0x15f   :  { %4705 = vmatmul.mubr.f32.gmra.mxu0 %v193_v27 }
 0x160   :  { %v422_v29 = vadd.f32 %v418_v23, %v288_v28  ;;  %v194_v28 = vld [vmem:[#allocation2 + $0x20] sm:$0xff] }
 0x161   :  { %4707 = vmatprep.mubr.f32.mxu0 %v194_v28 }
 0x162   :  { %5278 = vtanh.f32 %v422_v29  ;;  %v4311_v31 = vmul.f32 -1.442695, %v422_v29  ;;  %v195_v29 = vld [vmem:[#allocation2 + $0x28] sm:$0xff] }
 0x163   :  { %4708 = vmatmul.mubr.f32.gmra.mxu0 %v195_v29 }
 0x164   :  { %5280 = vpow2.f32 %v4311_v31  ;;  %v197_v31 = vld [vmem:[#allocation2 + $0x38] sm:$0xff] }
 0x16f   :  { %v5279_v30 = vpop.eup %5278 }
 0x170   :  { %432 = vrot.lane.b32.xlu0 %v5279_v30, %s5757_s1  ;;  %v196_v30 = vld [vmem:[#allocation2 + $0x30] sm:$0xff] }
 0x171   :  { %v5281_v32 = vpop.eup %5280  ;;  %4710 = vmatprep.mubr.f32.mxu0 %v196_v30 }
 0x172   :  { %v426_v33 = vadd.f32 1.0, %v5281_v32  ;;  %4711 = vmatmul.mubr.f32.gmra.mxu0 %v197_v31 }
 0x173   :  { %4776 = vmatprep.mubr.msk.f32.mxu0 %vm5756_vm0, %v5755_v0 }
 0x174   :  { %5282 = vrcp.f32 %v426_v33 }
 0x181   :  { %v5283_v34 = vpop.eup %5282 }
 0x182   :  { %v430_v37 = vmul.f32 0.0, %v5283_v34 }
 0x1e2   :  { %v433_v35 = vpop.permute.xlu0 %432 }
 0x1e3   :  { %v435_v36 = vmul.f32 %v5283_v34, %v433_v35 }
 0x1e5   :  { %437 = vrot.lane.b32.xlu0 %v435_v36, %s5758_s22 }
 0x257   :  { %v438_v38 = vpop.permute.xlu0 %437 }
 0x258   :  { %v5946_v39 = vadd.f32 %v438_v38, %v430_v37  ;;  %v6033_v37 = vld [vmem:[#allocation11 + $0x18] sm:$0xff] }
 0x25a   :  { %5284 = vtanh.f32 %v5946_v39 }
 0x267   :  { %v5285_v40 = vpop.eup %5284 }
 0x268   :  { %443 = vrot.lane.b32.xlu1 %v5285_v40, %s5757_s1  ;;  %v6043_v40 = vld [vmem:[#allocation11 + $0x8] sm:$0xff] }
 0x2da   :  { %v444_v45 = vpop.permute.xlu1 %443 }
 0x2db   :  { %v446_v46 = vmul.f32 %v5283_v34, %v444_v45  ;;  %v6051_v45 = vld [vmem:[#allocation11] sm:$0xff] }
 0x2dd   :  { %448 = vrot.lane.b32.xlu1 %v446_v46, %s5758_s22  ;;  %v6063_v46 = vld [vmem:[#allocation13 + $0x18] sm:$0xff] }
 0x34f   :  { %v449_v47 = vpop.permute.xlu1 %448 }
 0x350   :  { %4733 = vmatmul.mubr.msk.f32.vlgmr.msra.gmra.mxu1 %vm348_vm1, %v449_v47 }
 0x351   :  { %4736 = vmatpush3.msra.mxu1 %v5950_v41  ;;  %4743 = vmatprep.mubr.msk.f32.mxu1 %vm5756_vm0, %v5755_v0 }
 0x352   :  { %4737 = vmatprep.subr.mxu1 %v5755_v0 }
 0x353   :  { %4738 = vmatpush3.msra.mxu1 %v5954_v42 }
 0x354   :  { %4739 = vmatprep.subr.mxu1 %v5755_v0 }
 0x355   :  { %4740 = vmatpush3.msra.mxu1 %v5957_v43 }
 0x356   :  { %4741 = vmatprep.subr.mxu1 %v5755_v0 }
 0x357   :  { %4742 = vmatpush3.msra.mxu1 %v5961_v44 }
 0x358   :  { %4744 = vmatmul.mubr.msk.f32.vlgmr.msra.gmra.mxu1 %vm348_vm1, %v449_v47  ;;  %4746 = vmatprep.subr.mxu1 %v5755_v0 }
 0x359   :  { %4747 = vmatpush3.msra.mxu1 %v5976_v48  ;;  %4754 = vmatprep.mubr.msk.f32.mxu1 %vm5756_vm0, %v5755_v0 }
 0x35a   :  { %4748 = vmatprep.subr.mxu1 %v5755_v0 }
 0x35b   :  { %4749 = vmatpush3.msra.mxu1 %v5981_v49 }
 0x35c   :  { %4750 = vmatprep.subr.mxu1 %v5755_v0 }
 0x35d   :  { %4751 = vmatpush3.msra.mxu1 %v5987_v50 }
 0x35e   :  { %4752 = vmatprep.subr.mxu1 %v5755_v0 }
 0x35f   :  { %4753 = vmatpush3.msra.mxu1 %v5991_v51 }
 0x360   :  { %4755 = vmatmul.mubr.f32.vlgmr.msra.gmra.mxu1 %v5755_v0  ;;  %4757 = vmatprep.subr.mxu1 %v5755_v0 }
 0x361   :  { %4758 = vmatpush3.msra.mxu1 %v5908_v5  ;;  %4765 = vmatprep.mubr.msk.f32.mxu1 %vm5756_vm0, %v5755_v0 }
 0x362   :  { %4759 = vmatprep.subr.mxu1 %v5755_v0 }
 0x363   :  { %4760 = vmatpush3.msra.mxu1 %v5911_v6 }
 0x364   :  { %4761 = vmatprep.subr.mxu1 %v5755_v0 }
 0x365   :  { %4762 = vmatpush3.msra.mxu1 %v5915_v9 }
 0x366   :  { %4763 = vmatprep.subr.mxu1 %v5755_v0 }
 0x367   :  { %4764 = vmatpush3.msra.mxu1 %v5918_v11 }
 0x368   :  { %4779 = vmatprep.subr.mxu1 %v5755_v0 }
 0x410   :  { %v518_v53 = vpop.f32.mrf.mxu1 }
 0x411   :  { %v522_v54 = vadd.f32 %v518_v53, %v293_v52  ;;  %v6067_v52 = vld [vmem:[#allocation13 + $0x10] sm:$0xff]  ;;  %v6073_v53 = vld [vmem:[#allocation13 + $0x8] sm:$0xff] }
 0x412   :  { %v4734_v55 = vpop.f32.mrf.mxu1 }
 0x413   :  { %5286 = vtanh.f32 %v522_v54  ;;  %v4313_v2 = vmul.f32 -1.442695, %v522_v54  ;;  %v6079_v54 = vld [vmem:[#allocation13] sm:$0xff]  ;;  %v6104_v55 = vpop.f32.mrf.mxu0 }
 0x418   :  { %v619_v56 = vpop.f32.mrf.mxu1 }
 0x419   :  { %v620_v59 = vadd.f32 %v6013_v58, %v619_v56  ;;  %v297_v56 = vpop.f32.mrf.mxu0 }
 0x41a   :  { %v4745_v57 = vpop.f32.mrf.mxu1 }
 0x41b   :  { %v6106_v57 = vpop.f32.mrf.mxu0 }
 0x420   :  { %v5287_v60 = vpop.eup %5286  ;;  %v689_v61 = vpop.f32.mrf.mxu1 }
 0x421   :  { %v693_v62 = vadd.f32 %v689_v61, %v620_v59  ;;  %532 = vrot.lane.b32.xlu0 %v5287_v60, %s5757_s1  ;;  %v6108_v59 = vpop.f32.mrf.mxu0 }
 0x422   :  { %v4756_v63 = vpop.f32.mrf.mxu1 }
 0x423   :  { %5288 = vtanh.f32 %v693_v62  ;;  %v4316_v3 = vmul.f32 -1.442695, %v693_v62  ;;  %v6110_v60 = vpop.f32.mrf.mxu0  ;;  %v298_v62 = vadd.f32 %v5941_v26, %v297_v56 }
 0x424   :  { %5290 = vpow2.f32 %v4313_v2 }
 0x425   :  { %5292 = vpow2.f32 %v4316_v3  ;;  %v6112_v61 = vpop.f32.mrf.mxu0 }
 0x430   :  { %v5289_v1 = vpop.eup %5288 }
 0x431   :  { %703 = vrot.lane.b32.xlu1 %v5289_v1, %s5757_s1  ;;  %v5291_v4 = vpop.eup %5290 }
 0x432   :  { %v526_v7 = vadd.f32 1.0, %v5291_v4  ;;  %v5293_v8 = vpop.eup %5292 }
 0x433   :  { %v697_v10 = vadd.f32 1.0, %v5293_v8 }
 0x434   :  { %5294 = vrcp.f32 %v526_v7 }
 0x435   :  { %5296 = vrcp.f32 %v697_v10 }
 0x441   :  { %v5295_v12 = vpop.eup %5294 }
 0x442   :  { %v5297_v15 = vpop.eup %5296  ;;  %v530_v18 = vmul.f32 %v5295_v12, %v5946_v39  ;;  %v6037_v39 = vld [vmem:[#allocation11 + $0x10] sm:$0xff] }
 0x443   :  { %v701_v21 = vmul.f32 0.0, %v5297_v15 }
 0x493   :  { %v533_v13 = vpop.permute.xlu0 %532 }
 0x494   :  { %v535_v14 = vmul.f32 %v5295_v12, %v533_v13 }
 0x496   :  { %537 = vrot.lane.b32.xlu0 %v535_v14, %s5758_s22 }
 0x4a3   :  { %v704_v16 = vpop.permute.xlu1 %703 }
 0x4a4   :  { %v706_v17 = vmul.f32 %v5297_v15, %v704_v16  ;;  %v6120_v16 = vld [vmem:[%s6753_s9] ss:$0 sm:$0xff] }
 0x4a6   :  { %708 = vrot.lane.b32.xlu1 %v706_v17, %s5758_s22 }
 0x508   :  { %v538_v19 = vpop.permute.xlu0 %537 }
 0x509   :  { %v6021_v20 = vadd.f32 %v538_v19, %v530_v18 }
 0x50b   :  { %5298 = vtanh.f32 %v6021_v20 }
 0x518   :  { %v5299_v22 = vpop.eup %5298  ;;  %v709_v23 = vpop.permute.xlu1 %708 }
 0x519   :  { %v6024_v24 = vadd.f32 %v709_v23, %v701_v21  ;;  %543 = vrot.lane.b32.xlu0 %v5299_v22, %s5757_s1 }
 0x51b   :  { %5300 = vtanh.f32 %v6024_v24 }
 0x528   :  { %v5301_v32 = vpop.eup %5300 }
 0x529   :  { %714 = vrot.lane.b32.xlu1 %v5301_v32, %s5757_s1 }
 0x58b   :  { %v544_v33 = vpop.permute.xlu0 %543 }
 0x58c   :  { %v546_v34 = vmul.f32 %v5295_v12, %v544_v33 }
 0x58e   :  { %719 = vrot.lane.b32.xlu0 %v546_v34, %s5758_s22 }
 0x59b   :  { %v715_v35 = vpop.permute.xlu1 %714 }
 0x59c   :  { %v717_v36 = vmul.f32 %v5297_v15, %v715_v35 }
 0x59e   :  { %889 = vrot.lane.b32.xlu1 %v717_v36, %s5758_s22 }
 0x600   :  { %v720_v38 = vpop.permute.xlu0 %719 }
 0x601   :  { %4766 = vmatmul.mubr.msk.f32.vlgmr.msra.gmra.mxu1 %vm348_vm1, %v720_v38  ;;  %4777 = vmatmul.mubr.msk.f32.vlgmr.msra.gmra.mxu0 %vm348_vm1, %v720_v38 }
 0x602   :  { %4780 = vmatpush3.msra.mxu1 %v5976_v48  ;;  %4791 = vmatpush3.msra.mxu0 %v6033_v37 }
 0x603   :  { %4781 = vmatprep.subr.mxu1 %v5755_v0  ;;  %4792 = vmatprep.subr.mxu0 %v5755_v0 }
 0x604   :  { %4782 = vmatpush3.msra.mxu1 %v5981_v49  ;;  %4793 = vmatpush3.msra.mxu0 %v6037_v39 }
 0x605   :  { %4783 = vmatprep.subr.mxu1 %v5755_v0  ;;  %4794 = vmatprep.subr.mxu0 %v5755_v0 }
 0x606   :  { %4784 = vmatpush3.msra.mxu1 %v5987_v50  ;;  %4795 = vmatpush3.msra.mxu0 %v6043_v40 }
 0x607   :  { %4785 = vmatprep.subr.mxu1 %v5755_v0  ;;  %4796 = vmatprep.subr.mxu0 %v5755_v0 }
 0x608   :  { %4786 = vmatpush3.msra.mxu1 %v5991_v51  ;;  %4787 = vmatprep.mubr.msk.f32.mxu1 %vm5756_vm0, %v5755_v0 }
 0x609   :  { %4797 = vmatpush3.msra.mxu0 %v6051_v45  ;;  %4798 = vmatprep.mubr.msk.f32.mxu0 %vm5756_vm0, %v5755_v0 }
 0x60a   :  { %4801 = vmatprep.subr.mxu1 %v5755_v0  ;;  %4812 = vmatprep.subr.mxu0 %v5755_v0 }
 0x610   :  { %v890_v47 = vpop.permute.xlu1 %889 }
 0x611   :  { %4788 = vmatmul.mubr.msk.f32.vlgmr.msra.gmra.mxu1 %vm348_vm1, %v890_v47  ;;  %4799 = vmatmul.mubr.msk.f32.vlgmr.msra.gmra.mxu0 %vm348_vm1, %v890_v47 }
 0x612   :  { %4802 = vmatpush3.msra.mxu1 %v6063_v46  ;;  %4809 = vmatprep.mubr.msk.f32.mxu1 %vm5756_vm0, %v5755_v0 }
 0x613   :  { %4803 = vmatprep.subr.mxu1 %v5755_v0  ;;  %4813 = vmatpush3.msra.mxu0 %v5908_v5 }
 0x614   :  { %4804 = vmatpush3.msra.mxu1 %v6067_v52  ;;  %4814 = vmatprep.subr.mxu0 %v5755_v0 }
 0x615   :  { %4805 = vmatprep.subr.mxu1 %v5755_v0  ;;  %4815 = vmatpush3.msra.mxu0 %v5911_v6 }
 0x616   :  { %4806 = vmatpush3.msra.mxu1 %v6073_v53  ;;  %4816 = vmatprep.subr.mxu0 %v5755_v0 }
 0x617   :  { %4807 = vmatprep.subr.mxu1 %v5755_v0  ;;  %4817 = vmatpush3.msra.mxu0 %v5915_v9 }
 0x618   :  { %4808 = vmatpush3.msra.mxu1 %v6079_v54  ;;  %4818 = vmatprep.subr.mxu0 %v5755_v0 }
 0x619   :  { %4810 = vmatmul.mubr.f32.vlgmr.msra.gmra.mxu1 %v5755_v0  ;;  %4823 = vmatprep.subr.mxu1 %v5755_v0 }
 0x61a   :  { %4824 = vmatpush3.msra.mxu1 %v5950_v41  ;;  %4819 = vmatpush3.msra.mxu0 %v5918_v11 }
 0x61b   :  { %4825 = vmatprep.subr.mxu1 %v5755_v0  ;;  %4820 = vmatprep.mubr.msk.f32.mxu0 %vm5756_vm0, %v5755_v0 }
 0x61c   :  { %4826 = vmatpush3.msra.mxu1 %v5954_v42  ;;  %4831 = vmatprep.mubr.msk.f32.mxu1 %vm5756_vm0, %v5755_v0 }
 0x61d   :  { %4827 = vmatprep.subr.mxu1 %v5755_v0  ;;  %4834 = vmatprep.subr.mxu0 %v5755_v0 }
 0x61e   :  { %4828 = vmatpush3.msra.mxu1 %v5957_v43 }
 0x61f   :  { %4829 = vmatprep.subr.mxu1 %v5755_v0 }
 0x620   :  { %4830 = vmatpush3.msra.mxu1 %v5961_v44 }
 0x621   :  { %4845 = vmatprep.subr.mxu1 %v5755_v0 }
 0x6c1   :  { %v789_v63 = vpop.f32.mrf.mxu1  ;;  %v884_v1 = vpop.f32.mrf.mxu0 }
 0x6c2   :  { %v793_v2 = vadd.f32 %v789_v63, %v298_v62  ;;  %v885_v7 = vadd.f32 %v6013_v58, %v884_v1 }
 0x6c3   :  { %v4767_v3 = vpop.f32.mrf.mxu1  ;;  %v4778_v4 = vpop.f32.mrf.mxu0 }
 0x6c4   :  { %5302 = vtanh.f32 %v793_v2  ;;  %v4318_v25 = vmul.f32 -1.442695, %v793_v2 }
 0x6d1   :  { %v5303_v8 = vpop.eup %5302  ;;  %v959_v10 = vpop.f32.mrf.mxu1 }
 0x6d2   :  { %v1060_v12 = vpop.f32.mrf.mxu0  ;;  %v963_v13 = vadd.f32 %v959_v10, %v885_v7  ;;  %803 = vrot.lane.b32.xlu0 %v5303_v8, %s5757_s1 }
 0x6d3   :  { %v4789_v15 = vpop.f32.mrf.mxu1  ;;  %v1061_v17 = vadd.f32 %v6120_v16, %v1060_v12 }
 0x6d4   :  { %v4800_v14 = vpop.f32.mrf.mxu0  ;;  %5304 = vtanh.f32 %v963_v13  ;;  %v4321_v27 = vmul.f32 -1.442695, %v963_v13 }
 0x6d9   :  { %v1130_v18 = vpop.f32.mrf.mxu1 }
 0x6da   :  { %v1134_v19 = vadd.f32 %v1130_v18, %v1061_v17 }
 0x6db   :  { %v4811_v21 = vpop.f32.mrf.mxu1 }
 0x6dc   :  { %5306 = vtanh.f32 %v1134_v19  ;;  %v4324_v30 = vmul.f32 -1.442695, %v1134_v19 }
 0x6dd   :  { %5308 = vpow2.f32 %v4318_v25 }
 0x6de   :  { %5310 = vpow2.f32 %v4321_v27 }
 0x6e1   :  { %v5305_v22 = vpop.eup %5304 }
 0x6e2   :  { %973 = vrot.lane.b32.xlu1 %v5305_v22, %s5757_s1 }
 0x6e9   :  { %v5307_v23 = vpop.eup %5306 }
 0x6ea   :  { %1144 = vrot.lane.b32.xlu0 %v5307_v23, %s5757_s1  ;;  %v5309_v28 = vpop.eup %5308 }
 0x6eb   :  { %v797_v29 = vadd.f32 1.0, %v5309_v28  ;;  %v5311_v31 = vpop.eup %5310 }
 0x6ec   :  { %v967_v32 = vadd.f32 1.0, %v5311_v31 }
 0x6ed   :  { %5312 = vrcp.f32 %v797_v29 }
 0x6ee   :  { %5314 = vpow2.f32 %v4324_v30 }
 0x6ef   :  { %5316 = vrcp.f32 %v967_v32 }
 0x6fa   :  { %v5313_v33 = vpop.eup %5312 }
 0x6fb   :  { %v5315_v36 = vpop.eup %5314  ;;  %v801_v3 = vmul.f32 %v5313_v33, %v6021_v20 }
 0x6fc   :  { %v1138_v38 = vadd.f32 1.0, %v5315_v36  ;;  %v5317_v47 = vpop.eup %5316 }
 0x6fd   :  { %v971_v8 = vmul.f32 %v5317_v47, %v6024_v24 }
 0x6fe   :  { %5318 = vrcp.f32 %v1138_v38 }
 0x70b   :  { %v5319_v63 = vpop.eup %5318 }
 0x70c   :  { %v1142_v14 = vmul.f32 0.0, %v5319_v63 }
 0x744   :  { %v804_v34 = vpop.permute.xlu0 %803 }
 0x745   :  { %v806_v35 = vmul.f32 %v5313_v33, %v804_v34 }
 0x747   :  { %808 = vrot.lane.b32.xlu1 %v806_v35, %s5758_s22 }
 0x754   :  { %v974_v56 = vpop.permute.xlu1 %973 }
 0x755   :  { %v976_v62 = vmul.f32 %v5317_v47, %v974_v56 }
 0x757   :  { %978 = vrot.lane.b32.xlu0 %v976_v62, %s5758_s22 }
 0x75c   :  { %v1145_v1 = vpop.permute.xlu0 %1144 }
 0x75d   :  { %v1147_v2 = vmul.f32 %v5319_v63, %v1145_v1 }
 0x75f   :  { %1149 = vrot.lane.b32.xlu1 %v1147_v2, %s5758_s22 }
 0x7b9   :  { %v809_v4 = vpop.permute.xlu1 %808 }
 0x7ba   :  { %v6129_v7 = vadd.f32 %v809_v4, %v801_v3 }
 0x7bc   :  { %5320 = vtanh.f32 %v6129_v7 }
 0x7c9   :  { %v5321_v10 = vpop.eup %5320  ;;  %v979_v12 = vpop.permute.xlu0 %978 }
 0x7ca   :  { %v6133_v13 = vadd.f32 %v979_v12, %v971_v8  ;;  %814 = vrot.lane.b32.xlu0 %v5321_v10, %s5757_s1 }
 0x7cc   :  { %5322 = vtanh.f32 %v6133_v13 }
 0x7d1   :  { %v1150_v15 = vpop.permute.xlu1 %1149 }
 0x7d2   :  { %v6137_v17 = vadd.f32 %v1150_v15, %v1142_v14 }
 0x7d4   :  { %5324 = vtanh.f32 %v6137_v17 }
 0x7d9   :  { %v5323_v20 = vpop.eup %5322 }
 0x7da   :  { %984 = vrot.lane.b32.xlu1 %v5323_v20, %s5757_s1 }
 0x7e1   :  { %v5325_v18 = vpop.eup %5324 }
 0x7e2   :  { %1155 = vrot.lane.b32.xlu0 %v5325_v18, %s5757_s1 }
 0x83c   :  { %v815_v24 = vpop.permute.xlu0 %814 }
 0x83d   :  { %v817_v19 = vmul.f32 %v5313_v33, %v815_v24 }
 0x83f   :  { %1160 = vrot.lane.b32.xlu1 %v817_v19, %s5758_s22 }
 0x84c   :  { %v985_v21 = vpop.permute.xlu1 %984 }
 0x84d   :  { %v987_v22 = vmul.f32 %v5317_v47, %v985_v21 }
 0x84f   :  { %1330 = vrot.lane.b32.xlu0 %v987_v22, %s5758_s22 }
 0x854   :  { %v1156_v23 = vpop.permute.xlu0 %1155 }
 0x855   :  { %v1158_v25 = vmul.f32 %v5319_v63, %v1156_v23 }
 0x857   :  { %1500 = vrot.lane.b32.xlu1 %v1158_v25, %s5758_s22 }
 0x8b1   :  { %v1161_v27 = vpop.permute.xlu1 %1160 }
 0x8b2   :  { %4821 = vmatmul.mubr.msk.f32.vlgmr.msra.gmra.mxu0 %vm348_vm1, %v1161_v27  ;;  %4832 = vmatmul.mubr.msk.f32.vlgmr.msra.gmra.mxu1 %vm348_vm1, %v1161_v27 }
 0x8b3   :  { %4835 = vmatpush3.msra.mxu0 %v5976_v48  ;;  %4846 = vmatpush3.msra.mxu1 %v6033_v37 }
 0x8b4   :  { %4836 = vmatprep.subr.mxu0 %v5755_v0  ;;  %4847 = vmatprep.subr.mxu1 %v5755_v0 }
 0x8b5   :  { %4837 = vmatpush3.msra.mxu0 %v5981_v49  ;;  %4848 = vmatpush3.msra.mxu1 %v6037_v39 }
 0x8b6   :  { %4838 = vmatprep.subr.mxu0 %v5755_v0  ;;  %4849 = vmatprep.subr.mxu1 %v5755_v0 }
 0x8b7   :  { %4839 = vmatpush3.msra.mxu0 %v5987_v50  ;;  %4850 = vmatpush3.msra.mxu1 %v6043_v40 }
 0x8b8   :  { %4840 = vmatprep.subr.mxu0 %v5755_v0  ;;  %4851 = vmatprep.subr.mxu1 %v5755_v0 }
 0x8b9   :  { %4841 = vmatpush3.msra.mxu0 %v5991_v51  ;;  %4842 = vmatprep.mubr.msk.f32.mxu0 %vm5756_vm0, %v5755_v0 }
 0x8ba   :  { %4852 = vmatpush3.msra.mxu1 %v6051_v45  ;;  %4853 = vmatprep.mubr.msk.f32.mxu1 %vm5756_vm0, %v5755_v0 }
 0x8bb   :  { %4856 = vmatprep.subr.mxu0 %v5755_v0  ;;  %4867 = vmatprep.subr.mxu1 %v5755_v0 }
 0x8c1   :  { %v1331_v28 = vpop.permute.xlu0 %1330 }
 0x8c2   :  { %4843 = vmatmul.mubr.msk.f32.vlgmr.msra.gmra.mxu0 %vm348_vm1, %v1331_v28  ;;  %4854 = vmatmul.mubr.msk.f32.vlgmr.msra.gmra.mxu1 %vm348_vm1, %v1331_v28 }
 0x8c3   :  { %4857 = vmatpush3.msra.mxu0 %v6063_v46  ;;  %4864 = vmatprep.mubr.msk.f32.mxu0 %vm5756_vm0, %v5755_v0 }
 0x8c4   :  { %4858 = vmatprep.subr.mxu0 %v5755_v0  ;;  %4868 = vmatpush3.msra.mxu1 %v5908_v5  ;;  %v303_v5 = vadd.f32 %v6104_v55, %v5941_v26 }
 0x8c5   :  { %4859 = vmatpush3.msra.mxu0 %v6067_v52  ;;  %4869 = vmatprep.subr.mxu1 %v5755_v0 }
 0x8c6   :  { %4860 = vmatprep.subr.mxu0 %v5755_v0  ;;  %4870 = vmatpush3.msra.mxu1 %v5911_v6 }
 0x8c7   :  { %4861 = vmatpush3.msra.mxu0 %v6073_v53  ;;  %4871 = vmatprep.subr.mxu1 %v5755_v0 }
 0x8c8   :  { %4862 = vmatprep.subr.mxu0 %v5755_v0  ;;  %4872 = vmatpush3.msra.mxu1 %v5915_v9 }
 0x8c9   :  { %v6182_v29 = vpop.permute.xlu1 %1500  ;;  %4863 = vmatpush3.msra.mxu0 %v6079_v54  ;;  %4873 = vmatprep.subr.mxu1 %v5755_v0 }
 0x8ca   :  { %4865 = vmatmul.mubr.msk.f32.vlgmr.msra.gmra.mxu0 %vm348_vm1, %v6182_v29  ;;  %4878 = vmatprep.subr.mxu0 %v5755_v0 }
 0x8cb   :  { %4879 = vmatpush3.msra.mxu0 %v5950_v41  ;;  %4874 = vmatpush3.msra.mxu1 %v5918_v11 }
 0x8cc   :  { %4880 = vmatprep.subr.mxu0 %v5755_v0  ;;  %4875 = vmatprep.mubr.msk.f32.mxu1 %vm5756_vm0, %v5755_v0 }
 0x8cd   :  { %4881 = vmatpush3.msra.mxu0 %v5954_v42  ;;  %4886 = vmatprep.mubr.msk.f32.mxu0 %vm5756_vm0, %v5755_v0 }
 0x8ce   :  { %4882 = vmatprep.subr.mxu0 %v5755_v0  ;;  %4889 = vmatprep.subr.mxu1 %v5755_v0 }
 0x8cf   :  { %4883 = vmatpush3.msra.mxu0 %v5957_v43 }
 0x8d0   :  { %4884 = vmatprep.subr.mxu0 %v5755_v0 }
 0x8d1   :  { %4885 = vmatpush3.msra.mxu0 %v5961_v44 }
 0x8d2   :  { %4900 = vmatprep.subr.mxu0 %v5755_v0 }
 0x972   :  { %v1230_v6 = vpop.f32.mrf.mxu0  ;;  %v1325_v9 = vpop.f32.mrf.mxu1 }
 0x973   :  { %v1234_v11 = vadd.f32 %v1230_v6, %v303_v5  ;;  %v1326_v32 = vadd.f32 %v6013_v58, %v1325_v9 }
 0x974   :  { %v4822_v30 = vpop.f32.mrf.mxu0  ;;  %v4833_v31 = vpop.f32.mrf.mxu1 }
 0x975   :  { %5326 = vtanh.f32 %v1234_v11  ;;  %v4326_v3 = vmul.f32 -1.442695, %v1234_v11 }
 0x982   :  { %v5327_v33 = vpop.eup %5326  ;;  %v1400_v34 = vpop.f32.mrf.mxu0 }
 0x983   :  { %v1495_v35 = vpop.f32.mrf.mxu1  ;;  %v1404_v36 = vadd.f32 %v1400_v34, %v1326_v32  ;;  %1244 = vrot.lane.b32.xlu0 %v5327_v33, %s5757_s1 }
 0x984   :  { %v4844_v38 = vpop.f32.mrf.mxu0  ;;  %v1496_v56 = vadd.f32 %v6120_v16, %v1495_v35 }
 0x985   :  { %v4855_v47 = vpop.f32.mrf.mxu1  ;;  %5328 = vtanh.f32 %v1404_v36  ;;  %v4329_v4 = vmul.f32 -1.442695, %v1404_v36 }
 0x98a   :  { %v1570_v55 = vpop.f32.mrf.mxu0 }
 0x98b   :  { %v1574_v62 = vadd.f32 %v1570_v55, %v1496_v56 }
 0x98c   :  { %v4866_v63 = vpop.f32.mrf.mxu0 }
 0x98d   :  { %5330 = vtanh.f32 %v1574_v62  ;;  %v4332_v12 = vmul.f32 -1.442695, %v1574_v62 }
 0x98e   :  { %5332 = vpow2.f32 %v4326_v3  ;;  %v6265_v3 = vld [vmem:[#allocation7 + $0x10] sm:$0xff] }
 0x98f   :  { %5334 = vpow2.f32 %v4329_v4  ;;  %v6271_v4 = vld [vmem:[#allocation7 + $0x8] sm:$0xff] }
 0x992   :  { %v5329_v1 = vpop.eup %5328 }
 0x993   :  { %1414 = vrot.lane.b32.xlu1 %v5329_v1, %s5757_s1 }
 0x99a   :  { %v5331_v2 = vpop.eup %5330 }
 0x99b   :  { %1584 = vrot.lane.b32.xlu0 %v5331_v2, %s5757_s1  ;;  %v5333_v8 = vpop.eup %5332  ;;  %v6259_v2 = vld [vmem:[#allocation7 + $0x18] sm:$0xff] }
 0x99c   :  { %v1238_v10 = vadd.f32 1.0, %v5333_v8  ;;  %v5335_v14 = vpop.eup %5334 }
 0x99d   :  { %v1408_v15 = vadd.f32 1.0, %v5335_v14 }
 0x99e   :  { %5336 = vrcp.f32 %v1238_v10  ;;  %v6282_v10 = vld [vmem:[#allocation7] sm:$0xff] }
 0x99f   :  { %5338 = vpow2.f32 %v4332_v12 }
 0x9a0   :  { %5340 = vrcp.f32 %v1408_v15 }
 0x9ab   :  { %v5337_v20 = vpop.eup %5336 }
 0x9ac   :  { %v5339_v19 = vpop.eup %5338  ;;  %v1242_v6 = vmul.f32 %v5337_v20, %v6129_v7 }
 0x9ad   :  { %v1578_v21 = vadd.f32 1.0, %v5339_v19  ;;  %v5341_v22 = vpop.eup %5340 }
 0x9ae   :  { %v1412_v30 = vmul.f32 %v5341_v22, %v6133_v13 }
 0x9af   :  { %5342 = vrcp.f32 %v1578_v21 }
 0x9bc   :  { %v5343_v27 = vpop.eup %5342 }
 0x9bd   :  { %v1582_v34 = vmul.f32 %v5343_v27, %v6137_v17 }
 0x9f5   :  { %v1245_v18 = vpop.permute.xlu0 %1244 }
 0x9f6   :  { %v1247_v24 = vmul.f32 %v5337_v20, %v1245_v18 }
 0x9f8   :  { %1249 = vrot.lane.b32.xlu1 %v1247_v24, %s5758_s22 }
 0xa05   :  { %v1415_v23 = vpop.permute.xlu1 %1414 }
 0xa06   :  { %v1417_v25 = vmul.f32 %v5341_v22, %v1415_v23 }
 0xa08   :  { %1419 = vrot.lane.b32.xlu0 %v1417_v25, %s5758_s22 }
 0xa0d   :  { %v1585_v28 = vpop.permute.xlu0 %1584 }
 0xa0e   :  { %v1587_v5 = vmul.f32 %v5343_v27, %v1585_v28 }
 0xa10   :  { %1589 = vrot.lane.b32.xlu1 %v1587_v5, %s5758_s22 }
 0xa6a   :  { %v1250_v9 = vpop.permute.xlu1 %1249 }
 0xa6b   :  { %v6214_v11 = vadd.f32 %v1250_v9, %v1242_v6 }
 0xa6d   :  { %5344 = vtanh.f32 %v6214_v11 }
 0xa7a   :  { %v5345_v31 = vpop.eup %5344  ;;  %v1420_v32 = vpop.permute.xlu0 %1419 }
 0xa7b   :  { %v6218_v33 = vadd.f32 %v1420_v32, %v1412_v30  ;;  %1255 = vrot.lane.b32.xlu0 %v5345_v31, %s5757_s1 }
 0xa7d   :  { %5346 = vtanh.f32 %v6218_v33 }
 0xa82   :  { %v1590_v35 = vpop.permute.xlu1 %1589 }
 0xa83   :  { %v6223_v36 = vadd.f32 %v1590_v35, %v1582_v34 }
 0xa85   :  { %5348 = vtanh.f32 %v6223_v36 }
 0xa8a   :  { %v5347_v7 = vpop.eup %5346 }
 0xa8b   :  { %1425 = vrot.lane.b32.xlu1 %v5347_v7, %s5757_s1 }
 0xa92   :  { %v5349_v38 = vpop.eup %5348 }
 0xa93   :  { %1595 = vrot.lane.b32.xlu0 %v5349_v38, %s5757_s1 }
 0xaed   :  { %v1256_v13 = vpop.permute.xlu0 %1255 }
 0xaee   :  { %v1258_v47 = vmul.f32 %v5337_v20, %v1256_v13 }
 0xaf0   :  { %1600 = vrot.lane.b32.xlu1 %v1258_v47, %s5758_s22 }
 0xafd   :  { %v1426_v56 = vpop.permute.xlu1 %1425 }
 0xafe   :  { %v1428_v55 = vmul.f32 %v5341_v22, %v1426_v56 }
 0xb00   :  { %1770 = vrot.lane.b32.xlu0 %v1428_v55, %s5758_s22 }
 0xb05   :  { %v1596_v17 = vpop.permute.xlu0 %1595 }
 0xb06   :  { %v1598_v62 = vmul.f32 %v5343_v27, %v1596_v17 }
 0xb08   :  { %1940 = vrot.lane.b32.xlu1 %v1598_v62, %s5758_s22 }
 0xb62   :  { %v1601_v63 = vpop.permute.xlu1 %1600 }
 0xb63   :  { %4876 = vmatmul.mubr.msk.f32.vlgmr.msra.gmra.mxu1 %vm348_vm1, %v1601_v63  ;;  %4887 = vmatmul.mubr.msk.f32.vlgmr.msra.gmra.mxu0 %vm348_vm1, %v1601_v63 }
 0xb64   :  { %4890 = vmatpush3.msra.mxu1 %v5976_v48  ;;  %4901 = vmatpush3.msra.mxu0 %v6033_v37 }
 0xb65   :  { %4891 = vmatprep.subr.mxu1 %v5755_v0  ;;  %4902 = vmatprep.subr.mxu0 %v5755_v0 }
 0xb66   :  { %4892 = vmatpush3.msra.mxu1 %v5981_v49  ;;  %4903 = vmatpush3.msra.mxu0 %v6037_v39 }
 0xb67   :  { %4893 = vmatprep.subr.mxu1 %v5755_v0  ;;  %4904 = vmatprep.subr.mxu0 %v5755_v0 }
 0xb68   :  { %4894 = vmatpush3.msra.mxu1 %v5987_v50  ;;  %4905 = vmatpush3.msra.mxu0 %v6043_v40 }
 0xb69   :  { %4895 = vmatprep.subr.mxu1 %v5755_v0  ;;  %4906 = vmatprep.subr.mxu0 %v5755_v0 }
 0xb6a   :  { %4896 = vmatpush3.msra.mxu1 %v5991_v51  ;;  %4897 = vmatprep.mubr.msk.f32.mxu1 %vm5756_vm0, %v5755_v0 }
 0xb6b   :  { %4907 = vmatpush3.msra.mxu0 %v6051_v45  ;;  %4908 = vmatprep.mubr.msk.f32.mxu0 %vm5756_vm0, %v5755_v0 }
 0xb6c   :  { %4911 = vmatprep.subr.mxu1 %v5755_v0  ;;  %4922 = vmatprep.subr.mxu0 %v5755_v0 }
 0xb72   :  { %v1771_v1 = vpop.permute.xlu0 %1770 }
 0xb73   :  { %4898 = vmatmul.mubr.msk.f32.vlgmr.msra.gmra.mxu1 %vm348_vm1, %v1771_v1  ;;  %4909 = vmatmul.mubr.msk.f32.vlgmr.msra.gmra.mxu0 %vm348_vm1, %v1771_v1 }
 0xb74   :  { %4912 = vmatpush3.msra.mxu1 %v6063_v46  ;;  %4919 = vmatprep.mubr.msk.f32.mxu1 %vm5756_vm0, %v5755_v0 }
 0xb75   :  { %4913 = vmatprep.subr.mxu1 %v5755_v0  ;;  %4923 = vmatpush3.msra.mxu0 %v6259_v2 }
 0xb76   :  { %4914 = vmatpush3.msra.mxu1 %v6067_v52  ;;  %4924 = vmatprep.subr.mxu0 %v5755_v0 }
 0xb77   :  { %4915 = vmatprep.subr.mxu1 %v5755_v0  ;;  %4925 = vmatpush3.msra.mxu0 %v6265_v3 }
 0xb78   :  { %4916 = vmatpush3.msra.mxu1 %v6073_v53  ;;  %4926 = vmatprep.subr.mxu0 %v5755_v0 }
 0xb79   :  { %4917 = vmatprep.subr.mxu1 %v5755_v0  ;;  %4927 = vmatpush3.msra.mxu0 %v6271_v4 }
 0xb7a   :  { %v6274_v8 = vpop.permute.xlu1 %1940  ;;  %4918 = vmatpush3.msra.mxu1 %v6079_v54  ;;  %4928 = vmatprep.subr.mxu0 %v5755_v0 }
 0xb7b   :  { %4920 = vmatmul.mubr.msk.f32.vlgmr.msra.gmra.mxu1 %vm348_vm1, %v6274_v8  ;;  %4933 = vmatprep.subr.mxu1 %v5755_v0 }
 0xb7c   :  { %4934 = vmatpush3.msra.mxu1 %v5950_v41  ;;  %4929 = vmatpush3.msra.mxu0 %v6282_v10  ;;  %v308_v41 = vadd.f32 %v5941_v26, %v6108_v59 }
 0xb7d   :  { %4935 = vmatprep.subr.mxu1 %v5755_v0  ;;  %4930 = vmatprep.mubr.msk.f32.mxu0 %vm5756_vm0, %v5755_v0 }
 0xb7e   :  { %4936 = vmatpush3.msra.mxu1 %v5954_v42  ;;  %4941 = vmatprep.mubr.msk.f32.mxu1 %vm5756_vm0, %v5755_v0 }
 0xb7f   :  { %4937 = vmatprep.subr.mxu1 %v5755_v0  ;;  %4944 = vmatprep.subr.mxu0 %v5755_v0 }
 0xb80   :  { %4938 = vmatpush3.msra.mxu1 %v5957_v43 }
 0xb81   :  { %4939 = vmatprep.subr.mxu1 %v5755_v0 }
 0xb82   :  { %4940 = vmatpush3.msra.mxu1 %v5961_v44 }
 0xb83   :  { %4955 = vmatprep.subr.mxu1 %v5755_v0 }
 0xc23   :  { %v1670_v12 = vpop.f32.mrf.mxu1  ;;  %v1765_v42 = vpop.f32.mrf.mxu0 }
 0xc24   :  { %v1674_v14 = vadd.f32 %v1670_v12, %v308_v41  ;;  %v1766_v18 = vadd.f32 %v6013_v58, %v1765_v42 }
 0xc25   :  { %v4877_v15 = vpop.f32.mrf.mxu1  ;;  %v4888_v20 = vpop.f32.mrf.mxu0 }
 0xc26   :  { %5350 = vtanh.f32 %v1674_v14  ;;  %v4334_v58 = vmul.f32 -1.442695, %v1674_v14 }
 0xc33   :  { %v5351_v24 = vpop.eup %5350  ;;  %v1840_v19 = vpop.f32.mrf.mxu1 }
 0xc34   :  { %v1935_v43 = vpop.f32.mrf.mxu0  ;;  %v1844_v21 = vadd.f32 %v1840_v19, %v1766_v18  ;;  %1684 = vrot.lane.b32.xlu0 %v5351_v24, %s5757_s1 }
 0xc35   :  { %v4899_v22 = vpop.f32.mrf.mxu1  ;;  %v1936_v23 = vadd.f32 %v6120_v16, %v1935_v43 }
 0xc36   :  { %v4910_v44 = vpop.f32.mrf.mxu0  ;;  %5352 = vtanh.f32 %v1844_v21  ;;  %v4337_v5 = vmul.f32 -1.442695, %v1844_v21 }
 0xc3b   :  { %v2010_v26 = vpop.f32.mrf.mxu1 }
 0xc3c   :  { %v2014_v59 = vadd.f32 %v2010_v26, %v1936_v23 }
 0xc3d   :  { %v4921_v25 = vpop.f32.mrf.mxu1 }
 0xc3e   :  { %5354 = vtanh.f32 %v2014_v59  ;;  %v4340_v30 = vmul.f32 -1.442695, %v2014_v59  ;;  %v6401_v25 = vld [vmem:[%s6750_s6] ss:$0 sm:$0xff] }
 0xc3f   :  { %5356 = vpow2.f32 %v4334_v58 }
 0xc40   :  { %5358 = vpow2.f32 %v4337_v5 }
 0xc43   :  { %v5353_v27 = vpop.eup %5352 }
 0xc44   :  { %1854 = vrot.lane.b32.xlu1 %v5353_v27, %s5757_s1 }
 0xc4b   :  { %v5355_v28 = vpop.eup %5354 }
 0xc4c   :  { %2024 = vrot.lane.b32.xlu0 %v5355_v28, %s5757_s1  ;;  %v5357_v6 = vpop.eup %5356 }
 0xc4d   :  { %v1678_v9 = vadd.f32 1.0, %v5357_v6  ;;  %v5359_v31 = vpop.eup %5358 }
 0xc4e   :  { %v1848_v32 = vadd.f32 1.0, %v5359_v31 }
 0xc4f   :  { %5360 = vrcp.f32 %v1678_v9 }
 0xc50   :  { %5362 = vpow2.f32 %v4340_v30 }
 0xc51   :  { %5364 = vrcp.f32 %v1848_v32 }
 0xc5c   :  { %v5361_v34 = vpop.eup %5360 }
 0xc5d   :  { %v5363_v38 = vpop.eup %5362  ;;  %v1682_v1 = vmul.f32 %v5361_v34, %v6214_v11 }
 0xc5e   :  { %v2018_v13 = vadd.f32 1.0, %v5363_v38  ;;  %v5365_v47 = vpop.eup %5364 }
 0xc5f   :  { %v1852_v42 = vmul.f32 %v5365_v47, %v6218_v33 }
 0xc60   :  { %5366 = vrcp.f32 %v2018_v13 }
 0xc6d   :  { %v5367_v17 = vpop.eup %5366 }
 0xc6e   :  { %v2022_v18 = vmul.f32 %v5367_v17, %v6223_v36 }
 0xca6   :  { %v1685_v35 = vpop.permute.xlu0 %1684 }
 0xca7   :  { %v1687_v7 = vmul.f32 %v5361_v34, %v1685_v35 }
 0xca9   :  { %1689 = vrot.lane.b32.xlu1 %v1687_v7, %s5758_s22 }
 0xcb6   :  { %v1855_v56 = vpop.permute.xlu1 %1854 }
 0xcb7   :  { %v1857_v55 = vmul.f32 %v5365_v47, %v1855_v56 }
 0xcb9   :  { %1859 = vrot.lane.b32.xlu0 %v1857_v55, %s5758_s22 }
 0xcbe   :  { %v2025_v62 = vpop.permute.xlu0 %2024 }
 0xcbf   :  { %v2027_v63 = vmul.f32 %v5367_v17, %v2025_v62 }
 0xcc1   :  { %2029 = vrot.lane.b32.xlu1 %v2027_v63, %s5758_s22 }
 0xd1b   :  { %v1690_v41 = vpop.permute.xlu1 %1689 }
 0xd1c   :  { %v6308_v12 = vadd.f32 %v1690_v41, %v1682_v1 }
 0xd1e   :  { %5368 = vtanh.f32 %v6308_v12 }
 0xd2b   :  { %v5369_v14 = vpop.eup %5368  ;;  %v1860_v15 = vpop.permute.xlu0 %1859 }
 0xd2c   :  { %v6312_v20 = vadd.f32 %v1860_v15, %v1852_v42  ;;  %1695 = vrot.lane.b32.xlu0 %v5369_v14, %s5757_s1 }
 0xd2e   :  { %5370 = vtanh.f32 %v6312_v20 }
 0xd33   :  { %v2030_v24 = vpop.permute.xlu1 %2029 }
 0xd34   :  { %v6317_v19 = vadd.f32 %v2030_v24, %v2022_v18 }
 0xd36   :  { %5372 = vtanh.f32 %v6317_v19 }
 0xd3b   :  { %v5371_v11 = vpop.eup %5370 }
 0xd3c   :  { %1865 = vrot.lane.b32.xlu1 %v5371_v11, %s5757_s1 }
 0xd43   :  { %v5373_v43 = vpop.eup %5372 }
 0xd44   :  { %2035 = vrot.lane.b32.xlu0 %v5373_v43, %s5757_s1 }
 0xd9e   :  { %v1696_v33 = vpop.permute.xlu0 %1695 }
 0xd9f   :  { %v1698_v21 = vmul.f32 %v5361_v34, %v1696_v33 }
 0xda1   :  { %2040 = vrot.lane.b32.xlu1 %v1698_v21, %s5758_s22 }
 0xdae   :  { %v1866_v44 = vpop.permute.xlu1 %1865 }
 0xdaf   :  { %v1868_v22 = vmul.f32 %v5365_v47, %v1866_v44 }
 0xdb1   :  { %2210 = vrot.lane.b32.xlu0 %v1868_v22, %s5758_s22 }
 0xdb6   :  { %v2036_v36 = vpop.permute.xlu0 %2035 }
 0xdb7   :  { %v2038_v23 = vmul.f32 %v5367_v17, %v2036_v36 }
 0xdb9   :  { %2380 = vrot.lane.b32.xlu1 %v2038_v23, %s5758_s22 }
 0xe13   :  { %v2041_v26 = vpop.permute.xlu1 %2040 }
 0xe14   :  { %4931 = vmatmul.mubr.msk.f32.vlgmr.msra.gmra.mxu0 %vm348_vm1, %v2041_v26  ;;  %4942 = vmatmul.mubr.msk.f32.vlgmr.msra.gmra.mxu1 %vm348_vm1, %v2041_v26 }
 0xe15   :  { %4945 = vmatpush3.msra.mxu0 %v5976_v48  ;;  %4956 = vmatpush3.msra.mxu1 %v6033_v37  ;;  %v6383_v37 = vld [vmem:[#allocation8 + $0x8] sm:$0xff] }
 0xe16   :  { %4946 = vmatprep.subr.mxu0 %v5755_v0  ;;  %4957 = vmatprep.subr.mxu1 %v5755_v0 }
 0xe17   :  { %4947 = vmatpush3.msra.mxu0 %v5981_v49  ;;  %4958 = vmatpush3.msra.mxu1 %v6037_v39  ;;  %v6387_v39 = vld [vmem:[#allocation8] sm:$0xff] }
 0xe18   :  { %4948 = vmatprep.subr.mxu0 %v5755_v0  ;;  %4959 = vmatprep.subr.mxu1 %v5755_v0 }
 0xe19   :  { %4949 = vmatpush3.msra.mxu0 %v5987_v50  ;;  %4960 = vmatpush3.msra.mxu1 %v6043_v40  ;;  %v6369_v50 = vld [vmem:[#allocation8 + $0x18] sm:$0xff]  ;;  %v6394_v40 = vld [vmem:[%s6747_s3] ss:$0 sm:$0xff] }
 0xe1a   :  { %4950 = vmatprep.subr.mxu0 %v5755_v0  ;;  %4961 = vmatprep.subr.mxu1 %v5755_v0 }
 0xe1b   :  { %4951 = vmatpush3.msra.mxu0 %v5991_v51  ;;  %4952 = vmatprep.mubr.msk.f32.mxu0 %vm5756_vm0, %v5755_v0  ;;  %v6376_v51 = vld [vmem:[#allocation8 + $0x10] sm:$0xff] }
 0xe1c   :  { %4962 = vmatpush3.msra.mxu1 %v6051_v45  ;;  %4963 = vmatprep.mubr.msk.f32.mxu1 %vm5756_vm0, %v5755_v0  ;;  %v313_v45 = vadd.f32 %v6394_v40, %v6106_v57 }
 0xe1d   :  { %4966 = vmatprep.subr.mxu0 %v5755_v0  ;;  %4977 = vmatprep.subr.mxu1 %v5755_v0 }
 0xe23   :  { %v2211_v48 = vpop.permute.xlu0 %2210 }
 0xe24   :  { %4953 = vmatmul.mubr.msk.f32.vlgmr.msra.gmra.mxu0 %vm348_vm1, %v2211_v48  ;;  %4964 = vmatmul.mubr.msk.f32.vlgmr.msra.gmra.mxu1 %vm348_vm1, %v2211_v48 }
 0xe25   :  { %4967 = vmatpush3.msra.mxu0 %v6063_v46  ;;  %4974 = vmatprep.mubr.msk.f32.mxu0 %vm5756_vm0, %v5755_v0 }
 0xe26   :  { %4968 = vmatprep.subr.mxu0 %v5755_v0  ;;  %4978 = vmatpush3.msra.mxu1 %v6259_v2 }
 0xe27   :  { %4969 = vmatpush3.msra.mxu0 %v6067_v52  ;;  %4979 = vmatprep.subr.mxu1 %v5755_v0 }
 0xe28   :  { %4970 = vmatprep.subr.mxu0 %v5755_v0  ;;  %4980 = vmatpush3.msra.mxu1 %v6265_v3 }
 0xe29   :  { %4971 = vmatpush3.msra.mxu0 %v6073_v53  ;;  %4981 = vmatprep.subr.mxu1 %v5755_v0 }
 0xe2a   :  { %4972 = vmatprep.subr.mxu0 %v5755_v0  ;;  %4982 = vmatpush3.msra.mxu1 %v6271_v4 }
 0xe2b   :  { %v6362_v49 = vpop.permute.xlu1 %2380  ;;  %4973 = vmatpush3.msra.mxu0 %v6079_v54  ;;  %4983 = vmatprep.subr.mxu1 %v5755_v0 }
 0xe2c   :  { %4975 = vmatmul.mubr.msk.f32.vlgmr.msra.gmra.mxu0 %vm348_vm1, %v6362_v49  ;;  %4988 = vmatprep.subr.mxu0 %v5755_v0 }
 0xe2d   :  { %4989 = vmatpush3.msra.mxu0 %v6369_v50  ;;  %4984 = vmatpush3.msra.mxu1 %v6282_v10 }
 0xe2e   :  { %4990 = vmatprep.subr.mxu0 %v5755_v0  ;;  %4985 = vmatprep.mubr.msk.f32.mxu1 %vm5756_vm0, %v5755_v0 }
 0xe2f   :  { %4991 = vmatpush3.msra.mxu0 %v6376_v51  ;;  %4996 = vmatprep.mubr.msk.f32.mxu0 %vm5756_vm0, %v5755_v0 }
 0xe30   :  { %4992 = vmatprep.subr.mxu0 %v5755_v0  ;;  %4999 = vmatprep.subr.mxu1 %v5755_v0 }
 0xe31   :  { %4993 = vmatpush3.msra.mxu0 %v6383_v37 }
 0xe32   :  { %4994 = vmatprep.subr.mxu0 %v5755_v0 }
 0xe33   :  { %4995 = vmatpush3.msra.mxu0 %v6387_v39 }
 0xe34   :  { %5010 = vmatprep.subr.mxu0 %v5755_v0 }
 0xed4   :  { %v2110_v46 = vpop.f32.mrf.mxu0  ;;  %v2205_v52 = vpop.f32.mrf.mxu1 }
 0xed5   :  { %v2114_v53 = vadd.f32 %v2110_v46, %v313_v45  ;;  %v2206_v27 = vadd.f32 %v6401_v25, %v2205_v52 }
 0xed6   :  { %v4932_v54 = vpop.f32.mrf.mxu0  ;;  %v4943_v59 = vpop.f32.mrf.mxu1 }
 0xed7   :  { %5374 = vtanh.f32 %v2114_v53  ;;  %v4342_v38 = vmul.f32 -1.442695, %v2114_v53 }
 0xee4   :  { %v5375_v28 = vpop.eup %5374  ;;  %v2280_v58 = vpop.f32.mrf.mxu0 }
 0xee5   :  { %v2375_v5 = vpop.f32.mrf.mxu1  ;;  %v2284_v6 = vadd.f32 %v2280_v58, %v2206_v27  ;;  %2124 = vrot.lane.b32.xlu0 %v5375_v28, %s5757_s1  ;;  %v6431_v58 = vld [vmem:[#allocation10 + $0x18] sm:$0xff] }
 0xee6   :  { %v4954_v57 = vpop.f32.mrf.mxu0  ;;  %v2376_v30 = vadd.f32 %v6120_v16, %v2375_v5  ;;  %v6434_v5 = vld [vmem:[#allocation11 + $0x18] sm:$0xff] }
 0xee7   :  { %v4965_v9 = vpop.f32.mrf.mxu1  ;;  %5376 = vtanh.f32 %v2284_v6  ;;  %v4345_v13 = vmul.f32 -1.442695, %v2284_v6  ;;  %v6439_v6 = vld [vmem:[#allocation10 + $0x10] sm:$0xff] }
 0xee8   :  { %v6442_v57 = vld [vmem:[#allocation11 + $0x10] sm:$0xff]  ;;  %v6447_v9 = vld [vmem:[#allocation10 + $0x8] sm:$0xff] }
 0xeec   :  { %v2450_v31 = vpop.f32.mrf.mxu0 }
 0xeed   :  { %v2454_v32 = vadd.f32 %v2450_v31, %v2376_v30  ;;  %v6450_v30 = vld [vmem:[#allocation11 + $0x8] sm:$0xff]  ;;  %v6455_v31 = vld [vmem:[#allocation10] sm:$0xff] }
 0xeee   :  { %v4976_v34 = vpop.f32.mrf.mxu0 }
 0xeef   :  { %5378 = vtanh.f32 %v2454_v32  ;;  %v4348_v55 = vmul.f32 -1.442695, %v2454_v32  ;;  %v6460_v32 = vld [vmem:[#allocation11] sm:$0xff] }
 0xef0   :  { %5380 = vpow2.f32 %v4342_v38  ;;  %v6482_v38 = vld [vmem:[#allocation13 + $0x8] sm:$0xff] }
 0xef1   :  { %5382 = vpow2.f32 %v4345_v13  ;;  %v6490_v13 = vld [vmem:[#allocation13] sm:$0xff] }
 0xef4   :  { %v5377_v35 = vpop.eup %5376 }
 0xef5   :  { %2294 = vrot.lane.b32.xlu1 %v5377_v35, %s5757_s1  ;;  %v6469_v35 = vld [vmem:[#allocation13 + $0x18] sm:$0xff] }
 0xefc   :  { %v5379_v7 = vpop.eup %5378 }
 0xefd   :  { %2464 = vrot.lane.b32.xlu0 %v5379_v7, %s5757_s1  ;;  %v5381_v47 = vpop.eup %5380  ;;  %v6476_v7 = vld [vmem:[#allocation13 + $0x10] sm:$0xff] }
 0xefe   :  { %v2118_v56 = vadd.f32 1.0, %v5381_v47  ;;  %v5383_v16 = vpop.eup %5382 }
 0xeff   :  { %v2288_v17 = vadd.f32 1.0, %v5383_v16 }
 0xf00   :  { %5384 = vrcp.f32 %v2118_v56 }
 0xf01   :  { %5386 = vpow2.f32 %v4348_v55 }
 0xf02   :  { %5388 = vrcp.f32 %v2288_v17 }
 0xf0d   :  { %v5385_v62 = vpop.eup %5384 }
 0xf0e   :  { %v5387_v41 = vpop.eup %5386  ;;  %v2122_v33 = vmul.f32 %v5385_v62, %v6308_v12 }
 0xf0f   :  { %v2458_v42 = vadd.f32 1.0, %v5387_v41  ;;  %v5389_v14 = vpop.eup %5388 }
 0xf10   :  { %v2292_v22 = vmul.f32 %v5389_v14, %v6312_v20 }
 0xf11   :  { %5390 = vrcp.f32 %v2458_v42 }
 0xf1e   :  { %v5391_v24 = vpop.eup %5390 }
 0xf1f   :  { %v2462_v48 = vmul.f32 %v5391_v24, %v6317_v19 }
 0xf57   :  { %v2125_v63 = vpop.permute.xlu0 %2124 }
 0xf58   :  { %v2127_v1 = vmul.f32 %v5385_v62, %v2125_v63 }
 0xf5a   :  { %2129 = vrot.lane.b32.xlu1 %v2127_v1, %s5758_s22 }
 0xf67   :  { %v2295_v15 = vpop.permute.xlu1 %2294 }
 0xf68   :  { %v2297_v18 = vmul.f32 %v5389_v14, %v2295_v15 }
 0xf6a   :  { %2299 = vrot.lane.b32.xlu0 %v2297_v18, %s5758_s22 }
 0xf6f   :  { %v2465_v11 = vpop.permute.xlu0 %2464 }
 0xf70   :  { %v2467_v43 = vmul.f32 %v5391_v24, %v2465_v11 }
 0xf72   :  { %2469 = vrot.lane.b32.xlu1 %v2467_v43, %s5758_s22 }
 0xfcc   :  { %v2130_v21 = vpop.permute.xlu1 %2129 }
 0xfcd   :  { %v6412_v44 = vadd.f32 %v2130_v21, %v2122_v33 }
 0xfcf   :  { %5392 = vtanh.f32 %v6412_v44 }
 0xfdc   :  { %v5393_v36 = vpop.eup %5392  ;;  %v2300_v23 = vpop.permute.xlu0 %2299 }
 0xfdd   :  { %v6416_v26 = vadd.f32 %v2300_v23, %v2292_v22  ;;  %2135 = vrot.lane.b32.xlu0 %v5393_v36, %s5757_s1 }
 0xfdf   :  { %5394 = vtanh.f32 %v6416_v26 }
 0xfe4   :  { %v2470_v45 = vpop.permute.xlu1 %2469 }
 0xfe5   :  { %v6421_v46 = vadd.f32 %v2470_v45, %v2462_v48 }
 0xfe7   :  { %5396 = vtanh.f32 %v6421_v46 }
 0xfec   :  { %v5395_v12 = vpop.eup %5394 }
 0xfed   :  { %2305 = vrot.lane.b32.xlu1 %v5395_v12, %s5757_s1 }
 0xff4   :  { %v5397_v52 = vpop.eup %5396 }
 0xff5   :  { %2475 = vrot.lane.b32.xlu0 %v5397_v52, %s5757_s1 }
0x104f   :  { %v2136_v20 = vpop.permute.xlu0 %2135 }
0x1050   :  { %v2138_v53 = vmul.f32 %v5385_v62, %v2136_v20 }
0x1052   :  { %2480 = vrot.lane.b32.xlu1 %v2138_v53, %s5758_s22 }
0x105f   :  { %v2306_v54 = vpop.permute.xlu1 %2305 }
0x1060   :  { %v2308_v59 = vmul.f32 %v5389_v14, %v2306_v54 }
0x1062   :  { %2650 = vrot.lane.b32.xlu0 %v2308_v59, %s5758_s22 }
0x1067   :  { %v2476_v19 = vpop.permute.xlu0 %2475 }
0x1068   :  { %v2478_v27 = vmul.f32 %v5391_v24, %v2476_v19 }
0x106a   :  { %2820 = vrot.lane.b32.xlu1 %v2478_v27, %s5758_s22 }
0x10c4   :  { %v2481_v28 = vpop.permute.xlu1 %2480 }
0x10c5   :  { %4986 = vmatmul.mubr.msk.f32.vlgmr.msra.gmra.mxu1 %vm348_vm1, %v2481_v28  ;;  %4997 = vmatmul.mubr.msk.f32.vlgmr.msra.gmra.mxu0 %vm348_vm1, %v2481_v28 }
0x10c6   :  { %5000 = vmatpush3.msra.mxu1 %v6431_v58  ;;  %5011 = vmatpush3.msra.mxu0 %v6434_v5 }
0x10c7   :  { %5001 = vmatprep.subr.mxu1 %v5755_v0  ;;  %5012 = vmatprep.subr.mxu0 %v5755_v0 }
0x10c8   :  { %5002 = vmatpush3.msra.mxu1 %v6439_v6  ;;  %5013 = vmatpush3.msra.mxu0 %v6442_v57 }
0x10c9   :  { %5003 = vmatprep.subr.mxu1 %v5755_v0  ;;  %5014 = vmatprep.subr.mxu0 %v5755_v0 }
0x10ca   :  { %5004 = vmatpush3.msra.mxu1 %v6447_v9  ;;  %5015 = vmatpush3.msra.mxu0 %v6450_v30 }
0x10cb   :  { %5005 = vmatprep.subr.mxu1 %v5755_v0  ;;  %5016 = vmatprep.subr.mxu0 %v5755_v0 }
0x10cc   :  { %5006 = vmatpush3.msra.mxu1 %v6455_v31  ;;  %5007 = vmatprep.mubr.msk.f32.mxu1 %vm5756_vm0, %v5755_v0 }
0x10cd   :  { %5017 = vmatpush3.msra.mxu0 %v6460_v32  ;;  %5018 = vmatprep.mubr.msk.f32.mxu0 %vm5756_vm0, %v5755_v0 }
0x10ce   :  { %5021 = vmatprep.subr.mxu1 %v5755_v0  ;;  %5032 = vmatprep.subr.mxu0 %v5755_v0 }
0x10d4   :  { %v2651_v34 = vpop.permute.xlu0 %2650 }
0x10d5   :  { %5008 = vmatmul.mubr.msk.f32.vlgmr.msra.gmra.mxu1 %vm348_vm1, %v2651_v34  ;;  %5019 = vmatmul.mubr.msk.f32.vlgmr.msra.gmra.mxu0 %vm348_vm1, %v2651_v34 }
0x10d6   :  { %5022 = vmatpush3.msra.mxu1 %v6469_v35  ;;  %5029 = vmatprep.mubr.msk.f32.mxu1 %vm5756_vm0, %v5755_v0 }
0x10d7   :  { %5023 = vmatprep.subr.mxu1 %v5755_v0  ;;  %5033 = vmatpush3.msra.mxu0 %v6259_v2 }
0x10d8   :  { %5024 = vmatpush3.msra.mxu1 %v6476_v7  ;;  %5034 = vmatprep.subr.mxu0 %v5755_v0 }
0x10d9   :  { %5025 = vmatprep.subr.mxu1 %v5755_v0  ;;  %5035 = vmatpush3.msra.mxu0 %v6265_v3  ;;  %v318_v3 = vadd.f32 %v6394_v40, %v6112_v61  ;;  %v6518_v61 = vld [vmem:[%s6753_s9] ss:$0 sm:$0xff] }
0x10da   :  { %5026 = vmatpush3.msra.mxu1 %v6482_v38  ;;  %5036 = vmatprep.subr.mxu0 %v5755_v0 }
0x10db   :  { %5027 = vmatprep.subr.mxu1 %v5755_v0  ;;  %5037 = vmatpush3.msra.mxu0 %v6271_v4 }
0x10dc   :  { %v6488_v2 = vpop.permute.xlu1 %2820  ;;  %5028 = vmatpush3.msra.mxu1 %v6490_v13  ;;  %5038 = vmatprep.subr.mxu0 %v5755_v0 }
0x10dd   :  { %5030 = vmatmul.mubr.msk.f32.vlgmr.msra.gmra.mxu1 %vm348_vm1, %v6488_v2  ;;  %5043 = vmatprep.subr.mxu1 %v5755_v0 }
0x10de   :  { %5044 = vmatpush3.msra.mxu1 %v6369_v50  ;;  %5039 = vmatpush3.msra.mxu0 %v6282_v10 }
0x10df   :  { %5045 = vmatprep.subr.mxu1 %v5755_v0  ;;  %5040 = vmatprep.mubr.msk.f32.mxu0 %vm5756_vm0, %v5755_v0 }
0x10e0   :  { %5046 = vmatpush3.msra.mxu1 %v6376_v51  ;;  %5051 = vmatprep.mubr.msk.f32.mxu1 %vm5756_vm0, %v5755_v0 }
0x10e1   :  { %5047 = vmatprep.subr.mxu1 %v5755_v0  ;;  %5054 = vmatprep.subr.mxu0 %v5755_v0 }
0x10e2   :  { %5048 = vmatpush3.msra.mxu1 %v6383_v37 }
0x10e3   :  { %5049 = vmatprep.subr.mxu1 %v5755_v0 }
0x10e4   :  { %5050 = vmatpush3.msra.mxu1 %v6387_v39 }
0x10e5   :  { %5065 = vmatprep.subr.mxu1 %v5755_v0 }
0x1185   :  { %v2550_v4 = vpop.f32.mrf.mxu1  ;;  %v2645_v10 = vpop.f32.mrf.mxu0 }
0x1186   :  { %v2554_v47 = vadd.f32 %v2550_v4, %v318_v3  ;;  %v2646_v16 = vadd.f32 %v6401_v25, %v2645_v10 }
0x1187   :  { %v4987_v56 = vpop.f32.mrf.mxu1  ;;  %v4998_v55 = vpop.f32.mrf.mxu0 }
0x1188   :  { %5398 = vtanh.f32 %v2554_v47  ;;  %v4350_v33 = vmul.f32 -1.442695, %v2554_v47 }
0x1195   :  { %v5399_v17 = vpop.eup %5398  ;;  %v2720_v62 = vpop.f32.mrf.mxu1 }
0x1196   :  { %v2815_v63 = vpop.f32.mrf.mxu0  ;;  %v2724_v1 = vadd.f32 %v2720_v62, %v2646_v16  ;;  %2564 = vrot.lane.b32.xlu0 %v5399_v17, %s5757_s1 }
0x1197   :  { %v5009_v42 = vpop.f32.mrf.mxu1  ;;  %v2816_v14 = vadd.f32 %v6518_v61, %v2815_v63 }
0x1198   :  { %v5020_v41 = vpop.f32.mrf.mxu0  ;;  %5400 = vtanh.f32 %v2724_v1  ;;  %v4353_v21 = vmul.f32 -1.442695, %v2724_v1 }
0x119d   :  { %v2890_v15 = vpop.f32.mrf.mxu1 }
0x119e   :  { %v2894_v18 = vadd.f32 %v2890_v15, %v2816_v14 }
0x119f   :  { %v5031_v24 = vpop.f32.mrf.mxu1 }
0x11a0   :  { %5402 = vtanh.f32 %v2894_v18  ;;  %v4356_v23 = vmul.f32 -1.442695, %v2894_v18 }
0x11a1   :  { %5404 = vpow2.f32 %v4350_v33 }
0x11a2   :  { %5406 = vpow2.f32 %v4353_v21 }
0x11a5   :  { %v5401_v11 = vpop.eup %5400 }
0x11a6   :  { %2734 = vrot.lane.b32.xlu1 %v5401_v11, %s5757_s1 }
0x11ad   :  { %v5403_v43 = vpop.eup %5402 }
0x11ae   :  { %2904 = vrot.lane.b32.xlu0 %v5403_v43, %s5757_s1  ;;  %v5405_v22 = vpop.eup %5404 }
0x11af   :  { %v2558_v36 = vadd.f32 1.0, %v5405_v22  ;;  %v5407_v48 = vpop.eup %5406 }
0x11b0   :  { %v2728_v45 = vadd.f32 1.0, %v5407_v48 }
0x11b1   :  { %5408 = vrcp.f32 %v2558_v36 }
0x11b2   :  { %5410 = vpow2.f32 %v4356_v23 }
0x11b3   :  { %5412 = vrcp.f32 %v2728_v45 }
0x11be   :  { %v5409_v12 = vpop.eup %5408 }
0x11bf   :  { %v5411_v53 = vpop.eup %5410  ;;  %v2562_v4 = vmul.f32 %v5409_v12, %v6412_v44 }
0x11c0   :  { %v2898_v54 = vadd.f32 1.0, %v5411_v53  ;;  %v5413_v59 = vpop.eup %5412 }
0x11c1   :  { %v2732_v56 = vmul.f32 %v5413_v59, %v6416_v26 }
0x11c2   :  { %5414 = vrcp.f32 %v2898_v54 }
0x11cf   :  { %v5415_v28 = vpop.eup %5414 }
0x11d0   :  { %v2902_v62 = vmul.f32 %v5415_v28, %v6421_v46 }
0x1208   :  { %v2565_v52 = vpop.permute.xlu0 %2564 }
0x1209   :  { %v2567_v20 = vmul.f32 %v5409_v12, %v2565_v52 }
0x120b   :  { %2569 = vrot.lane.b32.xlu1 %v2567_v20, %s5758_s22 }
0x1218   :  { %v2735_v19 = vpop.permute.xlu1 %2734 }
0x1219   :  { %v2737_v27 = vmul.f32 %v5413_v59, %v2735_v19 }
0x121b   :  { %2739 = vrot.lane.b32.xlu0 %v2737_v27, %s5758_s22 }
0x1220   :  { %v2905_v34 = vpop.permute.xlu0 %2904 }
0x1221   :  { %v2907_v3 = vmul.f32 %v5415_v28, %v2905_v34 }
0x1223   :  { %2909 = vrot.lane.b32.xlu1 %v2907_v3, %s5758_s22 }
0x127d   :  { %v2570_v10 = vpop.permute.xlu1 %2569 }
0x127e   :  { %v6527_v47 = vadd.f32 %v2570_v10, %v2562_v4 }
0x1280   :  { %5416 = vtanh.f32 %v6527_v47 }
0x128d   :  { %v5417_v55 = vpop.eup %5416  ;;  %v2740_v16 = vpop.permute.xlu0 %2739 }
0x128e   :  { %v6531_v17 = vadd.f32 %v2740_v16, %v2732_v56  ;;  %2575 = vrot.lane.b32.xlu0 %v5417_v55, %s5757_s1 }
0x1290   :  { %5418 = vtanh.f32 %v6531_v17 }
0x1295   :  { %v2910_v63 = vpop.permute.xlu1 %2909 }
0x1296   :  { %v6536_v1 = vadd.f32 %v2910_v63, %v2902_v62 }
0x1298   :  { %5420 = vtanh.f32 %v6536_v1 }
0x129d   :  { %v5419_v44 = vpop.eup %5418 }
0x129e   :  { %2745 = vrot.lane.b32.xlu1 %v5419_v44, %s5757_s1 }
0x12a5   :  { %v5421_v41 = vpop.eup %5420 }
0x12a6   :  { %2915 = vrot.lane.b32.xlu0 %v5421_v41, %s5757_s1 }
0x1300   :  { %v2576_v26 = vpop.permute.xlu0 %2575 }
0x1301   :  { %v2578_v42 = vmul.f32 %v5409_v12, %v2576_v26 }
0x1303   :  { %2920 = vrot.lane.b32.xlu1 %v2578_v42, %s5758_s22 }
0x1310   :  { %v2746_v14 = vpop.permute.xlu1 %2745 }
0x1311   :  { %v2748_v15 = vmul.f32 %v5413_v59, %v2746_v14 }
0x1313   :  { %3090 = vrot.lane.b32.xlu0 %v2748_v15, %s5758_s22 }
0x1318   :  { %v2916_v46 = vpop.permute.xlu0 %2915 }
0x1319   :  { %v2918_v18 = vmul.f32 %v5415_v28, %v2916_v46 }
0x131b   :  { %3260 = vrot.lane.b32.xlu1 %v2918_v18, %s5758_s22 }
0x1375   :  { %v2921_v24 = vpop.permute.xlu1 %2920 }
0x1376   :  { %5041 = vmatmul.mubr.msk.f32.vlgmr.msra.gmra.mxu0 %vm348_vm1, %v2921_v24  ;;  %5052 = vmatmul.mubr.msk.f32.vlgmr.msra.gmra.mxu1 %vm348_vm1, %v2921_v24 }
0x1377   :  { %5055 = vmatpush3.msra.mxu0 %v6431_v58  ;;  %5066 = vmatpush3.msra.mxu1 %v6434_v5 }
0x1378   :  { %5056 = vmatprep.subr.mxu0 %v5755_v0  ;;  %5067 = vmatprep.subr.mxu1 %v5755_v0 }
0x1379   :  { %5057 = vmatpush3.msra.mxu0 %v6439_v6  ;;  %5068 = vmatpush3.msra.mxu1 %v6442_v57 }
0x137a   :  { %5058 = vmatprep.subr.mxu0 %v5755_v0  ;;  %5069 = vmatprep.subr.mxu1 %v5755_v0 }
0x137b   :  { %5059 = vmatpush3.msra.mxu0 %v6447_v9  ;;  %5070 = vmatpush3.msra.mxu1 %v6450_v30 }
0x137c   :  { %5060 = vmatprep.subr.mxu0 %v5755_v0  ;;  %5071 = vmatprep.subr.mxu1 %v5755_v0 }
0x137d   :  { %5061 = vmatpush3.msra.mxu0 %v6455_v31  ;;  %5062 = vmatprep.mubr.msk.f32.mxu0 %vm5756_vm0, %v5755_v0 }
0x137e   :  { %5072 = vmatpush3.msra.mxu1 %v6460_v32  ;;  %5073 = vmatprep.mubr.msk.f32.mxu1 %vm5756_vm0, %v5755_v0 }
0x137f   :  { %5076 = vmatprep.subr.mxu0 %v5755_v0  ;;  %5087 = vmatprep.subr.mxu1 %v5755_v0 }
0x1385   :  { %v3091_v11 = vpop.permute.xlu0 %3090 }
0x1386   :  { %5063 = vmatmul.mubr.msk.f32.vlgmr.msra.gmra.mxu0 %vm348_vm1, %v3091_v11  ;;  %5074 = vmatmul.mubr.msk.f32.vlgmr.msra.gmra.mxu1 %vm348_vm1, %v3091_v11 }
0x1387   :  { %5077 = vmatpush3.msra.mxu0 %v6469_v35  ;;  %5084 = vmatprep.mubr.msk.f32.mxu0 %vm5756_vm0, %v5755_v0 }
0x1388   :  { %5078 = vmatprep.subr.mxu0 %v5755_v0  ;;  %5088 = vmatpush3.msra.mxu1 %v6369_v50  ;;  %v323_v50 = vadd.f32 %v6394_v40, %v6110_v60 }
0x1389   :  { %5079 = vmatpush3.msra.mxu0 %v6476_v7  ;;  %5089 = vmatprep.subr.mxu1 %v5755_v0 }
0x138a   :  { %5080 = vmatprep.subr.mxu0 %v5755_v0  ;;  %5090 = vmatpush3.msra.mxu1 %v6376_v51 }
0x138b   :  { %5081 = vmatpush3.msra.mxu0 %v6482_v38  ;;  %5091 = vmatprep.subr.mxu1 %v5755_v0 }
0x138c   :  { %5082 = vmatprep.subr.mxu0 %v5755_v0  ;;  %5092 = vmatpush3.msra.mxu1 %v6383_v37 }
0x138d   :  { %v6581_v43 = vpop.permute.xlu1 %3260  ;;  %5083 = vmatpush3.msra.mxu0 %v6490_v13  ;;  %5093 = vmatprep.subr.mxu1 %v5755_v0 }
0x138e   :  { %5085 = vmatmul.mubr.msk.f32.vlgmr.msra.gmra.mxu0 %vm348_vm1, %v6581_v43  ;;  %5094 = vmatpush3.msra.mxu1 %v6387_v39 }
0x138f   :  { %5095 = vmatprep.mubr.msk.f32.mxu1 %vm5756_vm0, %v5755_v0  ;;  %5098 = vmatprep.subr.mxu0 %v5755_v0 }
0x1390   :  { %5099 = vmatpush3.msra.mxu0 %v6431_v58  ;;  %5109 = vmatprep.subr.mxu1 %v5755_v0 }
0x1391   :  { %5100 = vmatprep.subr.mxu0 %v5755_v0  ;;  %5106 = vmatprep.mubr.msk.f32.mxu0 %vm5756_vm0, %v5755_v0 }
0x1392   :  { %5101 = vmatpush3.msra.mxu0 %v6439_v6 }
0x1393   :  { %5102 = vmatprep.subr.mxu0 %v5755_v0 }
0x1394   :  { %5103 = vmatpush3.msra.mxu0 %v6447_v9 }
0x1395   :  { %5104 = vmatprep.subr.mxu0 %v5755_v0 }
0x1396   :  { %5105 = vmatpush3.msra.mxu0 %v6455_v31 }
0x1397   :  { %5120 = vmatprep.subr.mxu0 %v5755_v0 }
0x1436   :  { %v2990_v51 = vpop.f32.mrf.mxu0  ;;  %v3085_v37 = vpop.f32.mrf.mxu1 }
0x1437   :  { %v2994_v39 = vadd.f32 %v2990_v51, %v323_v50  ;;  %v3086_v6 = vadd.f32 %v6401_v25, %v3085_v37 }
0x1438   :  { %v5042_v58 = vpop.f32.mrf.mxu0  ;;  %v5053_v33 = vpop.f32.mrf.mxu1 }
0x1439   :  { %5422 = vtanh.f32 %v2994_v39  ;;  %v4358_v20 = vmul.f32 -1.442695, %v2994_v39 }
0x1446   :  { %v5423_v21 = vpop.eup %5422  ;;  %v3160_v22 = vpop.f32.mrf.mxu0 }
0x1447   :  { %v3255_v9 = vpop.f32.mrf.mxu1  ;;  %v3164_v36 = vadd.f32 %v3160_v22, %v3086_v6  ;;  %3004 = vrot.lane.b32.xlu0 %v5423_v21, %s5757_s1 }
0x1448   :  { %v5064_v31 = vpop.f32.mrf.mxu0  ;;  %v3256_v48 = vadd.f32 %v6518_v61, %v3255_v9 }
0x1449   :  { %v5075_v23 = vpop.f32.mrf.mxu1  ;;  %5424 = vtanh.f32 %v3164_v36  ;;  %v4361_v53 = vmul.f32 -1.442695, %v3164_v36 }
0x144e   :  { %v3330_v60 = vpop.f32.mrf.mxu0 }
0x144f   :  { %v3334_v40 = vadd.f32 %v3330_v60, %v3256_v48 }
0x1450   :  { %v5086_v45 = vpop.f32.mrf.mxu0 }
0x1451   :  { %5426 = vtanh.f32 %v3334_v40  ;;  %v4364_v19 = vmul.f32 -1.442695, %v3334_v40 }
0x1452   :  { %5428 = vpow2.f32 %v4358_v20 }
0x1453   :  { %5430 = vpow2.f32 %v4361_v53 }
0x1456   :  { %v5425_v12 = vpop.eup %5424 }
0x1457   :  { %3174 = vrot.lane.b32.xlu1 %v5425_v12, %s5757_s1 }
0x145e   :  { %v5427_v52 = vpop.eup %5426 }
0x145f   :  { %3344 = vrot.lane.b32.xlu0 %v5427_v52, %s5757_s1  ;;  %v5429_v54 = vpop.eup %5428 }
0x1460   :  { %v2998_v59 = vadd.f32 1.0, %v5429_v54  ;;  %v5431_v27 = vpop.eup %5430 }
0x1461   :  { %v3168_v28 = vadd.f32 1.0, %v5431_v27 }
0x1462   :  { %5432 = vrcp.f32 %v2998_v59 }
0x1463   :  { %5434 = vpow2.f32 %v4364_v19 }
0x1464   :  { %5436 = vrcp.f32 %v3168_v28 }
0x146f   :  { %v5433_v34 = vpop.eup %5432 }
0x1470   :  { %v5435_v10 = vpop.eup %5434  ;;  %v3002_v26 = vmul.f32 %v5433_v34, %v6527_v47 }
0x1471   :  { %v3338_v56 = vadd.f32 1.0, %v5435_v10  ;;  %v5437_v55 = vpop.eup %5436 }
0x1472   :  { %v3172_v15 = vmul.f32 %v5437_v55, %v6531_v17 }
0x1473   :  { %5438 = vrcp.f32 %v3338_v56 }
0x1480   :  { %v5439_v63 = vpop.eup %5438 }
0x1481   :  { %v3342_v11 = vmul.f32 %v5439_v63, %v6536_v1 }
0x14b9   :  { %v3005_v3 = vpop.permute.xlu0 %3004 }
0x14ba   :  { %v3007_v4 = vmul.f32 %v5433_v34, %v3005_v3 }
0x14bc   :  { %3009 = vrot.lane.b32.xlu1 %v3007_v4, %s5758_s22 }
0x14c9   :  { %v3175_v16 = vpop.permute.xlu1 %3174 }
0x14ca   :  { %v3177_v62 = vmul.f32 %v5437_v55, %v3175_v16  ;;  %v3882_v16 = vld [vmem:[#allocation14 + $0x18] sm:$0xff] }
0x14cc   :  { %3179 = vrot.lane.b32.xlu0 %v3177_v62, %s5758_s22 }
0x14d1   :  { %v3345_v44 = vpop.permute.xlu0 %3344 }
0x14d2   :  { %v3347_v41 = vmul.f32 %v5439_v63, %v3345_v44 }
0x14d4   :  { %3349 = vrot.lane.b32.xlu1 %v3347_v41, %s5758_s22 }
0x152e   :  { %v3010_v42 = vpop.permute.xlu1 %3009 }
0x152f   :  { %v3012_v14 = vadd.f32 %v3010_v42, %v3002_v26  ;;  %v4023_v26 = vld [vmem:[#allocation16 + $0x78] sm:$0xff] }
0x1531   :  { %5440 = vtanh.f32 %v3012_v14 }
0x153e   :  { %v5441_v46 = vpop.eup %5440  ;;  %v3180_v18 = vpop.permute.xlu0 %3179 }
0x153f   :  { %v6614_v24 = vadd.f32 %v3180_v18, %v3172_v15  ;;  %3015 = vrot.lane.b32.xlu0 %v5441_v46, %s5757_s1  ;;  %v3881_v46 = vld [vmem:[#allocation14 + $0x10] sm:$0xff]  ;;  %v3880_v18 = vld [vmem:[#allocation14 + $0x8] sm:$0xff] }
0x1541   :  { %5442 = vtanh.f32 %v6614_v24 }
0x1546   :  { %v3350_v50 = vpop.permute.xlu1 %3349 }
0x1547   :  { %v6619_v51 = vadd.f32 %v3350_v50, %v3342_v11  ;;  %v4022_v50 = vld [vmem:[#allocation16 + $0x70] sm:$0xff] }
0x1549   :  { %5444 = vtanh.f32 %v6619_v51 }
0x154e   :  { %v5443_v47 = vpop.eup %5442 }
0x154f   :  { %3185 = vrot.lane.b32.xlu1 %v5443_v47, %s5757_s1  ;;  %v4019_v47 = vld [vmem:[#allocation16 + $0x58] sm:$0xff] }
0x1556   :  { %v5445_v37 = vpop.eup %5444 }
0x1557   :  { %3355 = vrot.lane.b32.xlu0 %v5445_v37, %s5757_s1  ;;  %v4015_v37 = vld [vmem:[#allocation16 + $0x38] sm:$0xff] }
0x15b1   :  { %v3016_v17 = vpop.permute.xlu0 %3015 }
0x15b2   :  { %v3018_v39 = vmul.f32 %v5433_v34, %v3016_v17  ;;  %v4013_v17 = vld [vmem:[#allocation16 + $0x28] sm:$0xff] }
0x15b4   :  { %3360 = vrot.lane.b32.xlu1 %v3018_v39, %s5758_s22  ;;  %v4012_v39 = vld [vmem:[#allocation16 + $0x20] sm:$0xff] }
0x15c1   :  { %v3186_v58 = vpop.permute.xlu1 %3185 }
0x15c2   :  { %v3188_v33 = vmul.f32 %v5437_v55, %v3186_v58  ;;  %v4011_v58 = vld [vmem:[#allocation16 + $0x18] sm:$0xff] }
0x15c4   :  { %3435 = vrot.lane.b32.xlu0 %v3188_v33, %s5758_s22  ;;  %v4010_v33 = vld [vmem:[#allocation16 + $0x10] sm:$0xff] }
0x15c9   :  { %v3356_v1 = vpop.permute.xlu0 %3355 }
0x15ca   :  { %v3358_v6 = vmul.f32 %v5439_v63, %v3356_v1  ;;  %v4009_v1 = vld [vmem:[#allocation16 + $0x8] sm:$0xff] }
0x15cc   :  { %3605 = vrot.lane.b32.xlu1 %v3358_v6, %s5758_s22  ;;  %v4008_v6 = vld [vmem:[#allocation16] sm:$0xff] }
0x1626   :  { %v3361_v21 = vpop.permute.xlu1 %3360 }
0x1627   :  { %5096 = vmatmul.mubr.msk.f32.vlgmr.msra.gmra.mxu1 %vm348_vm1, %v3361_v21 }
0x1628   :  { %5110 = vmatpush3.msra.mxu1 %v6434_v5  ;;  %5117 = vmatprep.mubr.msk.f32.mxu1 %vm5756_vm0, %v5755_v0 }
0x1629   :  { %5111 = vmatprep.subr.mxu1 %v5755_v0 }
0x162a   :  { %5112 = vmatpush3.msra.mxu1 %v6442_v57 }
0x162b   :  { %5113 = vmatprep.subr.mxu1 %v5755_v0 }
0x162c   :  { %5114 = vmatpush3.msra.mxu1 %v6450_v30 }
0x162d   :  { %5115 = vmatprep.subr.mxu1 %v5755_v0 }
0x162e   :  { %5116 = vmatpush3.msra.mxu1 %v6460_v32 }
0x162f   :  { %5131 = vmatprep.subr.mxu1 %v5755_v0 }
0x1636   :  { %v3436_v22 = vpop.permute.xlu0 %3435 }
0x1637   :  { %5107 = vmatmul.mubr.msk.f32.vlgmr.msra.gmra.mxu0 %vm348_vm1, %v3436_v22  ;;  %5118 = vmatmul.mubr.msk.f32.vlgmr.msra.gmra.mxu1 %vm348_vm1, %v3436_v22 }
0x1638   :  { %5121 = vmatpush3.msra.mxu0 %v6469_v35  ;;  %5128 = vmatprep.mubr.msk.f32.mxu0 %vm5756_vm0, %v5755_v0 }
0x1639   :  { %5122 = vmatprep.subr.mxu0 %v5755_v0  ;;  %5132 = vmatpush3.msra.mxu1 %v6434_v5 }
0x163a   :  { %5123 = vmatpush3.msra.mxu0 %v6476_v7  ;;  %5133 = vmatprep.subr.mxu1 %v5755_v0 }
0x163b   :  { %5124 = vmatprep.subr.mxu0 %v5755_v0  ;;  %5134 = vmatpush3.msra.mxu1 %v6442_v57 }
0x163c   :  { %5125 = vmatpush3.msra.mxu0 %v6482_v38  ;;  %5135 = vmatprep.subr.mxu1 %v5755_v0 }
0x163d   :  { %5126 = vmatprep.subr.mxu0 %v5755_v0  ;;  %5136 = vmatpush3.msra.mxu1 %v6450_v30 }
0x163e   :  { %v6653_v9 = vpop.permute.xlu1 %3605  ;;  %5127 = vmatpush3.msra.mxu0 %v6490_v13  ;;  %5137 = vmatprep.subr.mxu1 %v5755_v0 }
0x163f   :  { %5129 = vmatmul.mubr.msk.f32.vlgmr.msra.gmra.mxu0 %vm348_vm1, %v6653_v9  ;;  %5138 = vmatpush3.msra.mxu1 %v6460_v32 }
0x1640   :  { %5139 = vmatprep.mubr.msk.f32.mxu1 %vm5756_vm0, %v5755_v0  ;;  %5142 = vmatprep.subr.mxu0 %v5755_v0 }
0x1641   :  { %5143 = vmatpush3.msra.mxu0 %v6469_v35  ;;  %5150 = vmatprep.mubr.msk.f32.mxu0 %vm5756_vm0, %v5755_v0 }
0x1642   :  { %5144 = vmatprep.subr.mxu0 %v5755_v0  ;;  %5153 = vmatprep.subr.mxu1 %v3882_v16 }
0x1643   :  { %5145 = vmatpush3.msra.mxu0 %v6476_v7 }
0x1644   :  { %5146 = vmatprep.subr.mxu0 %v5755_v0 }
0x1645   :  { %5147 = vmatpush3.msra.mxu0 %v6482_v38 }
0x1646   :  { %5148 = vmatprep.subr.mxu0 %v5755_v0 }
0x1647   :  { %5149 = vmatpush3.msra.mxu0 %v6490_v13 }
0x1648   :  { %5173 = vmatprep.subr.mxu0 %v4023_v26 }
0x16e7   :  { %v3430_v5 = vpop.f32.mrf.mxu1 }
0x16e8   :  { %v3431_v30 = vadd.f32 %v6401_v25, %v3430_v5  ;;  %v6706_v5 = vld [vmem:[%s6755_s11] ss:$0 sm:$0xff] }
0x16e9   :  { %v5097_v57 = vpop.f32.mrf.mxu1 }
0x16f7   :  { %v3505_v32 = vpop.f32.mrf.mxu0  ;;  %v3600_v35 = vpop.f32.mrf.mxu1 }
0x16f8   :  { %v3509_v36 = vadd.f32 %v3505_v32, %v3431_v30  ;;  %v3601_v7 = vadd.f32 %v6518_v61, %v3600_v35 }
0x16f9   :  { %v5108_v31 = vpop.f32.mrf.mxu0  ;;  %v5119_v23 = vpop.f32.mrf.mxu1 }
0x16fa   :  { %5446 = vtanh.f32 %v3509_v36  ;;  %v4367_v13 = vmul.f32 -1.442695, %v3509_v36 }
0x16ff   :  { %v3675_v48 = vpop.f32.mrf.mxu0 }
0x1700   :  { %v3679_v60 = vadd.f32 %v3675_v48, %v3601_v7 }
0x1701   :  { %v5130_v40 = vpop.f32.mrf.mxu0 }
0x1702   :  { %5448 = vtanh.f32 %v3679_v60  ;;  %v4370_v25 = vmul.f32 -1.442695, %v3679_v60 }
0x1703   :  { %5450 = vpow2.f32 %v4367_v13 }
0x1704   :  { %5452 = vpow2.f32 %v4370_v25 }
0x1707   :  { %v5447_v38 = vpop.eup %5446 }
0x1708   :  { %3519 = vrot.lane.b32.xlu0 %v5447_v38, %s5757_s1 }
0x170f   :  { %v5449_v0 = vpop.eup %5448 }
0x1710   :  { %3689 = vrot.lane.b32.xlu1 %v5449_v0, %s5757_s1  ;;  %v5451_v45 = vpop.eup %5450 }
0x1711   :  { %v3513_v12 = vadd.f32 1.0, %v5451_v45  ;;  %v5453_v52 = vpop.eup %5452 }
0x1712   :  { %v3683_v20 = vadd.f32 1.0, %v5453_v52 }
0x1713   :  { %5454 = vrcp.f32 %v3513_v12 }
0x1714   :  { %5456 = vrcp.f32 %v3683_v20 }
0x1720   :  { %v5455_v53 = vpop.eup %5454 }
0x1721   :  { %v5457_v19 = vpop.eup %5456  ;;  %v3517_v34 = vmul.f32 %v5455_v53, %v6614_v24  ;;  %v3879_v24 = vld [vmem:[#allocation14] sm:$0xff] }
0x1722   :  { %v3687_v10 = vmul.f32 %v5457_v19, %v6619_v51  ;;  %v4020_v51 = vld [vmem:[#allocation16 + $0x60] sm:$0xff] }
0x177a   :  { %v3520_v54 = vpop.permute.xlu0 %3519 }
0x177b   :  { %v3522_v59 = vmul.f32 %v5455_v53, %v3520_v54 }
0x177d   :  { %3524 = vrot.lane.b32.xlu0 %v3522_v59, %s5758_s22 }
0x1782   :  { %v3690_v27 = vpop.permute.xlu1 %3689 }
0x1783   :  { %v3692_v28 = vmul.f32 %v5457_v19, %v3690_v27 }
0x1785   :  { %3694 = vrot.lane.b32.xlu1 %v3692_v28, %s5758_s22 }
0x17ef   :  { %v3525_v3 = vpop.permute.xlu0 %3524 }
0x17f0   :  { %v3527_v4 = vadd.f32 %v3525_v3, %v3517_v34 }
0x17f2   :  { %5458 = vtanh.f32 %v3527_v4 }
0x17f7   :  { %v3695_v56 = vpop.permute.xlu1 %3694 }
0x17f8   :  { %v6680_v55 = vadd.f32 %v3695_v56, %v3687_v10 }
0x17fa   :  { %5460 = vtanh.f32 %v6680_v55 }
0x17ff   :  { %v5459_v62 = vpop.eup %5458 }
0x1800   :  { %3530 = vrot.lane.b32.xlu0 %v5459_v62, %s5757_s1  ;;  %v4158_v62 = vld [vmem:[#allocation17 + $0x70] sm:$0xff] }
0x1807   :  { %v5461_v63 = vpop.eup %5460 }
0x1808   :  { %3700 = vrot.lane.b32.xlu1 %v5461_v63, %s5757_s1  ;;  %v4157_v63 = vld [vmem:[#allocation17 + $0x68] sm:$0xff] }
0x1872   :  { %v3531_v44 = vpop.permute.xlu0 %3530 }
0x1873   :  { %v3533_v41 = vmul.f32 %v5455_v53, %v3531_v44  ;;  %v4156_v44 = vld [vmem:[#allocation17 + $0x60] sm:$0xff] }
0x1875   :  { %3705 = vrot.lane.b32.xlu0 %v3533_v41, %s5758_s22  ;;  %v4155_v41 = vld [vmem:[#allocation17 + $0x58] sm:$0xff] }
0x187a   :  { %v3701_v42 = vpop.permute.xlu1 %3700 }
0x187b   :  { %v3703_v14 = vmul.f32 %v5457_v19, %v3701_v42 }
0x187d   :  { %3780 = vrot.lane.b32.xlu1 %v3703_v14, %s5758_s22  ;;  %v4152_v14 = vld [vmem:[#allocation17 + $0x40] sm:$0xff] }
0x18e7   :  { %v3706_v15 = vpop.permute.xlu0 %3705 }
0x18e8   :  { %5140 = vmatmul.mubr.msk.f32.vlgmr.msra.gmra.mxu1 %vm348_vm1, %v3706_v15  ;;  %v4151_v15 = vld [vmem:[#allocation17 + $0x38] sm:$0xff] }
0x18e9   :  { %5154 = vmatpush3.msra.mxu1 %v3882_v16  ;;  %5161 = vmatprep.mubr.msk.f32.mxu1 %vm348_vm1, %v6182_v29  ;;  %v4021_v29 = vld [vmem:[#allocation16 + $0x68] sm:$0xff]  ;;  %v4159_v16 = vld [vmem:[#allocation17 + $0x78] sm:$0xff] }
0x18ea   :  { %5155 = vmatprep.subr.mxu1 %v3881_v46 }
0x18eb   :  { %5156 = vmatpush3.msra.mxu1 %v3881_v46  ;;  %v4150_v46 = vld [vmem:[#allocation17 + $0x30] sm:$0xff] }
0x18ec   :  { %5157 = vmatprep.subr.mxu1 %v3880_v18 }
0x18ed   :  { %5158 = vmatpush3.msra.mxu1 %v3880_v18  ;;  %v4149_v18 = vld [vmem:[#allocation17 + $0x28] sm:$0xff] }
0x18ee   :  { %5159 = vmatprep.subr.mxu1 %v3879_v24 }
0x18ef   :  { %5160 = vmatpush3.msra.mxu1 %v3879_v24  ;;  %v3781_v11 = vpop.permute.xlu1 %3780  ;;  %v4148_v24 = vld [vmem:[#allocation17 + $0x20] sm:$0xff] }
0x18f0   :  { %5151 = vmatmul.mubr.msk.f32.vlgmr.msra.gmra.mxu0 %vm348_vm1, %v3781_v11  ;;  %5162 = vmatmul.mubr.msk.f32.vlgmr.msra.gmra.mxu1 %vm348_vm1, %v6274_v8  ;;  %v4018_v8 = vld [vmem:[#allocation16 + $0x50] sm:$0xff] }
0x18f1   :  { %5164 = vmatprep.mubr.msk.f32.mxu1 %vm348_vm1, %v6362_v49  ;;  %5174 = vmatpush3.msra.mxu0 %v4023_v26  ;;  %v4017_v49 = vld [vmem:[#allocation16 + $0x48] sm:$0xff]  ;;  %v4154_v26 = vld [vmem:[#allocation17 + $0x50] sm:$0xff] }
0x18f2   :  { %5175 = vmatprep.subr.mxu0 %v4022_v50  ;;  %5217 = vmatprep.subr.mxu1 %v4159_v16 }
0x18f3   :  { %5176 = vmatpush3.msra.mxu0 %v4022_v50  ;;  %5218 = vmatpush3.msra.mxu1 %v4159_v16  ;;  %v4146_v50 = vld [vmem:[#allocation17 + $0x10] sm:$0xff] }
0x18f4   :  { %5165 = vmatmul.mubr.msk.f32.gmra.mxu1 %vm348_vm1, %v6488_v2  ;;  %5177 = vmatprep.subr.mxu0 %v4021_v29  ;;  %v4016_v2 = vld [vmem:[#allocation16 + $0x40] sm:$0xff] }
0x18f5   :  { %5167 = vmatprep.mubr.msk.f32.mxu1 %vm348_vm1, %v6581_v43  ;;  %5178 = vmatpush3.msra.mxu0 %v4021_v29  ;;  %v4014_v43 = vld [vmem:[#allocation16 + $0x30] sm:$0xff]  ;;  %v4145_v29 = vld [vmem:[#allocation17 + $0x8] sm:$0xff] }
0x18f6   :  { %5179 = vmatprep.subr.mxu0 %v4020_v51  ;;  %5219 = vmatprep.subr.mxu1 %v4158_v62 }
0x18f7   :  { %5180 = vmatpush3.msra.mxu0 %v4020_v51  ;;  %5220 = vmatpush3.msra.mxu1 %v4158_v62  ;;  %v4144_v51 = vld [vmem:[#allocation17] sm:$0xff] }
0x18f8   :  { %5168 = vmatmul.mubr.msk.f32.gmra.mxu1 %vm348_vm1, %v6653_v9  ;;  %5181 = vmatprep.subr.mxu0 %v4019_v47 }
0x18f9   :  { %5170 = vmatprep.mubr.msk.f32.mxu1 %vm348_vm1, %v3781_v11  ;;  %5182 = vmatpush3.msra.mxu0 %v4019_v47  ;;  %v4147_v11 = vld [vmem:[#allocation17 + $0x18] sm:$0xff] }
0x18fa   :  { %5183 = vmatprep.subr.mxu0 %v4018_v8  ;;  %5221 = vmatprep.subr.mxu1 %v4157_v63 }
0x18fb   :  { %5184 = vmatpush3.msra.mxu0 %v4018_v8  ;;  %5222 = vmatpush3.msra.mxu1 %v4157_v63 }
0x18fc   :  { %5185 = vmatprep.subr.mxu0 %v4017_v49  ;;  %5223 = vmatprep.subr.mxu1 %v4156_v44 }
0x18fd   :  { %5186 = vmatpush3.msra.mxu0 %v4017_v49  ;;  %5224 = vmatpush3.msra.mxu1 %v4156_v44 }
0x18fe   :  { %5187 = vmatprep.subr.mxu0 %v4016_v2  ;;  %5225 = vmatprep.subr.mxu1 %v4155_v41 }
0x18ff   :  { %5188 = vmatpush3.msra.mxu0 %v4016_v2  ;;  %5226 = vmatpush3.msra.mxu1 %v4155_v41 }
0x1900   :  { %5189 = vmatprep.subr.mxu0 %v4015_v37  ;;  %5227 = vmatprep.subr.mxu1 %v4154_v26 }
0x1901   :  { %5190 = vmatpush3.msra.mxu0 %v4015_v37  ;;  %5228 = vmatpush3.msra.mxu1 %v4154_v26 }
0x1902   :  { %5191 = vmatprep.subr.mxu0 %v4014_v43 }
0x1903   :  { %5192 = vmatpush3.msra.mxu0 %v4014_v43 }
0x1904   :  { %5193 = vmatprep.subr.mxu0 %v4013_v17 }
0x1905   :  { %5194 = vmatpush3.msra.mxu0 %v4013_v17  ;;  %v6722_v17 = vld [vmem:[%s6757_s13] ss:$0 sm:$0xff] }
0x1906   :  { %5195 = vmatprep.subr.mxu0 %v4012_v39 }
0x1907   :  { %5196 = vmatpush3.msra.mxu0 %v4012_v39 }
0x1908   :  { %5197 = vmatprep.subr.mxu0 %v4011_v58 }
0x1909   :  { %5198 = vmatpush3.msra.mxu0 %v4011_v58 }
0x190a   :  { %5199 = vmatprep.subr.mxu0 %v4010_v33 }
0x190b   :  { %5200 = vmatpush3.msra.mxu0 %v4010_v33 }
0x190c   :  { %5201 = vmatprep.subr.mxu0 %v4009_v1 }
0x190d   :  { %5202 = vmatpush3.msra.mxu0 %v4009_v1 }
0x190e   :  { %5203 = vmatprep.subr.mxu0 %v4008_v6 }
0x190f   :  { %5204 = vmatpush3.msra.mxu0 %v4008_v6 }
0x19a8   :  { %v3775_v21 = vpop.f32.mrf.mxu1 }
0x19a9   :  { %v3776_v9 = vadd.f32 %v6518_v61, %v3775_v21 }
0x19aa   :  { %v5141_v22 = vpop.f32.mrf.mxu1 }
0x19b0   :  { %v3850_v57 = vpop.f32.mrf.mxu0  ;;  %v5163_v30 = vpop.f32.mrf.mxu1 }
0x19b1   :  { %v3854_v32 = vadd.f32 %v3850_v57, %v3776_v9  ;;  %v3967_v35 = vadd.f32 %v5163_v30, %v6706_v5 }
0x19b2   :  { %v5152_v36 = vpop.f32.mrf.mxu0  ;;  %v3961_v31 = vpop.f32.mrf.mxu1 }
0x19b3   :  { %5462 = vtanh.f32 %v3854_v32  ;;  %v3962_v23 = vadd.f32 %v6706_v5, %v3961_v31  ;;  %v4001_v60 = vmax.f32 %v3967_v35, 0.0  ;;  %v4373_v59 = vmul.f32 -1.442695, %v3854_v32 }
0x19b4   :  { %v5166_v7 = vpop.f32.mrf.mxu1 }
0x19b5   :  { %v4000_v48 = vmax.f32 %v3962_v23, 0.0  ;;  %v3977_v61 = vadd.f32 %v5166_v7, %v6706_v5  ;;  %5464 = vpow2.f32 %v4373_v59 }
0x19b6   :  { %v3971_v40 = vpop.f32.mrf.mxu1 }
0x19b7   :  { %v3972_v38 = vadd.f32 %v6706_v5, %v3971_v40  ;;  %5205 = vmatprep.mubr.f32.mxu0 %v4000_v48  ;;  %v4003_v25 = vmax.f32 %v3977_v61, 0.0  ;;  %v4384_v61 = vld [vmem:[%s6759_s15] ss:$0 sm:$0xff]  ;;  %s5759_s15 = smov [#allocation19]  }
0x19b8   :  { %v5169_v0 = vpop.f32.mrf.mxu1  ;;  %5206 = vmatmul.mubr.f32.vlgmr.msra.gmra.mxu0 %v4001_v60  ;;  %s4293_s18 = sshll.u32 %s5759_s15, 4  ;;  %s4294_s18 = int_to_ptr.vmem [resolvable:$true] %s4293_s18 }
0x19b9   :  { %v4002_v13 = vmax.f32 %v3972_v38, 0.0  ;;  %v3987_v45 = vadd.f32 %v5169_v0, %v6706_v5  ;;  %s5709_s5 = scalar_lea.vmem %s4294_s18, 1024  ;;  %p5714_p9 = scmp.lt.s32.totalorder %s4294_s18, %s4294_s18 }
0x19ba   :  { %v3981_v12 = vpop.f32.mrf.mxu1  ;;  %p5710_p8 = scmp.ne.s32.totalorder %s4294_s18, %s5709_s5  ;;  %p5715_p10 = scmp.lt.s32.totalorder %s5709_s5, %s5709_s5 }
0x19bb   :  { %v3982_v52 = vadd.f32 %v6706_v5, %v3981_v12  ;;  %5208 = vmatprep.mubr.f32.mxu0 %v4002_v13  ;;  %v4005_v53 = vmax.f32 %v3987_v45, 0.0 }
0x19bc   :  { %5209 = vmatmul.mubr.f32.gmra.mxu0 %v4003_v25  ;;  %p5716_p11 = por %p5715_p10, %p5714_p9 }
0x19bd   :  { %v4004_v20 = vmax.f32 %v3982_v52, 0.0 }
0x19be   :  { %p5717_p12 = pnand %p5716_p11, %p5710_p8 }
0x19bf   :  { %5211 = vmatprep.mubr.f32.mxu0 %v4004_v20 }
0x19c0   :  { %v5463_v54 = vpop.eup %5462  ;;  %5212 = vmatmul.mubr.f32.gmra.mxu0 %v4005_v53 }
0x19c1   :  { %3864 = vrot.lane.b32.xlu0 %v5463_v54, %s5757_s1 }
0x19c2   :  { %v5465_v19 = vpop.eup %5464 }
0x19c3   :  { %v3858_v27 = vadd.f32 1.0, %v5465_v19 }
0x19c5   :  { %5466 = vrcp.f32 %v3858_v27 }
0x19d2   :  { %v5467_v28 = vpop.eup %5466 }
0x19d3   :  { %v3862_v4 = vmul.f32 %v5467_v28, %v6680_v55  ;;  %v4153_v55 = vld [vmem:[#allocation17 + $0x48] sm:$0xff] }
0x19d4   :  { %5229 = vmatprep.subr.mxu1 %v4153_v55 }
0x19d5   :  { %5230 = vmatpush3.msra.mxu1 %v4153_v55 }
0x19d6   :  { %5231 = vmatprep.subr.mxu1 %v4152_v14 }
0x19d7   :  { %5232 = vmatpush3.msra.mxu1 %v4152_v14 }
0x19d8   :  { %5233 = vmatprep.subr.mxu1 %v4151_v15 }
0x19d9   :  { %5234 = vmatpush3.msra.mxu1 %v4151_v15 }
0x19da   :  { %5235 = vmatprep.subr.mxu1 %v4150_v46 }
0x19db   :  { %5236 = vmatpush3.msra.mxu1 %v4150_v46 }
0x19dc   :  { %5237 = vmatprep.subr.mxu1 %v4149_v18 }
0x19dd   :  { %5238 = vmatpush3.msra.mxu1 %v4149_v18 }
0x19de   :  { %5239 = vmatprep.subr.mxu1 %v4148_v24 }
0x19df   :  { %5240 = vmatpush3.msra.mxu1 %v4148_v24 }
0x19e0   :  { %5241 = vmatprep.subr.mxu1 %v4147_v11 }
0x19e1   :  { %5242 = vmatpush3.msra.mxu1 %v4147_v11 }
0x19e2   :  { %5243 = vmatprep.subr.mxu1 %v4146_v50 }
0x19e3   :  { %5244 = vmatpush3.msra.mxu1 %v4146_v50 }
0x19e4   :  { %5245 = vmatprep.subr.mxu1 %v4145_v29 }
0x19e5   :  { %5246 = vmatpush3.msra.mxu1 %v4145_v29 }
0x19e6   :  { %5247 = vmatprep.subr.mxu1 %v4144_v51 }
0x19e7   :  { %5248 = vmatpush3.msra.mxu1 %v4144_v51 }
0x1a33   :  { %v3865_v34 = vpop.permute.xlu0 %3864 }
0x1a34   :  { %v3867_v3 = vmul.f32 %v5467_v28, %v3865_v34 }
0x1a36   :  { %3869 = vrot.lane.b32.xlu1 %v3867_v3, %s5758_s22 }
0x1a78   :  { %v5207_v49 = vpop.f32.mrf.mxu0 }
0x1a79   :  { %v4103_v33 = vadd.f32 %v5207_v49, %v6722_v17 }
0x1a7a   :  { %v4097_v2 = vpop.f32.mrf.mxu0 }
0x1a7b   :  { %v4098_v39 = vadd.f32 %v6722_v17, %v4097_v2  ;;  %v4137_v9 = vmax.f32 %v4103_v33, 0.0 }
0x1a7c   :  { %v5210_v37 = vpop.f32.mrf.mxu0 }
0x1a7d   :  { %v4136_v1 = vmax.f32 %v4098_v39, 0.0  ;;  %v4113_v57 = vadd.f32 %v5210_v37, %v6722_v17 }
0x1a7e   :  { %v4107_v43 = vpop.f32.mrf.mxu0 }
0x1a7f   :  { %v4108_v6 = vadd.f32 %v6722_v17, %v4107_v43  ;;  %v4139_v35 = vmax.f32 %v4113_v57, 0.0 }
0x1a80   :  { %v5213_v58 = vpop.f32.mrf.mxu0 }
0x1a81   :  { %v4138_v30 = vmax.f32 %v4108_v6, 0.0  ;;  %v4123_v36 = vadd.f32 %v5213_v58, %v6722_v17 }
0x1a82   :  { %v4117_v22 = vpop.f32.mrf.mxu0 }
0x1a83   :  { %v4118_v32 = vadd.f32 %v6722_v17, %v4117_v22  ;;  %v4141_v23 = vmax.f32 %v4123_v36, 0.0 }
0x1a85   :  { %v4140_v31 = vmax.f32 %v4118_v32, 0.0 }
0x1aa8   :  { %v3870_v10 = vpop.permute.xlu1 %3869 }
0x1aa9   :  { %v3872_v56 = vadd.f32 %v3870_v10, %v3862_v4 }
0x1aab   :  { %5468 = vtanh.f32 %v3872_v56 }
0x1ab8   :  { %v5469_v42 = vpop.eup %5468 }
0x1ab9   :  { %3875 = vrot.lane.b32.xlu0 %v5469_v42, %s5757_s1 }
0x1b2b   :  { %v3876_v47 = vpop.permute.xlu0 %3875 }
0x1b2c   :  { %v3878_v8 = vmul.f32 %v5467_v28, %v3876_v47 }
0x1b2e   :  { %3891 = vrot.lane.b32.xlu1 %v3878_v8, %s5758_s22 }
0x1ba0   :  { %v3892_v21 = vpop.permute.xlu1 %3891 }
0x1ba1   :  { %5171 = vmatmul.mubr.msk.f32.gmra.mxu1 %vm348_vm1, %v3892_v21 }
0x1ba2   :  { %5249 = vmatprep.mubr.f32.mxu1 %v4136_v1 }
0x1ba5   :  { %5250 = vmatmul.mubr.f32.vlgmr.msra.gmra.mxu1 %v4137_v9 }
0x1ba6   :  { %5252 = vmatprep.mubr.f32.mxu1 %v4138_v30 }
0x1ba9   :  { %5253 = vmatmul.mubr.f32.gmra.mxu1 %v4139_v35 }
0x1baa   :  { %5255 = vmatprep.mubr.f32.mxu1 %v4140_v31 }
0x1bad   :  { %5256 = vmatmul.mubr.f32.gmra.mxu1 %v4141_v23 }
0x1c61   :  { %v5172_v7 = vpop.f32.mrf.mxu1 }
0x1c62   :  { %v3997_v48 = vadd.f32 %v5172_v7, %v6706_v5 }
0x1c63   :  { %v3991_v60 = vpop.f32.mrf.mxu1 }
0x1c64   :  { %v3992_v40 = vadd.f32 %v6706_v5, %v3991_v60  ;;  %v4007_v25 = vmax.f32 %v3997_v48, 0.0 }
0x1c65   :  { %v5251_v38 = vpop.f32.mrf.mxu1 }
0x1c66   :  { %v4006_v0 = vmax.f32 %v3992_v40, 0.0  ;;  %v4239_v13 = vadd.f32 %v5251_v38, %v4384_v61 }
0x1c67   :  { %v4233_v45 = vpop.f32.mrf.mxu1 }
0x1c68   :  { %5470 = vtanh.f32 %v4239_v13  ;;  %v4234_v12 = vadd.f32 %v4384_v61, %v4233_v45  ;;  %5214 = vmatprep.mubr.f32.mxu0 %v4006_v0 }
0x1c69   :  { %5215 = vmatmul.mubr.f32.gmra.mxu0 %v4007_v25  ;;  %v5254_v52 = vpop.f32.mrf.mxu1 }
0x1c6a   :  { %5472 = vtanh.f32 %v4234_v12  ;;  %v4249_v20 = vadd.f32 %v5254_v52, %v4384_v61 }
0x1c6b   :  { %v4243_v53 = vpop.f32.mrf.mxu1 }
0x1c6c   :  { %5474 = vtanh.f32 %v4249_v20  ;;  %v4244_v54 = vadd.f32 %v4384_v61, %v4243_v53 }
0x1c6d   :  { %v5257_v59 = vpop.f32.mrf.mxu1 }
0x1c6e   :  { %5476 = vtanh.f32 %v4244_v54  ;;  %v4259_v19 = vadd.f32 %v5257_v59, %v4384_v61 }
0x1c6f   :  { %v4253_v27 = vpop.f32.mrf.mxu1 }
0x1c70   :  { %5478 = vtanh.f32 %v4259_v19  ;;  %v4254_v5 = vadd.f32 %v4384_v61, %v4253_v27 }
0x1c72   :  { %5480 = vtanh.f32 %v4254_v5 }
0x1c75   :  { %v5471_v28 = vpop.eup %5470 }
0x1c76   :  { %4281 = vst [vmem:[#allocation19 + $0x8] sm:$0xff] %v5471_v28 }
0x1c77   :  { %v5473_v34 = vpop.eup %5472 }
0x1c78   :  { %4280 = vst [vmem:[#allocation19] sm:$0xff] %v5473_v34 }
0x1c79   :  { %v5475_v3 = vpop.eup %5474 }
0x1c7a   :  { %4283 = vst [vmem:[#allocation19 + $0x18] sm:$0xff] %v5475_v3 }
0x1c7b   :  { %v5477_v4 = vpop.eup %5476 }
0x1c7c   :  { %4282 = vst [vmem:[#allocation19 + $0x10] sm:$0xff] %v5477_v4 }
0x1c7d   :  { %v5479_v10 = vpop.eup %5478 }
0x1c7e   :  { %4285 = vst [vmem:[#allocation19 + $0x28] sm:$0xff] %v5479_v10 }
0x1c7f   :  { %v5481_v56 = vpop.eup %5480 }
0x1c80   :  { %4284 = vst [vmem:[#allocation19 + $0x20] sm:$0xff] %v5481_v56 }
0x1d29   :  { %v5216_v16 = vpop.f32.mrf.mxu0 }
0x1d2a   :  { %v4133_v62 = vadd.f32 %v5216_v16, %v6722_v17 }
0x1d2b   :  { %v4127_v63 = vpop.f32.mrf.mxu0 }
0x1d2c   :  { %v4128_v44 = vadd.f32 %v6722_v17, %v4127_v63  ;;  %v4143_v26 = vmax.f32 %v4133_v62, 0.0 }
0x1d2e   :  { %v4142_v41 = vmax.f32 %v4128_v44, 0.0 }
0x1d30   :  { %5258 = vmatprep.mubr.f32.mxu1 %v4142_v41 }
0x1d31   :  { %5259 = vmatmul.mubr.f32.gmra.mxu1 %v4143_v26 }
0x1df1   :  { %v5260_v42 = vpop.f32.mrf.mxu1 }
0x1df2   :  { %v4269_v55 = vadd.f32 %v5260_v42, %v4384_v61 }
0x1df3   :  { %v4263_v14 = vpop.f32.mrf.mxu1 }
0x1df4   :  { %5482 = vtanh.f32 %v4269_v55  ;;  %v4264_v15 = vadd.f32 %v4384_v61, %v4263_v14 }
0x1df6   :  { %5484 = vtanh.f32 %v4264_v15 }
0x1e01   :  { %v5483_v46 = vpop.eup %5482 }
0x1e02   :  { %4287 = vst [vmem:[#allocation19 + $0x38] sm:$0xff] %v5483_v46 }
0x1e03   :  { %v5485_v18 = vpop.eup %5484 }
0x1e04   :  { %4286 = vst [vmem:[#allocation19 + $0x30] sm:$0xff] %v5485_v18 }
0x1e05   :  { %5720 = shalt.err (!%p5717_p12)
}
0x1e06   :  { %4299 = dma.vmem_to_hbm [thread:$0]  %s4294_s18, 1024, %s6760_s16, [#allocation4], %s5745_s26, %s5745_s26, %s5746_s27  }
0x1e07   :  { %5741 = dma.done.wait [#allocation4], 1024  }
0x1e08   :  { %5742 = vsyncadd [#allocation4], 4294966272 }
0x1e09   :  { %4303 = vsyncpa [#allocation3], 1 }
0x1e0a   :  { %4304 = vsyncpa [#allocation6], 1 }
0x1e0b   :  { %4305 = vsyncpa [#allocation9], 1 }
0x1e0c   :  { %4306 = vsyncpa [#allocation12], 1 }
0x1e0d   :  { %4307 = vsyncpa [#allocation15], 1 }
0x1e0e   :  { %4308 = vsyncpa [#allocation18], 1 }
0x1e0f   :  { %4309 = vsyncpa [#allocation4], 1 }

</bundles_post_ra>
